<compile_context>
chip_gen: v6e
topology: v6e:2x2x1
jax: 0.10.0
libtpu: 0.0.40
codegen_flags: <defaults>
</compile_context>

<pallas_src>
import functools

import jax
import jax.numpy as jnp
from jax.experimental import pallas as pl
from jax.experimental.pallas import tpu as pltpu


def _round_up(x, m):
    return ((x + m - 1) // m) * m


# ----------------------------------------------------------------------------
# Generic row-tiled linear kernel:  Y = X @ W + b.
# Used for the hoisted encoder/decoder input-gate projections and for fc_out.
# ----------------------------------------------------------------------------
def _linear_kernel(x_ref, w_ref, b_ref, o_ref):
    o_ref[...] = (jnp.dot(x_ref[...], w_ref[...],
                          preferred_element_type=jnp.float32)
                  + b_ref[...])


def linear_pallas(x, w, b, tm=256):
    M, K = x.shape
    N = w.shape[1]
    tm = min(tm, _round_up(M, 8))          # tile rows; multiple of 8 sublanes
    Mp = _round_up(M, tm)
    if Mp != M:
        x = jnp.pad(x, ((0, Mp - M), (0, 0)))
    out = pl.pallas_call(
        _linear_kernel,
        out_shape=jax.ShapeDtypeStruct((Mp, N), jnp.float32),
        grid_spec=pltpu.PrefetchScalarGridSpec(
            num_scalar_prefetch=0,
            grid=(Mp // tm,),
            in_specs=[
                pl.BlockSpec((tm, K), lambda i: (i, 0)),
                pl.BlockSpec((K, N), lambda i: (0, 0)),   # weight resident
                pl.BlockSpec((1, N), lambda i: (0, 0)),
            ],
            out_specs=pl.BlockSpec((tm, N), lambda i: (i, 0)),
        ),
        compiler_params=pltpu.CompilerParams(
            dimension_semantics=("parallel",)),
    )(x, w, b)
    return out[:M]


# ----------------------------------------------------------------------------
# Fused encoder+decoder recurrence. grid=() : whole (small) sequence resident
# in VMEM; (h, c) live in vregs as fori_loop carries. Per step only h @ W_hh
# is computed — the input projections were precomputed by linear_pallas.
# The encoder mask reproduces pack_padded_sequence semantics (state freezes
# once t >= length[b]); padded batch rows have length 0 and stay at zero.
# ----------------------------------------------------------------------------
def _recurrence_kernel(lens_ref, enc_g_ref, dec_g_ref, enc_whh_ref,
                       dec_whh_ref, h_all_ref, *, H, T_src, T_dec):
    B = enc_g_ref.shape[1]
    lens = lens_ref[...]                              # (B, 1) int32
    enc_whh = enc_whh_ref[...]                        # (H, 4H), resident
    dec_whh = dec_whh_ref[...]

    def cell(gates, c):                               # gate order: i, f, g, o
        i = jax.nn.sigmoid(gates[:, 0:H])
        f = jax.nn.sigmoid(gates[:, H:2 * H])
        g = jnp.tanh(gates[:, 2 * H:3 * H])
        o = jax.nn.sigmoid(gates[:, 3 * H:4 * H])
        c_new = f * c + i * g
        h_new = o * jnp.tanh(c_new)
        return h_new, c_new

    def enc_step(t, carry):
        h, c = carry
        gates = enc_g_ref[t] + jnp.dot(h, enc_whh,
                                       preferred_element_type=jnp.float32)
        h_new, c_new = cell(gates, c)
        valid = t < lens                              # (B, 1) bool
        return jnp.where(valid, h_new, h), jnp.where(valid, c_new, c)

    h0 = jnp.zeros((B, H), jnp.float32)
    c0 = jnp.zeros((B, H), jnp.float32)
    h, c = jax.lax.fori_loop(0, T_src, enc_step, (h0, c0), unroll=True)

    def dec_step(t, carry):
        h, c = carry
        gates = dec_g_ref[t] + jnp.dot(h, dec_whh,
                                       preferred_element_type=jnp.float32)
        h_new, c_new = cell(gates, c)
        h_all_ref[t] = h_new                          # logits computed later
        return h_new, c_new

    jax.lax.fori_loop(0, T_dec, dec_step, (h, c), unroll=True)


def recurrence_pallas(lens_col, enc_gates, dec_gates, enc_whh, dec_whh,
                      *, T_src, T_dec):
    Bp = enc_gates.shape[1]
    H = enc_whh.shape[0]
    return pl.pallas_call(
        functools.partial(_recurrence_kernel, H=H, T_src=T_src, T_dec=T_dec),
        out_shape=jax.ShapeDtypeStruct((T_dec, Bp, H), jnp.float32),
    )(lens_col, enc_gates, dec_gates, enc_whh, dec_whh)


# ----------------------------------------------------------------------------
# Parameter construction (deterministic, PyTorch-shaped) and full forward.
# ----------------------------------------------------------------------------
def make_params(key, in_vocab, tgt_vocab, E, H, pad_idx=0):
    ks = jax.random.split(key, 12)
    k = 1.0 / jnp.sqrt(jnp.float32(H))

    def u(kk, shape, scale):
        return jax.random.uniform(kk, shape, jnp.float32, -scale, scale)

    enc_emb = jax.random.normal(ks[0], (in_vocab, E), jnp.float32)
    enc_emb = enc_emb.at[pad_idx].set(0.0)
    dec_emb = jax.random.normal(ks[1], (tgt_vocab, E), jnp.float32)
    dec_emb = dec_emb.at[pad_idx].set(0.0)
    return dict(
        enc_emb=enc_emb,
        dec_emb=dec_emb,
        # LSTM weights pre-transposed: x @ W_ih, h @ W_hh ; gate order i,f,g,o.
        enc_wih=u(ks[2], (E, 4 * H), k),
        enc_whh=u(ks[3], (H, 4 * H), k),
        enc_b=u(ks[4], (1, 4 * H), k) + u(ks[5], (1, 4 * H), k),  # b_ih + b_hh
        dec_wih=u(ks[6], (E, 4 * H), k),
        dec_whh=u(ks[7], (H, 4 * H), k),
        dec_b=u(ks[8], (1, 4 * H), k) + u(ks[9], (1, 4 * H), k),
        # fc_out: Linear(H, V)
        dec_wfc=u(ks[10], (H, tgt_vocab), 1.0 / jnp.sqrt(jnp.float32(H))),
        dec_bfc=u(ks[11], (1, tgt_vocab), 1.0 / jnp.sqrt(jnp.float32(H))),
    )


def seq2seq_forward(params, native_tokens, native_lens, roman_tokens):
    B, T_src = native_tokens.shape
    T_tgt = roman_tokens.shape[1]
    T_dec = T_tgt - 1
    H = params["enc_whh"].shape[0]
    E = params["enc_emb"].shape[1]
    V = params["dec_emb"].shape[0]

    B_pad = max(8, _round_up(B, 8))            # pad batch to sublane multiple

    # Time-major token ids (transpose the tiny int matrices, not activations).
    src_ids_tm = jnp.transpose(native_tokens)                 # (T_src, B)
    dec_ids_tm = jnp.transpose(roman_tokens[:, :T_dec])       # (T_dec, B)
    lens = native_lens.astype(jnp.int32)
    if B_pad != B:
        src_ids_tm = jnp.pad(src_ids_tm, ((0, 0), (0, B_pad - B)))
        dec_ids_tm = jnp.pad(dec_ids_tm, ((0, 0), (0, B_pad - B)))
        lens = jnp.pad(lens, (0, B_pad - B))   # len 0 -> padded rows stay zero

    emb_src_tm = params["enc_emb"][src_ids_tm]                # (T_src, Bp, E)
    emb_dec_tm = params["dec_emb"][dec_ids_tm]                # (T_dec, Bp, E)

    # Hoisted input projections: one big MXU matmul per phase.
    enc_gates = linear_pallas(emb_src_tm.reshape(T_src * B_pad, E),
                              params["enc_wih"], params["enc_b"])
    enc_gates = enc_gates.reshape(T_src, B_pad, 4 * H)
    dec_gates = linear_pallas(emb_dec_tm.reshape(T_dec * B_pad, E),
                              params["dec_wih"], params["dec_b"])
    dec_gates = dec_gates.reshape(T_dec, B_pad, 4 * H)

    # Fused encoder+decoder recurrence: only h @ W_hh on the critical path.
    lens_col = lens.reshape(B_pad, 1)
    h_all = recurrence_pallas(lens_col, enc_gates, dec_gates,
                              params["enc_whh"], params["dec_whh"],
                              T_src=T_src, T_dec=T_dec)       # (T_dec, Bp, H)

    # Hoisted fc_out: one big (T_dec*Bp, H) @ (H, V) matmul.
    logits = linear_pallas(h_all.reshape(T_dec * B_pad, H),
                           params["dec_wfc"], params["dec_bfc"])
    logits_tm = logits.reshape(T_dec, B_pad, V)[:, :B]        # (T_dec, B, V)

    # outputs[:, 0] stays zero, exactly as in the PyTorch loop.
    outputs = jnp.concatenate(
        [jnp.zeros((B, 1, V), jnp.float32),
         jnp.transpose(logits_tm, (1, 0, 2))], axis=1)        # (B, T_tgt, V)
    return outputs


# ----------------------------------------------------------------------------
# Pure-JAX reference for a correctness check.
# ----------------------------------------------------------------------------
def reference_forward(params, native_tokens, native_lens, roman_tokens):
    H = params["enc_whh"].shape[0]
    B, T_src = native_tokens.shape
    V = params["dec_emb"].shape[0]
    T_tgt = roman_tokens.shape[1]
    emb = params["enc_emb"][native_tokens]

    def cell(x, h, c, wih, whh, b):
        gates = x @ wih + h @ whh + b
        i = jax.nn.sigmoid(gates[:, :H])
        f = jax.nn.sigmoid(gates[:, H:2 * H])
        g = jnp.tanh(gates[:, 2 * H:3 * H])
        o = jax.nn.sigmoid(gates[:, 3 * H:])
        c_new = f * c + i * g
        return o * jnp.tanh(c_new), c_new

    h = jnp.zeros((B, H), jnp.float32)
    c = jnp.zeros((B, H), jnp.float32)
    for t in range(T_src):
        h_new, c_new = cell(emb[:, t], h, c, params["enc_wih"],
                            params["enc_whh"], params["enc_b"])
        m = (t < native_lens).astype(jnp.float32)[:, None]
        h = m * h_new + (1 - m) * h
        c = m * c_new + (1 - m) * c

    outs = [jnp.zeros((B, V), jnp.float32)]
    for t in range(T_tgt - 1):
        x = params["dec_emb"][roman_tokens[:, t]]
        h, c = cell(x, h, c, params["dec_wih"], params["dec_whh"],
                    params["dec_b"])
        outs.append(h @ params["dec_wfc"] + params["dec_bfc"][0])
    return jnp.stack(outs, axis=1)


if __name__ == "__main__":
    key = jax.random.PRNGKey(0)
    k_par, k_src, k_tgt = jax.random.split(key, 3)

    B, T_SRC, T_TGT = 2, 8, 6
    IN_VOCAB, TGT_VOCAB = 24, 32
    E, H = 32, 128               # H multiple of 128 keeps gate slices aligned

    params = make_params(k_par, IN_VOCAB, TGT_VOCAB, E, H)

    native_tensor = jax.random.randint(k_src, (B, T_SRC), 1, IN_VOCAB,
                                       dtype=jnp.int32)
    native_tensor_len = jnp.array([T_SRC, 5], dtype=jnp.int32)
    roman_tensor = jax.random.randint(k_tgt, (B, T_TGT), 1, TGT_VOCAB,
                                      dtype=jnp.int32)

    out = jax.jit(seq2seq_forward)(params, native_tensor, native_tensor_len,
                                   roman_tensor)
    out = jax.block_until_ready(out)

    ref = jax.block_until_ready(
        reference_forward(params, native_tensor, native_tensor_len,
                          roman_tensor))

    assert out.shape == (B, T_TGT, TGT_VOCAB), out.shape
    assert jnp.allclose(out, ref, atol=1e-4, rtol=1e-4), (
        float(jnp.max(jnp.abs(out - ref))))
    print("KERNEL_OK")
</pallas_src>

<mosaic_0001>
module attributes {stable_mosaic.version = 11 : i64} {
  func.func @_linear_kernel(%arg0: i32, %arg1: memref<40x32xf32, #tpu.memory_space<vmem>>, %arg2: memref<32x512xf32, #tpu.memory_space<vmem>>, %arg3: memref<1x512xf32, #tpu.memory_space<vmem>>, %arg4: memref<40x512xf32, #tpu.memory_space<vmem>>) attributes {dimension_semantics = [#tpu.dimension_semantics<parallel>], iteration_bounds = array<i64: 1>, scalar_prefetch = 0 : i64, scratch_operands = 0 : i64, tpu.core_type = #tpu.core_type<tc>, window_params = [{transform_indices = @transform_0, window_bounds = array<i64: 40, 32>}, {pipeline_mode = #tpu.pipeline_mode<synchronous>, transform_indices = @transform_1, window_bounds = array<i64: 32, 512>}, {pipeline_mode = #tpu.pipeline_mode<synchronous>, transform_indices = @transform_2, window_bounds = array<i64: 1, 512>}, {transform_indices = @transform_3, window_bounds = array<i64: 40, 512>}]} {
    %c0 = arith.constant 0 : index
    %c0_0 = arith.constant 0 : index
    %0 = vector.load %arg1[%c0, %c0_0] : memref<40x32xf32, #tpu.memory_space<vmem>>, vector<40x32xf32>
    %c0_1 = arith.constant 0 : index
    %c0_2 = arith.constant 0 : index
    %1 = vector.load %arg2[%c0_1, %c0_2] : memref<32x512xf32, #tpu.memory_space<vmem>>, vector<32x512xf32>
    %cst = arith.constant dense<0.000000e+00> : vector<40x512xf32>
    %2 = tpu.matmul %0, %1, %cst {dimension_numbers = #tpu.dot_dimension_numbers<[1], [0], [0], [1], [0, 0, 1, 1], [], []>} : vector<40x32xf32>, vector<32x512xf32>, vector<40x512xf32> -> vector<40x512xf32>
    %c0_3 = arith.constant 0 : index
    %c0_4 = arith.constant 0 : index
    %3 = vector.load %arg3[%c0_3, %c0_4] : memref<1x512xf32, #tpu.memory_space<vmem>>, vector<1x512xf32>
    %4 = vector.broadcast %3 : vector<1x512xf32> to vector<40x512xf32>
    %5 = arith.addf %2, %4 : vector<40x512xf32>
    %c0_5 = arith.constant 0 : index
    %c0_6 = arith.constant 0 : index
    %6 = vector.load %arg4[%c0_5, %c0_6] : memref<40x512xf32, #tpu.memory_space<vmem>>, vector<40x512xf32>
    tpu.vector_store %arg4[%c0_5, %c0_6], %5 {strides = array<i32>} : memref<40x512xf32, #tpu.memory_space<vmem>>, vector<40x512xf32>,
    return
  }
  func.func @transform_0(%arg0: i32) -> (i32, i32) {
    %c0_i32 = arith.constant 0 : i32
    %c0_i32_0 = arith.constant 0 : i32
    return %arg0, %c0_i32 : i32, i32
  }
  func.func @transform_1(%arg0: i32) -> (i32, i32) {
    %c0_i32 = arith.constant 0 : i32
    %c0_i32_0 = arith.constant 0 : i32
    %c0_i32_1 = arith.constant 0 : i32
    return %c0_i32, %c0_i32_0 : i32, i32
  }
  func.func @transform_2(%arg0: i32) -> (i32, i32) {
    %c0_i32 = arith.constant 0 : i32
    %c0_i32_0 = arith.constant 0 : i32
    %c0_i32_1 = arith.constant 0 : i32
    return %c0_i32, %c0_i32_0 : i32, i32
  }
  func.func @transform_3(%arg0: i32) -> (i32, i32) {
    %c0_i32 = arith.constant 0 : i32
    %c0_i32_0 = arith.constant 0 : i32
    return %arg0, %c0_i32 : i32, i32
  }
}

module attributes {stable_mosaic.version = 11 : i64} {
  func.func @_linear_kernel(%arg0: i32, %arg1: memref<64x32xf32, #tpu.memory_space<vmem>>, %arg2: memref<32x512xf32, #tpu.memory_space<vmem>>, %arg3: memref<1x512xf32, #tpu.memory_space<vmem>>, %arg4: memref<64x512xf32, #tpu.memory_space<vmem>>) attributes {dimension_semantics = [#tpu.dimension_semantics<parallel>], iteration_bounds = array<i64: 1>, scalar_prefetch = 0 : i64, scratch_operands = 0 : i64, tpu.core_type = #tpu.core_type<tc>, window_params = [{transform_indices = @transform_0, window_bounds = array<i64: 64, 32>}, {pipeline_mode = #tpu.pipeline_mode<synchronous>, transform_indices = @transform_1, window_bounds = array<i64: 32, 512>}, {pipeline_mode = #tpu.pipeline_mode<synchronous>, transform_indices = @transform_2, window_bounds = array<i64: 1, 512>}, {transform_indices = @transform_3, window_bounds = array<i64: 64, 512>}]} {
    %c0 = arith.constant 0 : index
    %c0_0 = arith.constant 0 : index
    %0 = vector.load %arg1[%c0, %c0_0] : memref<64x32xf32, #tpu.memory_space<vmem>>, vector<64x32xf32>
    %c0_1 = arith.constant 0 : index
    %c0_2 = arith.constant 0 : index
    %1 = vector.load %arg2[%c0_1, %c0_2] : memref<32x512xf32, #tpu.memory_space<vmem>>, vector<32x512xf32>
    %cst = arith.constant dense<0.000000e+00> : vector<64x512xf32>
    %2 = tpu.matmul %0, %1, %cst {dimension_numbers = #tpu.dot_dimension_numbers<[1], [0], [0], [1], [0, 0, 1, 1], [], []>} : vector<64x32xf32>, vector<32x512xf32>, vector<64x512xf32> -> vector<64x512xf32>
    %c0_3 = arith.constant 0 : index
    %c0_4 = arith.constant 0 : index
    %3 = vector.load %arg3[%c0_3, %c0_4] : memref<1x512xf32, #tpu.memory_space<vmem>>, vector<1x512xf32>
    %4 = vector.broadcast %3 : vector<1x512xf32> to vector<64x512xf32>
    %5 = arith.addf %2, %4 : vector<64x512xf32>
    %c0_5 = arith.constant 0 : index
    %c0_6 = arith.constant 0 : index
    %6 = vector.load %arg4[%c0_5, %c0_6] : memref<64x512xf32, #tpu.memory_space<vmem>>, vector<64x512xf32>
    tpu.vector_store %arg4[%c0_5, %c0_6], %5 {strides = array<i32>} : memref<64x512xf32, #tpu.memory_space<vmem>>, vector<64x512xf32>,
    return
  }
  func.func @transform_0(%arg0: i32) -> (i32, i32) {
    %c0_i32 = arith.constant 0 : i32
    %c0_i32_0 = arith.constant 0 : i32
    return %arg0, %c0_i32 : i32, i32
  }
  func.func @transform_1(%arg0: i32) -> (i32, i32) {
    %c0_i32 = arith.constant 0 : i32
    %c0_i32_0 = arith.constant 0 : i32
    %c0_i32_1 = arith.constant 0 : i32
    return %c0_i32, %c0_i32_0 : i32, i32
  }
  func.func @transform_2(%arg0: i32) -> (i32, i32) {
    %c0_i32 = arith.constant 0 : i32
    %c0_i32_0 = arith.constant 0 : i32
    %c0_i32_1 = arith.constant 0 : i32
    return %c0_i32, %c0_i32_0 : i32, i32
  }
  func.func @transform_3(%arg0: i32) -> (i32, i32) {
    %c0_i32 = arith.constant 0 : i32
    %c0_i32_0 = arith.constant 0 : i32
    return %arg0, %c0_i32 : i32, i32
  }
}

module attributes {stable_mosaic.version = 11 : i64} {
  func.func @_linear_kernel(%arg0: i32, %arg1: memref<40x128xf32, #tpu.memory_space<vmem>>, %arg2: memref<128x32xf32, #tpu.memory_space<vmem>>, %arg3: memref<1x32xf32, #tpu.memory_space<vmem>>, %arg4: memref<40x32xf32, #tpu.memory_space<vmem>>) attributes {dimension_semantics = [#tpu.dimension_semantics<parallel>], iteration_bounds = array<i64: 1>, scalar_prefetch = 0 : i64, scratch_operands = 0 : i64, tpu.core_type = #tpu.core_type<tc>, window_params = [{transform_indices = @transform_0, window_bounds = array<i64: 40, 128>}, {pipeline_mode = #tpu.pipeline_mode<synchronous>, transform_indices = @transform_1, window_bounds = array<i64: 128, 32>}, {pipeline_mode = #tpu.pipeline_mode<synchronous>, transform_indices = @transform_2, window_bounds = array<i64: 1, 32>}, {transform_indices = @transform_3, window_bounds = array<i64: 40, 32>}]} {
    %c0 = arith.constant 0 : index
    %c0_0 = arith.constant 0 : index
    %0 = vector.load %arg1[%c0, %c0_0] : memref<40x128xf32, #tpu.memory_space<vmem>>, vector<40x128xf32>
    %c0_1 = arith.constant 0 : index
    %c0_2 = arith.constant 0 : index
    %1 = vector.load %arg2[%c0_1, %c0_2] : memref<128x32xf32, #tpu.memory_space<vmem>>, vector<128x32xf32>
    %cst = arith.constant dense<0.000000e+00> : vector<40x32xf32>
    %2 = tpu.matmul %0, %1, %cst {dimension_numbers = #tpu.dot_dimension_numbers<[1], [0], [0], [1], [0, 0, 1, 1], [], []>} : vector<40x128xf32>, vector<128x32xf32>, vector<40x32xf32> -> vector<40x32xf32>
    %c0_3 = arith.constant 0 : index
    %c0_4 = arith.constant 0 : index
    %3 = vector.load %arg3[%c0_3, %c0_4] : memref<1x32xf32, #tpu.memory_space<vmem>>, vector<1x32xf32>
    %4 = vector.broadcast %3 : vector<1x32xf32> to vector<40x32xf32>
    %5 = arith.addf %2, %4 : vector<40x32xf32>
    %c0_5 = arith.constant 0 : index
    %c0_6 = arith.constant 0 : index
    %6 = vector.load %arg4[%c0_5, %c0_6] : memref<40x32xf32, #tpu.memory_space<vmem>>, vector<40x32xf32>
    tpu.vector_store %arg4[%c0_5, %c0_6], %5 {strides = array<i32>} : memref<40x32xf32, #tpu.memory_space<vmem>>, vector<40x32xf32>,
    return
  }
  func.func @transform_0(%arg0: i32) -> (i32, i32) {
    %c0_i32 = arith.constant 0 : i32
    %c0_i32_0 = arith.constant 0 : i32
    return %arg0, %c0_i32 : i32, i32
  }
  func.func @transform_1(%arg0: i32) -> (i32, i32) {
    %c0_i32 = arith.constant 0 : i32
    %c0_i32_0 = arith.constant 0 : i32
    %c0_i32_1 = arith.constant 0 : i32
    return %c0_i32, %c0_i32_0 : i32, i32
  }
  func.func @transform_2(%arg0: i32) -> (i32, i32) {
    %c0_i32 = arith.constant 0 : i32
    %c0_i32_0 = arith.constant 0 : i32
    %c0_i32_1 = arith.constant 0 : i32
    return %c0_i32, %c0_i32_0 : i32, i32
  }
  func.func @transform_3(%arg0: i32) -> (i32, i32) {
    %c0_i32 = arith.constant 0 : i32
    %c0_i32_0 = arith.constant 0 : i32
    return %arg0, %c0_i32 : i32, i32
  }
}

module attributes {stable_mosaic.version = 11 : i64} {
  func.func @_recurrence_kernel(%arg0: memref<8x1xi32, #tpu.memory_space<vmem>>, %arg1: memref<8x8x512xf32, #tpu.memory_space<vmem>>, %arg2: memref<5x8x512xf32, #tpu.memory_space<vmem>>, %arg3: memref<128x512xf32, #tpu.memory_space<vmem>>, %arg4: memref<128x512xf32, #tpu.memory_space<vmem>>, %arg5: memref<5x8x128xf32, #tpu.memory_space<vmem>>) attributes {dimension_semantics = [], scalar_prefetch = 0 : i64, scratch_operands = 0 : i64, tpu.core_type = #tpu.core_type<tc>} {
    %c0 = arith.constant 0 : index
    %c0_0 = arith.constant 0 : index
    %0 = vector.load %arg0[%c0, %c0_0] : memref<8x1xi32, #tpu.memory_space<vmem>>, vector<8x1xi32>
    %c0_1 = arith.constant 0 : index
    %c0_2 = arith.constant 0 : index
    %1 = vector.load %arg3[%c0_1, %c0_2] : memref<128x512xf32, #tpu.memory_space<vmem>>, vector<128x512xf32>
    %c0_3 = arith.constant 0 : index
    %c0_4 = arith.constant 0 : index
    %2 = vector.load %arg4[%c0_3, %c0_4] : memref<128x512xf32, #tpu.memory_space<vmem>>, vector<128x512xf32>
    %cst = arith.constant 0.000000e+00 : f32
    %3 = vector.broadcast %cst : f32 to vector<8x128xf32>
    %cst_5 = arith.constant 0.000000e+00 : f32
    %4 = vector.broadcast %cst_5 : f32 to vector<8x128xf32>
    %c0_i32 = arith.constant 0 : i32
    %5 = arith.index_cast %c0_i32 : i32 to index
    %c0_6 = arith.constant 0 : index
    %c0_7 = arith.constant 0 : index
    %6 = vector.load %arg1[%5, %c0_6, %c0_7] : memref<8x8x512xf32, #tpu.memory_space<vmem>>, vector<1x8x512xf32>
    %7 = vector.shape_cast %6 : vector<1x8x512xf32> to vector<8x512xf32>
    %cst_8 = arith.constant dense<0.000000e+00> : vector<8x512xf32>
    %8 = tpu.matmul %3, %1, %cst_8 {dimension_numbers = #tpu.dot_dimension_numbers<[1], [0], [0], [1], [0, 0, 1, 1], [], []>} : vector<8x128xf32>, vector<128x512xf32>, vector<8x512xf32> -> vector<8x512xf32>
    %9 = arith.addf %7, %8 : vector<8x512xf32>
    %10 = vector.extract_strided_slice %9 {offsets = [0, 0], sizes = [8, 128], strides = [1, 1]} : vector<8x512xf32> to vector<8x128xf32>
    %11 = arith.negf %10 : vector<8x128xf32>
    %12 = math.exp %11 : vector<8x128xf32>
    %cst_9 = arith.constant 1.000000e+00 : f32
    %13 = vector.broadcast %cst_9 : f32 to vector<8x128xf32>
    %14 = arith.addf %13, %12 : vector<8x128xf32>
    %15 = arith.divf %13, %14 : vector<8x128xf32>
    %16 = vector.extract_strided_slice %9 {offsets = [0, 128], sizes = [8, 128], strides = [1, 1]} : vector<8x512xf32> to vector<8x128xf32>
    %17 = arith.negf %16 : vector<8x128xf32>
    %18 = math.exp %17 : vector<8x128xf32>
    %cst_10 = arith.constant 1.000000e+00 : f32
    %19 = vector.broadcast %cst_10 : f32 to vector<8x128xf32>
    %20 = arith.addf %19, %18 : vector<8x128xf32>
    %21 = arith.divf %19, %20 : vector<8x128xf32>
    %22 = vector.extract_strided_slice %9 {offsets = [0, 256], sizes = [8, 128], strides = [1, 1]} : vector<8x512xf32> to vector<8x128xf32>
    %23 = math.tanh %22 : vector<8x128xf32>
    %24 = vector.extract_strided_slice %9 {offsets = [0, 384], sizes = [8, 128], strides = [1, 1]} : vector<8x512xf32> to vector<8x128xf32>
    %25 = arith.negf %24 : vector<8x128xf32>
    %26 = math.exp %25 : vector<8x128xf32>
    %cst_11 = arith.constant 1.000000e+00 : f32
    %27 = vector.broadcast %cst_11 : f32 to vector<8x128xf32>
    %28 = arith.addf %27, %26 : vector<8x128xf32>
    %29 = arith.divf %27, %28 : vector<8x128xf32>
    %30 = arith.mulf %21, %4 : vector<8x128xf32>
    %31 = arith.mulf %15, %23 : vector<8x128xf32>
    %32 = arith.addf %30, %31 : vector<8x128xf32>
    %33 = math.tanh %32 : vector<8x128xf32>
    %34 = arith.mulf %29, %33 : vector<8x128xf32>
    %35 = vector.broadcast %c0_i32 : i32 to vector<8x1xi32>
    %36 = arith.cmpi slt, %35, %0 : vector<8x1xi32>
    %37 = vector.shape_cast %36 : vector<8x1xi1> to vector<8x1xi1>
    %38 = vector.broadcast %37 : vector<8x1xi1> to vector<8x128xi1>
    %39 = arith.select %38, %34, %3 : vector<8x128xi1>, vector<8x128xf32>
    %40 = vector.shape_cast %36 : vector<8x1xi1> to vector<8x1xi1>
    %41 = vector.broadcast %40 : vector<8x1xi1> to vector<8x128xi1>
    %42 = arith.select %41, %32, %4 : vector<8x128xi1>, vector<8x128xf32>
    %c1_i32 = arith.constant 1 : i32
    %43 = arith.index_cast %c1_i32 : i32 to index
    %c0_12 = arith.constant 0 : index
    %c0_13 = arith.constant 0 : index
    %44 = vector.load %arg1[%43, %c0_12, %c0_13] : memref<8x8x512xf32, #tpu.memory_space<vmem>>, vector<1x8x512xf32>
    %45 = vector.shape_cast %44 : vector<1x8x512xf32> to vector<8x512xf32>
    %cst_14 = arith.constant dense<0.000000e+00> : vector<8x512xf32>
    %46 = tpu.matmul %39, %1, %cst_14 {dimension_numbers = #tpu.dot_dimension_numbers<[1], [0], [0], [1], [0, 0, 1, 1], [], []>} : vector<8x128xf32>, vector<128x512xf32>, vector<8x512xf32> -> vector<8x512xf32>
    %47 = arith.addf %45, %46 : vector<8x512xf32>
    %48 = vector.extract_strided_slice %47 {offsets = [0, 0], sizes = [8, 128], strides = [1, 1]} : vector<8x512xf32> to vector<8x128xf32>
    %49 = arith.negf %48 : vector<8x128xf32>
    %50 = math.exp %49 : vector<8x128xf32>
    %cst_15 = arith.constant 1.000000e+00 : f32
    %51 = vector.broadcast %cst_15 : f32 to vector<8x128xf32>
    %52 = arith.addf %51, %50 : vector<8x128xf32>
    %53 = arith.divf %51, %52 : vector<8x128xf32>
    %54 = vector.extract_strided_slice %47 {offsets = [0, 128], sizes = [8, 128], strides = [1, 1]} : vector<8x512xf32> to vector<8x128xf32>
    %55 = arith.negf %54 : vector<8x128xf32>
    %56 = math.exp %55 : vector<8x128xf32>
    %cst_16 = arith.constant 1.000000e+00 : f32
    %57 = vector.broadcast %cst_16 : f32 to vector<8x128xf32>
    %58 = arith.addf %57, %56 : vector<8x128xf32>
    %59 = arith.divf %57, %58 : vector<8x128xf32>
    %60 = vector.extract_strided_slice %47 {offsets = [0, 256], sizes = [8, 128], strides = [1, 1]} : vector<8x512xf32> to vector<8x128xf32>
    %61 = math.tanh %60 : vector<8x128xf32>
    %62 = vector.extract_strided_slice %47 {offsets = [0, 384], sizes = [8, 128], strides = [1, 1]} : vector<8x512xf32> to vector<8x128xf32>
    %63 = arith.negf %62 : vector<8x128xf32>
    %64 = math.exp %63 : vector<8x128xf32>
    %cst_17 = arith.constant 1.000000e+00 : f32
    %65 = vector.broadcast %cst_17 : f32 to vector<8x128xf32>
    %66 = arith.addf %65, %64 : vector<8x128xf32>
    %67 = arith.divf %65, %66 : vector<8x128xf32>
    %68 = arith.mulf %59, %42 : vector<8x128xf32>
    %69 = arith.mulf %53, %61 : vector<8x128xf32>
    %70 = arith.addf %68, %69 : vector<8x128xf32>
    %71 = math.tanh %70 : vector<8x128xf32>
    %72 = arith.mulf %67, %71 : vector<8x128xf32>
    %73 = vector.broadcast %c1_i32 : i32 to vector<8x1xi32>
    %74 = arith.cmpi slt, %73, %0 : vector<8x1xi32>
    %75 = vector.shape_cast %74 : vector<8x1xi1> to vector<8x1xi1>
    %76 = vector.broadcast %75 : vector<8x1xi1> to vector<8x128xi1>
    %77 = arith.select %76, %72, %39 : vector<8x128xi1>, vector<8x128xf32>
    %78 = vector.shape_cast %74 : vector<8x1xi1> to vector<8x1xi1>
    %79 = vector.broadcast %78 : vector<8x1xi1> to vector<8x128xi1>
    %80 = arith.select %79, %70, %42 : vector<8x128xi1>, vector<8x128xf32>
    %c2_i32 = arith.constant 2 : i32
    %81 = arith.index_cast %c2_i32 : i32 to index
    %c0_18 = arith.constant 0 : index
    %c0_19 = arith.constant 0 : index
    %82 = vector.load %arg1[%81, %c0_18, %c0_19] : memref<8x8x512xf32, #tpu.memory_space<vmem>>, vector<1x8x512xf32>
    %83 = vector.shape_cast %82 : vector<1x8x512xf32> to vector<8x512xf32>
    %cst_20 = arith.constant dense<0.000000e+00> : vector<8x512xf32>
    %84 = tpu.matmul %77, %1, %cst_20 {dimension_numbers = #tpu.dot_dimension_numbers<[1], [0], [0], [1], [0, 0, 1, 1], [], []>} : vector<8x128xf32>, vector<128x512xf32>, vector<8x512xf32> -> vector<8x512xf32>
    %85 = arith.addf %83, %84 : vector<8x512xf32>
    %86 = vector.extract_strided_slice %85 {offsets = [0, 0], sizes = [8, 128], strides = [1, 1]} : vector<8x512xf32> to vector<8x128xf32>
    %87 = arith.negf %86 : vector<8x128xf32>
    %88 = math.exp %87 : vector<8x128xf32>
    %cst_21 = arith.constant 1.000000e+00 : f32
    %89 = vector.broadcast %cst_21 : f32 to vector<8x128xf32>
    %90 = arith.addf %89, %88 : vector<8x128xf32>
    %91 = arith.divf %89, %90 : vector<8x128xf32>
    %92 = vector.extract_strided_slice %85 {offsets = [0, 128], sizes = [8, 128], strides = [1, 1]} : vector<8x512xf32> to vector<8x128xf32>
    %93 = arith.negf %92 : vector<8x128xf32>
    %94 = math.exp %93 : vector<8x128xf32>
    %cst_22 = arith.constant 1.000000e+00 : f32
    %95 = vector.broadcast %cst_22 : f32 to vector<8x128xf32>
    %96 = arith.addf %95, %94 : vector<8x128xf32>
    %97 = arith.divf %95, %96 : vector<8x128xf32>
    %98 = vector.extract_strided_slice %85 {offsets = [0, 256], sizes = [8, 128], strides = [1, 1]} : vector<8x512xf32> to vector<8x128xf32>
    %99 = math.tanh %98 : vector<8x128xf32>
    %100 = vector.extract_strided_slice %85 {offsets = [0, 384], sizes = [8, 128], strides = [1, 1]} : vector<8x512xf32> to vector<8x128xf32>
    %101 = arith.negf %100 : vector<8x128xf32>
    %102 = math.exp %101 : vector<8x128xf32>
    %cst_23 = arith.constant 1.000000e+00 : f32
    %103 = vector.broadcast %cst_23 : f32 to vector<8x128xf32>
    %104 = arith.addf %103, %102 : vector<8x128xf32>
    %105 = arith.divf %103, %104 : vector<8x128xf32>
    %106 = arith.mulf %97, %80 : vector<8x128xf32>
    %107 = arith.mulf %91, %99 : vector<8x128xf32>
    %108 = arith.addf %106, %107 : vector<8x128xf32>
    %109 = math.tanh %108 : vector<8x128xf32>
    %110 = arith.mulf %105, %109 : vector<8x128xf32>
    %111 = vector.broadcast %c2_i32 : i32 to vector<8x1xi32>
    %112 = arith.cmpi slt, %111, %0 : vector<8x1xi32>
    %113 = vector.shape_cast %112 : vector<8x1xi1> to vector<8x1xi1>
    %114 = vector.broadcast %113 : vector<8x1xi1> to vector<8x128xi1>
    %115 = arith.select %114, %110, %77 : vector<8x128xi1>, vector<8x128xf32>
    %116 = vector.shape_cast %112 : vector<8x1xi1> to vector<8x1xi1>
    %117 = vector.broadcast %116 : vector<8x1xi1> to vector<8x128xi1>
    %118 = arith.select %117, %108, %80 : vector<8x128xi1>, vector<8x128xf32>
    %c3_i32 = arith.constant 3 : i32
    %119 = arith.index_cast %c3_i32 : i32 to index
    %c0_24 = arith.constant 0 : index
    %c0_25 = arith.constant 0 : index
    %120 = vector.load %arg1[%119, %c0_24, %c0_25] : memref<8x8x512xf32, #tpu.memory_space<vmem>>, vector<1x8x512xf32>
    %121 = vector.shape_cast %120 : vector<1x8x512xf32> to vector<8x512xf32>
    %cst_26 = arith.constant dense<0.000000e+00> : vector<8x512xf32>
    %122 = tpu.matmul %115, %1, %cst_26 {dimension_numbers = #tpu.dot_dimension_numbers<[1], [0], [0], [1], [0, 0, 1, 1], [], []>} : vector<8x128xf32>, vector<128x512xf32>, vector<8x512xf32> -> vector<8x512xf32>
    %123 = arith.addf %121, %122 : vector<8x512xf32>
    %124 = vector.extract_strided_slice %123 {offsets = [0, 0], sizes = [8, 128], strides = [1, 1]} : vector<8x512xf32> to vector<8x128xf32>
    %125 = arith.negf %124 : vector<8x128xf32>
    %126 = math.exp %125 : vector<8x128xf32>
    %cst_27 = arith.constant 1.000000e+00 : f32
    %127 = vector.broadcast %cst_27 : f32 to vector<8x128xf32>
    %128 = arith.addf %127, %126 : vector<8x128xf32>
    %129 = arith.divf %127, %128 : vector<8x128xf32>
    %130 = vector.extract_strided_slice %123 {offsets = [0, 128], sizes = [8, 128], strides = [1, 1]} : vector<8x512xf32> to vector<8x128xf32>
    %131 = arith.negf %130 : vector<8x128xf32>
    %132 = math.exp %131 : vector<8x128xf32>
    %cst_28 = arith.constant 1.000000e+00 : f32
    %133 = vector.broadcast %cst_28 : f32 to vector<8x128xf32>
    %134 = arith.addf %133, %132 : vector<8x128xf32>
    %135 = arith.divf %133, %134 : vector<8x128xf32>
    %136 = vector.extract_strided_slice %123 {offsets = [0, 256], sizes = [8, 128], strides = [1, 1]} : vector<8x512xf32> to vector<8x128xf32>
    %137 = math.tanh %136 : vector<8x128xf32>
    %138 = vector.extract_strided_slice %123 {offsets = [0, 384], sizes = [8, 128], strides = [1, 1]} : vector<8x512xf32> to vector<8x128xf32>
    %139 = arith.negf %138 : vector<8x128xf32>
    %140 = math.exp %139 : vector<8x128xf32>
    %cst_29 = arith.constant 1.000000e+00 : f32
    %141 = vector.broadcast %cst_29 : f32 to vector<8x128xf32>
    %142 = arith.addf %141, %140 : vector<8x128xf32>
    %143 = arith.divf %141, %142 : vector<8x128xf32>
    %144 = arith.mulf %135, %118 : vector<8x128xf32>
    %145 = arith.mulf %129, %137 : vector<8x128xf32>
    %146 = arith.addf %144, %145 : vector<8x128xf32>
    %147 = math.tanh %146 : vector<8x128xf32>
    %148 = arith.mulf %143, %147 : vector<8x128xf32>
    %149 = vector.broadcast %c3_i32 : i32 to vector<8x1xi32>
    %150 = arith.cmpi slt, %149, %0 : vector<8x1xi32>
    %151 = vector.shape_cast %150 : vector<8x1xi1> to vector<8x1xi1>
    %152 = vector.broadcast %151 : vector<8x1xi1> to vector<8x128xi1>
    %153 = arith.select %152, %148, %115 : vector<8x128xi1>, vector<8x128xf32>
    %154 = vector.shape_cast %150 : vector<8x1xi1> to vector<8x1xi1>
    %155 = vector.broadcast %154 : vector<8x1xi1> to vector<8x128xi1>
    %156 = arith.select %155, %146, %118 : vector<8x128xi1>, vector<8x128xf32>
    %c4_i32 = arith.constant 4 : i32
    %157 = arith.index_cast %c4_i32 : i32 to index
    %c0_30 = arith.constant 0 : index
    %c0_31 = arith.constant 0 : index
    %158 = vector.load %arg1[%157, %c0_30, %c0_31] : memref<8x8x512xf32, #tpu.memory_space<vmem>>, vector<1x8x512xf32>
    %159 = vector.shape_cast %158 : vector<1x8x512xf32> to vector<8x512xf32>
    %cst_32 = arith.constant dense<0.000000e+00> : vector<8x512xf32>
    %160 = tpu.matmul %153, %1, %cst_32 {dimension_numbers = #tpu.dot_dimension_numbers<[1], [0], [0], [1], [0, 0, 1, 1], [], []>} : vector<8x128xf32>, vector<128x512xf32>, vector<8x512xf32> -> vector<8x512xf32>
    %161 = arith.addf %159, %160 : vector<8x512xf32>
    %162 = vector.extract_strided_slice %161 {offsets = [0, 0], sizes = [8, 128], strides = [1, 1]} : vector<8x512xf32> to vector<8x128xf32>
    %163 = arith.negf %162 : vector<8x128xf32>
    %164 = math.exp %163 : vector<8x128xf32>
    %cst_33 = arith.constant 1.000000e+00 : f32
    %165 = vector.broadcast %cst_33 : f32 to vector<8x128xf32>
    %166 = arith.addf %165, %164 : vector<8x128xf32>
    %167 = arith.divf %165, %166 : vector<8x128xf32>
    %168 = vector.extract_strided_slice %161 {offsets = [0, 128], sizes = [8, 128], strides = [1, 1]} : vector<8x512xf32> to vector<8x128xf32>
    %169 = arith.negf %168 : vector<8x128xf32>
    %170 = math.exp %169 : vector<8x128xf32>
    %cst_34 = arith.constant 1.000000e+00 : f32
    %171 = vector.broadcast %cst_34 : f32 to vector<8x128xf32>
    %172 = arith.addf %171, %170 : vector<8x128xf32>
    %173 = arith.divf %171, %172 : vector<8x128xf32>
    %174 = vector.extract_strided_slice %161 {offsets = [0, 256], sizes = [8, 128], strides = [1, 1]} : vector<8x512xf32> to vector<8x128xf32>
    %175 = math.tanh %174 : vector<8x128xf32>
    %176 = vector.extract_strided_slice %161 {offsets = [0, 384], sizes = [8, 128], strides = [1, 1]} : vector<8x512xf32> to vector<8x128xf32>
    %177 = arith.negf %176 : vector<8x128xf32>
    %178 = math.exp %177 : vector<8x128xf32>
    %cst_35 = arith.constant 1.000000e+00 : f32
    %179 = vector.broadcast %cst_35 : f32 to vector<8x128xf32>
    %180 = arith.addf %179, %178 : vector<8x128xf32>
    %181 = arith.divf %179, %180 : vector<8x128xf32>
    %182 = arith.mulf %173, %156 : vector<8x128xf32>
    %183 = arith.mulf %167, %175 : vector<8x128xf32>
    %184 = arith.addf %182, %183 : vector<8x128xf32>
    %185 = math.tanh %184 : vector<8x128xf32>
    %186 = arith.mulf %181, %185 : vector<8x128xf32>
    %187 = vector.broadcast %c4_i32 : i32 to vector<8x1xi32>
    %188 = arith.cmpi slt, %187, %0 : vector<8x1xi32>
    %189 = vector.shape_cast %188 : vector<8x1xi1> to vector<8x1xi1>
    %190 = vector.broadcast %189 : vector<8x1xi1> to vector<8x128xi1>
    %191 = arith.select %190, %186, %153 : vector<8x128xi1>, vector<8x128xf32>
    %192 = vector.shape_cast %188 : vector<8x1xi1> to vector<8x1xi1>
    %193 = vector.broadcast %192 : vector<8x1xi1> to vector<8x128xi1>
    %194 = arith.select %193, %184, %156 : vector<8x128xi1>, vector<8x128xf32>
    %c5_i32 = arith.constant 5 : i32
    %195 = arith.index_cast %c5_i32 : i32 to index
    %c0_36 = arith.constant 0 : index
    %c0_37 = arith.constant 0 : index
    %196 = vector.load %arg1[%195, %c0_36, %c0_37] : memref<8x8x512xf32, #tpu.memory_space<vmem>>, vector<1x8x512xf32>
    %197 = vector.shape_cast %196 : vector<1x8x512xf32> to vector<8x512xf32>
    %cst_38 = arith.constant dense<0.000000e+00> : vector<8x512xf32>
    %198 = tpu.matmul %191, %1, %cst_38 {dimension_numbers = #tpu.dot_dimension_numbers<[1], [0], [0], [1], [0, 0, 1, 1], [], []>} : vector<8x128xf32>, vector<128x512xf32>, vector<8x512xf32> -> vector<8x512xf32>
    %199 = arith.addf %197, %198 : vector<8x512xf32>
    %200 = vector.extract_strided_slice %199 {offsets = [0, 0], sizes = [8, 128], strides = [1, 1]} : vector<8x512xf32> to vector<8x128xf32>
    %201 = arith.negf %200 : vector<8x128xf32>
    %202 = math.exp %201 : vector<8x128xf32>
    %cst_39 = arith.constant 1.000000e+00 : f32
    %203 = vector.broadcast %cst_39 : f32 to vector<8x128xf32>
    %204 = arith.addf %203, %202 : vector<8x128xf32>
    %205 = arith.divf %203, %204 : vector<8x128xf32>
    %206 = vector.extract_strided_slice %199 {offsets = [0, 128], sizes = [8, 128], strides = [1, 1]} : vector<8x512xf32> to vector<8x128xf32>
    %207 = arith.negf %206 : vector<8x128xf32>
    %208 = math.exp %207 : vector<8x128xf32>
    %cst_40 = arith.constant 1.000000e+00 : f32
    %209 = vector.broadcast %cst_40 : f32 to vector<8x128xf32>
    %210 = arith.addf %209, %208 : vector<8x128xf32>
    %211 = arith.divf %209, %210 : vector<8x128xf32>
    %212 = vector.extract_strided_slice %199 {offsets = [0, 256], sizes = [8, 128], strides = [1, 1]} : vector<8x512xf32> to vector<8x128xf32>
    %213 = math.tanh %212 : vector<8x128xf32>
    %214 = vector.extract_strided_slice %199 {offsets = [0, 384], sizes = [8, 128], strides = [1, 1]} : vector<8x512xf32> to vector<8x128xf32>
    %215 = arith.negf %214 : vector<8x128xf32>
    %216 = math.exp %215 : vector<8x128xf32>
    %cst_41 = arith.constant 1.000000e+00 : f32
    %217 = vector.broadcast %cst_41 : f32 to vector<8x128xf32>
    %218 = arith.addf %217, %216 : vector<8x128xf32>
    %219 = arith.divf %217, %218 : vector<8x128xf32>
    %220 = arith.mulf %211, %194 : vector<8x128xf32>
    %221 = arith.mulf %205, %213 : vector<8x128xf32>
    %222 = arith.addf %220, %221 : vector<8x128xf32>
    %223 = math.tanh %222 : vector<8x128xf32>
    %224 = arith.mulf %219, %223 : vector<8x128xf32>
    %225 = vector.broadcast %c5_i32 : i32 to vector<8x1xi32>
    %226 = arith.cmpi slt, %225, %0 : vector<8x1xi32>
    %227 = vector.shape_cast %226 : vector<8x1xi1> to vector<8x1xi1>
    %228 = vector.broadcast %227 : vector<8x1xi1> to vector<8x128xi1>
    %229 = arith.select %228, %224, %191 : vector<8x128xi1>, vector<8x128xf32>
    %230 = vector.shape_cast %226 : vector<8x1xi1> to vector<8x1xi1>
    %231 = vector.broadcast %230 : vector<8x1xi1> to vector<8x128xi1>
    %232 = arith.select %231, %222, %194 : vector<8x128xi1>, vector<8x128xf32>
    %c6_i32 = arith.constant 6 : i32
    %233 = arith.index_cast %c6_i32 : i32 to index
    %c0_42 = arith.constant 0 : index
    %c0_43 = arith.constant 0 : index
    %234 = vector.load %arg1[%233, %c0_42, %c0_43] : memref<8x8x512xf32, #tpu.memory_space<vmem>>, vector<1x8x512xf32>
    %235 = vector.shape_cast %234 : vector<1x8x512xf32> to vector<8x512xf32>
    %cst_44 = arith.constant dense<0.000000e+00> : vector<8x512xf32>
    %236 = tpu.matmul %229, %1, %cst_44 {dimension_numbers = #tpu.dot_dimension_numbers<[1], [0], [0], [1], [0, 0, 1, 1], [], []>} : vector<8x128xf32>, vector<128x512xf32>, vector<8x512xf32> -> vector<8x512xf32>
    %237 = arith.addf %235, %236 : vector<8x512xf32>
    %238 = vector.extract_strided_slice %237 {offsets = [0, 0], sizes = [8, 128], strides = [1, 1]} : vector<8x512xf32> to vector<8x128xf32>
    %239 = arith.negf %238 : vector<8x128xf32>
    %240 = math.exp %239 : vector<8x128xf32>
    %cst_45 = arith.constant 1.000000e+00 : f32
    %241 = vector.broadcast %cst_45 : f32 to vector<8x128xf32>
    %242 = arith.addf %241, %240 : vector<8x128xf32>
    %243 = arith.divf %241, %242 : vector<8x128xf32>
    %244 = vector.extract_strided_slice %237 {offsets = [0, 128], sizes = [8, 128], strides = [1, 1]} : vector<8x512xf32> to vector<8x128xf32>
    %245 = arith.negf %244 : vector<8x128xf32>
    %246 = math.exp %245 : vector<8x128xf32>
    %cst_46 = arith.constant 1.000000e+00 : f32
    %247 = vector.broadcast %cst_46 : f32 to vector<8x128xf32>
    %248 = arith.addf %247, %246 : vector<8x128xf32>
    %249 = arith.divf %247, %248 : vector<8x128xf32>
    %250 = vector.extract_strided_slice %237 {offsets = [0, 256], sizes = [8, 128], strides = [1, 1]} : vector<8x512xf32> to vector<8x128xf32>
    %251 = math.tanh %250 : vector<8x128xf32>
    %252 = vector.extract_strided_slice %237 {offsets = [0, 384], sizes = [8, 128], strides = [1, 1]} : vector<8x512xf32> to vector<8x128xf32>
    %253 = arith.negf %252 : vector<8x128xf32>
    %254 = math.exp %253 : vector<8x128xf32>
    %cst_47 = arith.constant 1.000000e+00 : f32
    %255 = vector.broadcast %cst_47 : f32 to vector<8x128xf32>
    %256 = arith.addf %255, %254 : vector<8x128xf32>
    %257 = arith.divf %255, %256 : vector<8x128xf32>
    %258 = arith.mulf %249, %232 : vector<8x128xf32>
    %259 = arith.mulf %243, %251 : vector<8x128xf32>
    %260 = arith.addf %258, %259 : vector<8x128xf32>
    %261 = math.tanh %260 : vector<8x128xf32>
    %262 = arith.mulf %257, %261 : vector<8x128xf32>
    %263 = vector.broadcast %c6_i32 : i32 to vector<8x1xi32>
    %264 = arith.cmpi slt, %263, %0 : vector<8x1xi32>
    %265 = vector.shape_cast %264 : vector<8x1xi1> to vector<8x1xi1>
    %266 = vector.broadcast %265 : vector<8x1xi1> to vector<8x128xi1>
    %267 = arith.select %266, %262, %229 : vector<8x128xi1>, vector<8x128xf32>
    %268 = vector.shape_cast %264 : vector<8x1xi1> to vector<8x1xi1>
    %269 = vector.broadcast %268 : vector<8x1xi1> to vector<8x128xi1>
    %270 = arith.select %269, %260, %232 : vector<8x128xi1>, vector<8x128xf32>
    %c7_i32 = arith.constant 7 : i32
    %271 = arith.index_cast %c7_i32 : i32 to index
    %c0_48 = arith.constant 0 : index
    %c0_49 = arith.constant 0 : index
    %272 = vector.load %arg1[%271, %c0_48, %c0_49] : memref<8x8x512xf32, #tpu.memory_space<vmem>>, vector<1x8x512xf32>
    %273 = vector.shape_cast %272 : vector<1x8x512xf32> to vector<8x512xf32>
    %cst_50 = arith.constant dense<0.000000e+00> : vector<8x512xf32>
    %274 = tpu.matmul %267, %1, %cst_50 {dimension_numbers = #tpu.dot_dimension_numbers<[1], [0], [0], [1], [0, 0, 1, 1], [], []>} : vector<8x128xf32>, vector<128x512xf32>, vector<8x512xf32> -> vector<8x512xf32>
    %275 = arith.addf %273, %274 : vector<8x512xf32>
    %276 = vector.extract_strided_slice %275 {offsets = [0, 0], sizes = [8, 128], strides = [1, 1]} : vector<8x512xf32> to vector<8x128xf32>
    %277 = arith.negf %276 : vector<8x128xf32>
    %278 = math.exp %277 : vector<8x128xf32>
    %cst_51 = arith.constant 1.000000e+00 : f32
    %279 = vector.broadcast %cst_51 : f32 to vector<8x128xf32>
    %280 = arith.addf %279, %278 : vector<8x128xf32>
    %281 = arith.divf %279, %280 : vector<8x128xf32>
    %282 = vector.extract_strided_slice %275 {offsets = [0, 128], sizes = [8, 128], strides = [1, 1]} : vector<8x512xf32> to vector<8x128xf32>
    %283 = arith.negf %282 : vector<8x128xf32>
    %284 = math.exp %283 : vector<8x128xf32>
    %cst_52 = arith.constant 1.000000e+00 : f32
    %285 = vector.broadcast %cst_52 : f32 to vector<8x128xf32>
    %286 = arith.addf %285, %284 : vector<8x128xf32>
    %287 = arith.divf %285, %286 : vector<8x128xf32>
    %288 = vector.extract_strided_slice %275 {offsets = [0, 256], sizes = [8, 128], strides = [1, 1]} : vector<8x512xf32> to vector<8x128xf32>
    %289 = math.tanh %288 : vector<8x128xf32>
    %290 = vector.extract_strided_slice %275 {offsets = [0, 384], sizes = [8, 128], strides = [1, 1]} : vector<8x512xf32> to vector<8x128xf32>
    %291 = arith.negf %290 : vector<8x128xf32>
    %292 = math.exp %291 : vector<8x128xf32>
    %cst_53 = arith.constant 1.000000e+00 : f32
    %293 = vector.broadcast %cst_53 : f32 to vector<8x128xf32>
    %294 = arith.addf %293, %292 : vector<8x128xf32>
    %295 = arith.divf %293, %294 : vector<8x128xf32>
    %296 = arith.mulf %287, %270 : vector<8x128xf32>
    %297 = arith.mulf %281, %289 : vector<8x128xf32>
    %298 = arith.addf %296, %297 : vector<8x128xf32>
    %299 = math.tanh %298 : vector<8x128xf32>
    %300 = arith.mulf %295, %299 : vector<8x128xf32>
    %301 = vector.broadcast %c7_i32 : i32 to vector<8x1xi32>
    %302 = arith.cmpi slt, %301, %0 : vector<8x1xi32>
    %303 = vector.shape_cast %302 : vector<8x1xi1> to vector<8x1xi1>
    %304 = vector.broadcast %303 : vector<8x1xi1> to vector<8x128xi1>
    %305 = arith.select %304, %300, %267 : vector<8x128xi1>, vector<8x128xf32>
    %306 = vector.shape_cast %302 : vector<8x1xi1> to vector<8x1xi1>
    %307 = vector.broadcast %306 : vector<8x1xi1> to vector<8x128xi1>
    %308 = arith.select %307, %298, %270 : vector<8x128xi1>, vector<8x128xf32>
    %c8_i32 = arith.constant 8 : i32
    %c0_i32_54 = arith.constant 0 : i32
    %309 = arith.index_cast %c0_i32_54 : i32 to index
    %c0_55 = arith.constant 0 : index
    %c0_56 = arith.constant 0 : index
    %310 = vector.load %arg2[%309, %c0_55, %c0_56] : memref<5x8x512xf32, #tpu.memory_space<vmem>>, vector<1x8x512xf32>
    %311 = vector.shape_cast %310 : vector<1x8x512xf32> to vector<8x512xf32>
    %cst_57 = arith.constant dense<0.000000e+00> : vector<8x512xf32>
    %312 = tpu.matmul %305, %2, %cst_57 {dimension_numbers = #tpu.dot_dimension_numbers<[1], [0], [0], [1], [0, 0, 1, 1], [], []>} : vector<8x128xf32>, vector<128x512xf32>, vector<8x512xf32> -> vector<8x512xf32>
    %313 = arith.addf %311, %312 : vector<8x512xf32>
    %314 = vector.extract_strided_slice %313 {offsets = [0, 0], sizes = [8, 128], strides = [1, 1]} : vector<8x512xf32> to vector<8x128xf32>
    %315 = arith.negf %314 : vector<8x128xf32>
    %316 = math.exp %315 : vector<8x128xf32>
    %cst_58 = arith.constant 1.000000e+00 : f32
    %317 = vector.broadcast %cst_58 : f32 to vector<8x128xf32>
    %318 = arith.addf %317, %316 : vector<8x128xf32>
    %319 = arith.divf %317, %318 : vector<8x128xf32>
    %320 = vector.extract_strided_slice %313 {offsets = [0, 128], sizes = [8, 128], strides = [1, 1]} : vector<8x512xf32> to vector<8x128xf32>
    %321 = arith.negf %320 : vector<8x128xf32>
    %322 = math.exp %321 : vector<8x128xf32>
    %cst_59 = arith.constant 1.000000e+00 : f32
    %323 = vector.broadcast %cst_59 : f32 to vector<8x128xf32>
    %324 = arith.addf %323, %322 : vector<8x128xf32>
    %325 = arith.divf %323, %324 : vector<8x128xf32>
    %326 = vector.extract_strided_slice %313 {offsets = [0, 256], sizes = [8, 128], strides = [1, 1]} : vector<8x512xf32> to vector<8x128xf32>
    %327 = math.tanh %326 : vector<8x128xf32>
    %328 = vector.extract_strided_slice %313 {offsets = [0, 384], sizes = [8, 128], strides = [1, 1]} : vector<8x512xf32> to vector<8x128xf32>
    %329 = arith.negf %328 : vector<8x128xf32>
    %330 = math.exp %329 : vector<8x128xf32>
    %cst_60 = arith.constant 1.000000e+00 : f32
    %331 = vector.broadcast %cst_60 : f32 to vector<8x128xf32>
    %332 = arith.addf %331, %330 : vector<8x128xf32>
    %333 = arith.divf %331, %332 : vector<8x128xf32>
    %334 = arith.mulf %325, %308 : vector<8x128xf32>
    %335 = arith.mulf %319, %327 : vector<8x128xf32>
    %336 = arith.addf %334, %335 : vector<8x128xf32>
    %337 = math.tanh %336 : vector<8x128xf32>
    %338 = arith.mulf %333, %337 : vector<8x128xf32>
    %339 = arith.index_cast %c0_i32_54 : i32 to index
    %c0_61 = arith.constant 0 : index
    %c0_62 = arith.constant 0 : index
    %340 = vector.load %arg5[%339, %c0_61, %c0_62] : memref<5x8x128xf32, #tpu.memory_space<vmem>>, vector<1x8x128xf32>
    %341 = vector.shape_cast %340 : vector<1x8x128xf32> to vector<8x128xf32>
    %342 = vector.shape_cast %338 : vector<8x128xf32> to vector<1x8x128xf32>
    tpu.vector_store %arg5[%339, %c0_61, %c0_62], %342 {strides = array<i32>} : memref<5x8x128xf32, #tpu.memory_space<vmem>>, vector<1x8x128xf32>,
    %c1_i32_63 = arith.constant 1 : i32
    %343 = arith.index_cast %c1_i32_63 : i32 to index
    %c0_64 = arith.constant 0 : index
    %c0_65 = arith.constant 0 : index
    %344 = vector.load %arg2[%343, %c0_64, %c0_65] : memref<5x8x512xf32, #tpu.memory_space<vmem>>, vector<1x8x512xf32>
    %345 = vector.shape_cast %344 : vector<1x8x512xf32> to vector<8x512xf32>
    %cst_66 = arith.constant dense<0.000000e+00> : vector<8x512xf32>
    %346 = tpu.matmul %338, %2, %cst_66 {dimension_numbers = #tpu.dot_dimension_numbers<[1], [0], [0], [1], [0, 0, 1, 1], [], []>} : vector<8x128xf32>, vector<128x512xf32>, vector<8x512xf32> -> vector<8x512xf32>
    %347 = arith.addf %345, %346 : vector<8x512xf32>
    %348 = vector.extract_strided_slice %347 {offsets = [0, 0], sizes = [8, 128], strides = [1, 1]} : vector<8x512xf32> to vector<8x128xf32>
    %349 = arith.negf %348 : vector<8x128xf32>
    %350 = math.exp %349 : vector<8x128xf32>
    %cst_67 = arith.constant 1.000000e+00 : f32
    %351 = vector.broadcast %cst_67 : f32 to vector<8x128xf32>
    %352 = arith.addf %351, %350 : vector<8x128xf32>
    %353 = arith.divf %351, %352 : vector<8x128xf32>
    %354 = vector.extract_strided_slice %347 {offsets = [0, 128], sizes = [8, 128], strides = [1, 1]} : vector<8x512xf32> to vector<8x128xf32>
    %355 = arith.negf %354 : vector<8x128xf32>
    %356 = math.exp %355 : vector<8x128xf32>
    %cst_68 = arith.constant 1.000000e+00 : f32
    %357 = vector.broadcast %cst_68 : f32 to vector<8x128xf32>
    %358 = arith.addf %357, %356 : vector<8x128xf32>
    %359 = arith.divf %357, %358 : vector<8x128xf32>
    %360 = vector.extract_strided_slice %347 {offsets = [0, 256], sizes = [8, 128], strides = [1, 1]} : vector<8x512xf32> to vector<8x128xf32>
    %361 = math.tanh %360 : vector<8x128xf32>
    %362 = vector.extract_strided_slice %347 {offsets = [0, 384], sizes = [8, 128], strides = [1, 1]} : vector<8x512xf32> to vector<8x128xf32>
    %363 = arith.negf %362 : vector<8x128xf32>
    %364 = math.exp %363 : vector<8x128xf32>
    %cst_69 = arith.constant 1.000000e+00 : f32
    %365 = vector.broadcast %cst_69 : f32 to vector<8x128xf32>
    %366 = arith.addf %365, %364 : vector<8x128xf32>
    %367 = arith.divf %365, %366 : vector<8x128xf32>
    %368 = arith.mulf %359, %336 : vector<8x128xf32>
    %369 = arith.mulf %353, %361 : vector<8x128xf32>
    %370 = arith.addf %368, %369 : vector<8x128xf32>
    %371 = math.tanh %370 : vector<8x128xf32>
    %372 = arith.mulf %367, %371 : vector<8x128xf32>
    %373 = arith.index_cast %c1_i32_63 : i32 to index
    %c0_70 = arith.constant 0 : index
    %c0_71 = arith.constant 0 : index
    %374 = vector.load %arg5[%373, %c0_70, %c0_71] : memref<5x8x128xf32, #tpu.memory_space<vmem>>, vector<1x8x128xf32>
    %375 = vector.shape_cast %374 : vector<1x8x128xf32> to vector<8x128xf32>
    %376 = vector.shape_cast %372 : vector<8x128xf32> to vector<1x8x128xf32>
    tpu.vector_store %arg5[%373, %c0_70, %c0_71], %376 {strides = array<i32>} : memref<5x8x128xf32, #tpu.memory_space<vmem>>, vector<1x8x128xf32>,
    %c2_i32_72 = arith.constant 2 : i32
    %377 = arith.index_cast %c2_i32_72 : i32 to index
    %c0_73 = arith.constant 0 : index
    %c0_74 = arith.constant 0 : index
    %378 = vector.load %arg2[%377, %c0_73, %c0_74] : memref<5x8x512xf32, #tpu.memory_space<vmem>>, vector<1x8x512xf32>
    %379 = vector.shape_cast %378 : vector<1x8x512xf32> to vector<8x512xf32>
    %cst_75 = arith.constant dense<0.000000e+00> : vector<8x512xf32>
    %380 = tpu.matmul %372, %2, %cst_75 {dimension_numbers = #tpu.dot_dimension_numbers<[1], [0], [0], [1], [0, 0, 1, 1], [], []>} : vector<8x128xf32>, vector<128x512xf32>, vector<8x512xf32> -> vector<8x512xf32>
    %381 = arith.addf %379, %380 : vector<8x512xf32>
    %382 = vector.extract_strided_slice %381 {offsets = [0, 0], sizes = [8, 128], strides = [1, 1]} : vector<8x512xf32> to vector<8x128xf32>
    %383 = arith.negf %382 : vector<8x128xf32>
    %384 = math.exp %383 : vector<8x128xf32>
    %cst_76 = arith.constant 1.000000e+00 : f32
    %385 = vector.broadcast %cst_76 : f32 to vector<8x128xf32>
    %386 = arith.addf %385, %384 : vector<8x128xf32>
    %387 = arith.divf %385, %386 : vector<8x128xf32>
    %388 = vector.extract_strided_slice %381 {offsets = [0, 128], sizes = [8, 128], strides = [1, 1]} : vector<8x512xf32> to vector<8x128xf32>
    %389 = arith.negf %388 : vector<8x128xf32>
    %390 = math.exp %389 : vector<8x128xf32>
    %cst_77 = arith.constant 1.000000e+00 : f32
    %391 = vector.broadcast %cst_77 : f32 to vector<8x128xf32>
    %392 = arith.addf %391, %390 : vector<8x128xf32>
    %393 = arith.divf %391, %392 : vector<8x128xf32>
    %394 = vector.extract_strided_slice %381 {offsets = [0, 256], sizes = [8, 128], strides = [1, 1]} : vector<8x512xf32> to vector<8x128xf32>
    %395 = math.tanh %394 : vector<8x128xf32>
    %396 = vector.extract_strided_slice %381 {offsets = [0, 384], sizes = [8, 128], strides = [1, 1]} : vector<8x512xf32> to vector<8x128xf32>
    %397 = arith.negf %396 : vector<8x128xf32>
    %398 = math.exp %397 : vector<8x128xf32>
    %cst_78 = arith.constant 1.000000e+00 : f32
    %399 = vector.broadcast %cst_78 : f32 to vector<8x128xf32>
    %400 = arith.addf %399, %398 : vector<8x128xf32>
    %401 = arith.divf %399, %400 : vector<8x128xf32>
    %402 = arith.mulf %393, %370 : vector<8x128xf32>
    %403 = arith.mulf %387, %395 : vector<8x128xf32>
    %404 = arith.addf %402, %403 : vector<8x128xf32>
    %405 = math.tanh %404 : vector<8x128xf32>
    %406 = arith.mulf %401, %405 : vector<8x128xf32>
    %407 = arith.index_cast %c2_i32_72 : i32 to index
    %c0_79 = arith.constant 0 : index
    %c0_80 = arith.constant 0 : index
    %408 = vector.load %arg5[%407, %c0_79, %c0_80] : memref<5x8x128xf32, #tpu.memory_space<vmem>>, vector<1x8x128xf32>
    %409 = vector.shape_cast %408 : vector<1x8x128xf32> to vector<8x128xf32>
    %410 = vector.shape_cast %406 : vector<8x128xf32> to vector<1x8x128xf32>
    tpu.vector_store %arg5[%407, %c0_79, %c0_80], %410 {strides = array<i32>} : memref<5x8x128xf32, #tpu.memory_space<vmem>>, vector<1x8x128xf32>,
    %c3_i32_81 = arith.constant 3 : i32
    %411 = arith.index_cast %c3_i32_81 : i32 to index
    %c0_82 = arith.constant 0 : index
    %c0_83 = arith.constant 0 : index
    %412 = vector.load %arg2[%411, %c0_82, %c0_83] : memref<5x8x512xf32, #tpu.memory_space<vmem>>, vector<1x8x512xf32>
    %413 = vector.shape_cast %412 : vector<1x8x512xf32> to vector<8x512xf32>
    %cst_84 = arith.constant dense<0.000000e+00> : vector<8x512xf32>
    %414 = tpu.matmul %406, %2, %cst_84 {dimension_numbers = #tpu.dot_dimension_numbers<[1], [0], [0], [1], [0, 0, 1, 1], [], []>} : vector<8x128xf32>, vector<128x512xf32>, vector<8x512xf32> -> vector<8x512xf32>
    %415 = arith.addf %413, %414 : vector<8x512xf32>
    %416 = vector.extract_strided_slice %415 {offsets = [0, 0], sizes = [8, 128], strides = [1, 1]} : vector<8x512xf32> to vector<8x128xf32>
    %417 = arith.negf %416 : vector<8x128xf32>
    %418 = math.exp %417 : vector<8x128xf32>
    %cst_85 = arith.constant 1.000000e+00 : f32
    %419 = vector.broadcast %cst_85 : f32 to vector<8x128xf32>
    %420 = arith.addf %419, %418 : vector<8x128xf32>
    %421 = arith.divf %419, %420 : vector<8x128xf32>
    %422 = vector.extract_strided_slice %415 {offsets = [0, 128], sizes = [8, 128], strides = [1, 1]} : vector<8x512xf32> to vector<8x128xf32>
    %423 = arith.negf %422 : vector<8x128xf32>
    %424 = math.exp %423 : vector<8x128xf32>
    %cst_86 = arith.constant 1.000000e+00 : f32
    %425 = vector.broadcast %cst_86 : f32 to vector<8x128xf32>
    %426 = arith.addf %425, %424 : vector<8x128xf32>
    %427 = arith.divf %425, %426 : vector<8x128xf32>
    %428 = vector.extract_strided_slice %415 {offsets = [0, 256], sizes = [8, 128], strides = [1, 1]} : vector<8x512xf32> to vector<8x128xf32>
    %429 = math.tanh %428 : vector<8x128xf32>
    %430 = vector.extract_strided_slice %415 {offsets = [0, 384], sizes = [8, 128], strides = [1, 1]} : vector<8x512xf32> to vector<8x128xf32>
    %431 = arith.negf %430 : vector<8x128xf32>
    %432 = math.exp %431 : vector<8x128xf32>
    %cst_87 = arith.constant 1.000000e+00 : f32
    %433 = vector.broadcast %cst_87 : f32 to vector<8x128xf32>
    %434 = arith.addf %433, %432 : vector<8x128xf32>
    %435 = arith.divf %433, %434 : vector<8x128xf32>
    %436 = arith.mulf %427, %404 : vector<8x128xf32>
    %437 = arith.mulf %421, %429 : vector<8x128xf32>
    %438 = arith.addf %436, %437 : vector<8x128xf32>
    %439 = math.tanh %438 : vector<8x128xf32>
    %440 = arith.mulf %435, %439 : vector<8x128xf32>
    %441 = arith.index_cast %c3_i32_81 : i32 to index
    %c0_88 = arith.constant 0 : index
    %c0_89 = arith.constant 0 : index
    %442 = vector.load %arg5[%441, %c0_88, %c0_89] : memref<5x8x128xf32, #tpu.memory_space<vmem>>, vector<1x8x128xf32>
    %443 = vector.shape_cast %442 : vector<1x8x128xf32> to vector<8x128xf32>
    %444 = vector.shape_cast %440 : vector<8x128xf32> to vector<1x8x128xf32>
    tpu.vector_store %arg5[%441, %c0_88, %c0_89], %444 {strides = array<i32>} : memref<5x8x128xf32, #tpu.memory_space<vmem>>, vector<1x8x128xf32>,
    %c4_i32_90 = arith.constant 4 : i32
    %445 = arith.index_cast %c4_i32_90 : i32 to index
    %c0_91 = arith.constant 0 : index
    %c0_92 = arith.constant 0 : index
    %446 = vector.load %arg2[%445, %c0_91, %c0_92] : memref<5x8x512xf32, #tpu.memory_space<vmem>>, vector<1x8x512xf32>
    %447 = vector.shape_cast %446 : vector<1x8x512xf32> to vector<8x512xf32>
    %cst_93 = arith.constant dense<0.000000e+00> : vector<8x512xf32>
    %448 = tpu.matmul %440, %2, %cst_93 {dimension_numbers = #tpu.dot_dimension_numbers<[1], [0], [0], [1], [0, 0, 1, 1], [], []>} : vector<8x128xf32>, vector<128x512xf32>, vector<8x512xf32> -> vector<8x512xf32>
    %449 = arith.addf %447, %448 : vector<8x512xf32>
    %450 = vector.extract_strided_slice %449 {offsets = [0, 0], sizes = [8, 128], strides = [1, 1]} : vector<8x512xf32> to vector<8x128xf32>
    %451 = arith.negf %450 : vector<8x128xf32>
    %452 = math.exp %451 : vector<8x128xf32>
    %cst_94 = arith.constant 1.000000e+00 : f32
    %453 = vector.broadcast %cst_94 : f32 to vector<8x128xf32>
    %454 = arith.addf %453, %452 : vector<8x128xf32>
    %455 = arith.divf %453, %454 : vector<8x128xf32>
    %456 = vector.extract_strided_slice %449 {offsets = [0, 128], sizes = [8, 128], strides = [1, 1]} : vector<8x512xf32> to vector<8x128xf32>
    %457 = arith.negf %456 : vector<8x128xf32>
    %458 = math.exp %457 : vector<8x128xf32>
    %cst_95 = arith.constant 1.000000e+00 : f32
    %459 = vector.broadcast %cst_95 : f32 to vector<8x128xf32>
    %460 = arith.addf %459, %458 : vector<8x128xf32>
    %461 = arith.divf %459, %460 : vector<8x128xf32>
    %462 = vector.extract_strided_slice %449 {offsets = [0, 256], sizes = [8, 128], strides = [1, 1]} : vector<8x512xf32> to vector<8x128xf32>
    %463 = math.tanh %462 : vector<8x128xf32>
    %464 = vector.extract_strided_slice %449 {offsets = [0, 384], sizes = [8, 128], strides = [1, 1]} : vector<8x512xf32> to vector<8x128xf32>
    %465 = arith.negf %464 : vector<8x128xf32>
    %466 = math.exp %465 : vector<8x128xf32>
    %cst_96 = arith.constant 1.000000e+00 : f32
    %467 = vector.broadcast %cst_96 : f32 to vector<8x128xf32>
    %468 = arith.addf %467, %466 : vector<8x128xf32>
    %469 = arith.divf %467, %468 : vector<8x128xf32>
    %470 = arith.mulf %461, %438 : vector<8x128xf32>
    %471 = arith.mulf %455, %463 : vector<8x128xf32>
    %472 = arith.addf %470, %471 : vector<8x128xf32>
    %473 = math.tanh %472 : vector<8x128xf32>
    %474 = arith.mulf %469, %473 : vector<8x128xf32>
    %475 = arith.index_cast %c4_i32_90 : i32 to index
    %c0_97 = arith.constant 0 : index
    %c0_98 = arith.constant 0 : index
    %476 = vector.load %arg5[%475, %c0_97, %c0_98] : memref<5x8x128xf32, #tpu.memory_space<vmem>>, vector<1x8x128xf32>
    %477 = vector.shape_cast %476 : vector<1x8x128xf32> to vector<8x128xf32>
    %478 = vector.shape_cast %474 : vector<8x128xf32> to vector<1x8x128xf32>
    tpu.vector_store %arg5[%475, %c0_97, %c0_98], %478 {strides = array<i32>} : memref<5x8x128xf32, #tpu.memory_space<vmem>>, vector<1x8x128xf32>,
    %c5_i32_99 = arith.constant 5 : i32
    return
  }
}

</mosaic_0001>

<bundles_post_ra>
// kernel: seq2seq_forward.7
= control target key start
LH: loop header
LB: loop body
LE: loop exit
PB: predicated region body
PF: predicated region fallthrough
CT: control target
= control target key end

     0   :  { %v245_v0 = vmov 0.0   ;;  %vm246_vm0 = vmmov 0   ;;  %vm132_vm1 = vcmask 261120   ;;  %s390_s1 = inlined_call_operand.vmem [shape: f32[128,32], index: 1, kind: input, shape index: {}]   ;;  %s391_s0 = inlined_call_operand.vmem [shape: f32[40,128], index: 0, kind: input, shape index: {}]   ;;  %s392_s2 = inlined_call_operand.vmem [shape: f32[1,32], index: 2, kind: input, shape index: {}]   ;;  %s393_s3 = inlined_call_operand.vmem [shape: f32[40,32], index: 3, kind: output, shape index: {}]  }
   0x1   :  { %164 = vmatprep.subr.mxu0 %v245_v0  ;;  %v34_v1 = vld [vmem:[%s390_s1 + $0x78] sm:$0xff]  ;;  %211 = vmatprep.subr.mxu1 %v245_v0  ;;  %v33_v2 = vld [vmem:[%s390_s1 + $0x70] sm:$0xff]  ;;  %v32_v3 = vld [vmem:[%s390_s1 + $0x68] sm:$0xff] }
   0x2   :  { %165 = vmatpush3.msra.mxu0 %v34_v1  ;;  %227 = vmatpush3.msra.mxu1 %v34_v1  ;;  %v31_v4 = vld [vmem:[%s390_s1 + $0x60] sm:$0xff]  ;;  %v30_v5 = vld [vmem:[%s390_s1 + $0x58] sm:$0xff]  ;;  %v29_v6 = vld [vmem:[%s390_s1 + $0x50] sm:$0xff] }
   0x3   :  { %166 = vmatprep.subr.mxu0 %v245_v0  ;;  %212 = vmatprep.subr.mxu1 %v245_v0  ;;  %v28_v7 = vld [vmem:[%s390_s1 + $0x48] sm:$0xff]  ;;  %v27_v8 = vld [vmem:[%s390_s1 + $0x40] sm:$0xff]  ;;  %v26_v9 = vld [vmem:[%s390_s1 + $0x38] sm:$0xff] }
   0x4   :  { %167 = vmatpush3.msra.mxu0 %v33_v2  ;;  %228 = vmatpush3.msra.mxu1 %v33_v2  ;;  %v25_v10 = vld [vmem:[%s390_s1 + $0x30] sm:$0xff]  ;;  %v24_v11 = vld [vmem:[%s390_s1 + $0x28] sm:$0xff]  ;;  %v23_v12 = vld [vmem:[%s390_s1 + $0x20] sm:$0xff] }
   0x5   :  { %168 = vmatprep.subr.mxu0 %v245_v0  ;;  %213 = vmatprep.subr.mxu1 %v245_v0  ;;  %v22_v13 = vld [vmem:[%s390_s1 + $0x18] sm:$0xff]  ;;  %v21_v14 = vld [vmem:[%s390_s1 + $0x10] sm:$0xff]  ;;  %v20_v15 = vld [vmem:[%s390_s1 + $0x8] sm:$0xff] }
   0x6   :  { %169 = vmatpush3.msra.mxu0 %v32_v3  ;;  %229 = vmatpush3.msra.mxu1 %v32_v3  ;;  %v19_v16 = vld [vmem:[%s390_s1] sm:$0xff]  ;;  %v17_v18 = vld [vmem:[%s391_s0 + $0x18] sm:$0xff]  ;;  %v15_v19 = vld [vmem:[%s391_s0 + $0x8] sm:$0xff] }
   0x7   :  { %170 = vmatprep.subr.mxu0 %v245_v0  ;;  %214 = vmatprep.subr.mxu1 %v245_v0  ;;  %v14_v17 = vld [vmem:[%s391_s0] sm:$0xff]  ;;  %v16_v21 = vld [vmem:[%s391_s0 + $0x10] sm:$0xff] }
   0x8   :  { %171 = vmatpush3.msra.mxu0 %v31_v4  ;;  %230 = vmatpush3.msra.mxu1 %v31_v4  ;;  %v18_v20 = vld [vmem:[%s391_s0 + $0x20] sm:$0xff] }
   0x9   :  { %172 = vmatprep.subr.mxu0 %v245_v0  ;;  %215 = vmatprep.subr.mxu1 %v245_v0  ;;  %v142_v22 = vld [vmem:[%s392_s2] ss:$0 sm:$0xff] }
   0xa   :  { %173 = vmatpush3.msra.mxu0 %v30_v5  ;;  %231 = vmatpush3.msra.mxu1 %v30_v5 }
   0xb   :  { %174 = vmatprep.subr.mxu0 %v245_v0  ;;  %216 = vmatprep.subr.mxu1 %v245_v0 }
   0xc   :  { %175 = vmatpush3.msra.mxu0 %v29_v6  ;;  %232 = vmatpush3.msra.mxu1 %v29_v6 }
   0xd   :  { %176 = vmatprep.subr.mxu0 %v245_v0  ;;  %217 = vmatprep.subr.mxu1 %v245_v0 }
   0xe   :  { %177 = vmatpush3.msra.mxu0 %v28_v7  ;;  %233 = vmatpush3.msra.mxu1 %v28_v7 }
   0xf   :  { %178 = vmatprep.subr.mxu0 %v245_v0  ;;  %218 = vmatprep.subr.mxu1 %v245_v0 }
  0x10   :  { %179 = vmatpush3.msra.mxu0 %v27_v8  ;;  %234 = vmatpush3.msra.mxu1 %v27_v8 }
  0x11   :  { %180 = vmatprep.subr.mxu0 %v245_v0  ;;  %219 = vmatprep.subr.mxu1 %v245_v0 }
  0x12   :  { %181 = vmatpush3.msra.mxu0 %v26_v9  ;;  %235 = vmatpush3.msra.mxu1 %v26_v9 }
  0x13   :  { %182 = vmatprep.subr.mxu0 %v245_v0  ;;  %220 = vmatprep.subr.mxu1 %v245_v0 }
  0x14   :  { %183 = vmatpush3.msra.mxu0 %v25_v10  ;;  %236 = vmatpush3.msra.mxu1 %v25_v10 }
  0x15   :  { %184 = vmatprep.subr.mxu0 %v245_v0  ;;  %221 = vmatprep.subr.mxu1 %v245_v0 }
  0x16   :  { %185 = vmatpush3.msra.mxu0 %v24_v11  ;;  %237 = vmatpush3.msra.mxu1 %v24_v11 }
  0x17   :  { %186 = vmatprep.subr.mxu0 %v245_v0  ;;  %222 = vmatprep.subr.mxu1 %v245_v0 }
  0x18   :  { %187 = vmatpush3.msra.mxu0 %v23_v12  ;;  %238 = vmatpush3.msra.mxu1 %v23_v12 }
  0x19   :  { %188 = vmatprep.subr.mxu0 %v245_v0  ;;  %223 = vmatprep.subr.mxu1 %v245_v0 }
  0x1a   :  { %189 = vmatpush3.msra.mxu0 %v22_v13  ;;  %239 = vmatpush3.msra.mxu1 %v22_v13 }
  0x1b   :  { %190 = vmatprep.subr.mxu0 %v245_v0  ;;  %224 = vmatprep.subr.mxu1 %v245_v0 }
  0x1c   :  { %191 = vmatpush3.msra.mxu0 %v21_v14  ;;  %240 = vmatpush3.msra.mxu1 %v21_v14 }
  0x1d   :  { %192 = vmatprep.subr.mxu0 %v245_v0  ;;  %225 = vmatprep.subr.mxu1 %v245_v0 }
  0x1e   :  { %193 = vmatpush3.msra.mxu0 %v20_v15  ;;  %241 = vmatpush3.msra.mxu1 %v20_v15 }
  0x1f   :  { %194 = vmatprep.subr.mxu0 %v245_v0  ;;  %196 = vmatprep.mubr.msk.f32.mxu0 %vm246_vm0, %v245_v0 }
  0x20   :  { %195 = vmatpush3.msra.mxu0 %v19_v16  ;;  %226 = vmatprep.subr.mxu1 %v245_v0 }
  0x21   :  { %197 = vmatmul.mubr.f32.vlgmr.msra.gmra.mxu0 %v14_v17  ;;  %242 = vmatpush3.msra.mxu1 %v19_v16 }
  0x22   :  { %205 = vmatprep.mubr.msk.f32.mxu1 %vm246_vm0, %v245_v0  ;;  %199 = vmatprep.mubr.msk.f32.mxu0 %vm246_vm0, %v245_v0 }
  0x23   :  { %206 = vmatmul.mubr.f32.vlgmr.msra.gmra.mxu1 %v17_v18 }
  0x24   :  { %208 = vmatprep.mubr.msk.f32.mxu1 %vm246_vm0, %v245_v0 }
  0x25   :  { %200 = vmatmul.mubr.f32.gmra.mxu0 %v15_v19 }
  0x26   :  { %202 = vmatprep.mubr.msk.f32.mxu0 %vm246_vm0, %v245_v0 }
  0x27   :  { %209 = vmatmul.mubr.f32.gmra.mxu1 %v18_v20 }
  0x29   :  { %203 = vmatmul.mubr.f32.gmra.mxu0 %v16_v21 }
  0xe1   :  { %v108_v23 = vpop.f32.mrf.mxu0 }
  0xe2   :  { %v109_v24 = vadd.f32 %v142_v22, %v108_v23 }
  0xe3   :  { %v198_v25 = vpop.f32.mrf.mxu0  ;;  %v123_v26 = vpop.f32.mrf.mxu1 }
  0xe4   :  { %133 = vst.msk [vmem:[%s393_s3] sm:$0xff] %vm132_vm1, %v109_v24  ;;  %v124_v27 = vadd.f32 %v142_v22, %v123_v26 }
  0xe5   :  { %v113_v28 = vpop.f32.mrf.mxu0  ;;  %v207_v29 = vpop.f32.mrf.mxu1 }
  0xe6   :  { %136 = vst.msk [vmem:[%s393_s3 + $0x18] sm:$0xff] %vm132_vm1, %v124_v27  ;;  %v114_v30 = vadd.f32 %v142_v22, %v113_v28 }
  0xe7   :  { %v201_v31 = vpop.f32.mrf.mxu0  ;;  %v128_v32 = vpop.f32.mrf.mxu1 }
  0xe8   :  { %134 = vst.msk [vmem:[%s393_s3 + $0x8] sm:$0xff] %vm132_vm1, %v114_v30  ;;  %v129_v33 = vadd.f32 %v142_v22, %v128_v32 }
  0xe9   :  { %v118_v34 = vpop.f32.mrf.mxu0  ;;  %v210_v35 = vpop.f32.mrf.mxu1 }
  0xea   :  { %137 = vst.msk [vmem:[%s393_s3 + $0x20] sm:$0xff] %vm132_vm1, %v129_v33  ;;  %v119_v36 = vadd.f32 %v142_v22, %v118_v34 }
  0xeb   :  { %v204_v37 = vpop.f32.mrf.mxu0 }
  0xec   :  { %135 = vst.msk [vmem:[%s393_s3 + $0x10] sm:$0xff] %vm132_vm1, %v119_v36 }

// kernel: seq2seq_forward.4
= control target key start
LH: loop header
LB: loop body
LE: loop exit
PB: predicated region body
PF: predicated region fallthrough
CT: control target
= control target key end

     0   :  { %v364_v3 = vmov 0.0   ;;  %vm60_vm0 = vcmask 261120   ;;  %v40_v25 = vlaneseq  ;;  %s628_s1 = inlined_call_operand.vmem [shape: f32[32,512], index: 1, kind: input, shape index: {}]   ;;  %s629_s0 = inlined_call_operand.vmem [shape: f32[64,32], index: 0, kind: input, shape index: {}]   ;;  %s630_s2 = inlined_call_operand.vmem [shape: f32[1,512], index: 2, kind: input, shape index: {}]   ;;  %s631_s3 = inlined_call_operand.vmem [shape: f32[64,512], index: 3, kind: output, shape index: {}]  }
   0x1   :  { %v35_v0 = vld [vmem:[%s628_s1 + $0x68] sm:$0xff]  ;;  %v37_v1 = vld [vmem:[%s628_s1 + $0x78] sm:$0xff]  ;;  %v34_v2 = vld [vmem:[%s628_s1 + $0x60] sm:$0xff]  ;;  %149 = vmatprep.mubr.f32.mxu0 %v364_v3  ;;  %262 = vmatprep.mubr.f32.mxu1 %v364_v3 }
   0x2   :  { %109 = vmatprep.subr.mxu0 %v35_v0  ;;  %222 = vmatprep.subr.mxu1 %v37_v1  ;;  %v36_v4 = vld [vmem:[%s628_s1 + $0x70] sm:$0xff]  ;;  %v31_v5 = vld [vmem:[%s628_s1 + $0x48] sm:$0xff]  ;;  %v33_v6 = vld [vmem:[%s628_s1 + $0x58] sm:$0xff]  ;;  %v41_v26 = vshrl.u32 %v40_v25, 7 }
   0x3   :  { %110 = vmatpush1.msra.mxu0 %v34_v2  ;;  %223 = vmatpush1.msra.mxu1 %v36_v4  ;;  %v30_v7 = vld [vmem:[%s628_s1 + $0x40] sm:$0xff]  ;;  %v32_v8 = vld [vmem:[%s628_s1 + $0x50] sm:$0xff]  ;;  %v27_v9 = vld [vmem:[%s628_s1 + $0x28] sm:$0xff] }
   0x4   :  { %111 = vmatprep.subr.mxu0 %v31_v5  ;;  %224 = vmatprep.subr.mxu1 %v33_v6  ;;  %v29_v10 = vld [vmem:[%s628_s1 + $0x38] sm:$0xff]  ;;  %v26_v11 = vld [vmem:[%s628_s1 + $0x20] sm:$0xff]  ;;  %v28_v12 = vld [vmem:[%s628_s1 + $0x30] sm:$0xff]  ;;  %v42_v27 = vsub.s32 0, %v41_v26  ;;  %v50_v28 = vsub.s32 2, %v41_v26  ;;  %v46_v30 = vsub.s32 1, %v41_v26 }
   0x5   :  { %112 = vmatpush1.msra.mxu0 %v30_v7  ;;  %225 = vmatpush1.msra.mxu1 %v32_v8  ;;  %v23_v13 = vld [vmem:[%s628_s1 + $0x8] sm:$0xff]  ;;  %v25_v14 = vld [vmem:[%s628_s1 + $0x18] sm:$0xff]  ;;  %v22_v15 = vld [vmem:[%s628_s1] sm:$0xff]  ;;  %v54_v31 = vsub.s32 3, %v41_v26 }
   0x6   :  { %113 = vmatprep.subr.mxu0 %v27_v9  ;;  %226 = vmatprep.subr.mxu1 %v29_v10  ;;  %v24_v16 = vld [vmem:[%s628_s1 + $0x10] sm:$0xff]  ;;  %v14_v17 = vld [vmem:[%s629_s0] sm:$0xff]  ;;  %v15_v18 = vld [vmem:[%s629_s0 + $0x8] sm:$0xff] }
   0x7   :  { %114 = vmatpush1.msra.mxu0 %v26_v11  ;;  %227 = vmatpush1.msra.mxu1 %v28_v12  ;;  %v16_v19 = vld [vmem:[%s629_s0 + $0x10] sm:$0xff]  ;;  %v17_v20 = vld [vmem:[%s629_s0 + $0x18] sm:$0xff]  ;;  %v18_v21 = vld [vmem:[%s629_s0 + $0x20] sm:$0xff] }
   0x8   :  { %115 = vmatprep.subr.mxu0 %v23_v13  ;;  %228 = vmatprep.subr.mxu1 %v25_v14  ;;  %v19_v22 = vld [vmem:[%s629_s0 + $0x28] sm:$0xff]  ;;  %v20_v23 = vld [vmem:[%s629_s0 + $0x30] sm:$0xff]  ;;  %v21_v24 = vld [vmem:[%s629_s0 + $0x38] sm:$0xff] }
   0x9   :  { %116 = vmatpush1.msra.mxu0 %v22_v15  ;;  %229 = vmatpush1.msra.mxu1 %v24_v16  ;;  %v38_v29 = vld [vmem:[%s630_s2] sm:$0xf] }
   0xa   :  { %347 = vmatmul.mubr.msk.f32.vlgmr.msra.gmra.mxu0 %vm60_vm0, %v14_v17  ;;  %355 = vmatmul.mubr.msk.f32.vlgmr.msra.gmra.mxu1 %vm60_vm0, %v14_v17  ;;  %v492_v32 = vrot.slane %v38_v29, %v42_v27  ;;  %v494_v33 = vrot.slane %v38_v29, %v50_v28  ;;  %v496_v34 = vrot.slane %v38_v29, %v46_v30 }
   0xb   :  { %155 = vmatprep.mubr.f32.mxu0 %v364_v3  ;;  %268 = vmatprep.mubr.f32.mxu1 %v364_v3  ;;  %v498_v35 = vrot.slane %v38_v29, %v54_v31 }
   0xe   :  { %348 = vmatmul.mubr.msk.f32.gmra.mxu0 %vm60_vm0, %v15_v18  ;;  %356 = vmatmul.mubr.msk.f32.gmra.mxu1 %vm60_vm0, %v15_v18 }
   0xf   :  { %161 = vmatprep.mubr.f32.mxu0 %v364_v3  ;;  %274 = vmatprep.mubr.f32.mxu1 %v364_v3 }
  0x12   :  { %349 = vmatmul.mubr.msk.f32.gmra.mxu0 %vm60_vm0, %v16_v19  ;;  %357 = vmatmul.mubr.msk.f32.gmra.mxu1 %vm60_vm0, %v16_v19 }
  0x13   :  { %167 = vmatprep.mubr.f32.mxu0 %v364_v3  ;;  %280 = vmatprep.mubr.f32.mxu1 %v364_v3 }
  0x16   :  { %350 = vmatmul.mubr.msk.f32.gmra.mxu0 %vm60_vm0, %v17_v20  ;;  %358 = vmatmul.mubr.msk.f32.gmra.mxu1 %vm60_vm0, %v17_v20 }
  0x17   :  { %173 = vmatprep.mubr.f32.mxu0 %v364_v3  ;;  %286 = vmatprep.mubr.f32.mxu1 %v364_v3 }
  0x1a   :  { %351 = vmatmul.mubr.msk.f32.gmra.mxu0 %vm60_vm0, %v18_v21  ;;  %359 = vmatmul.mubr.msk.f32.gmra.mxu1 %vm60_vm0, %v18_v21 }
  0x1b   :  { %179 = vmatprep.mubr.f32.mxu0 %v364_v3  ;;  %292 = vmatprep.mubr.f32.mxu1 %v364_v3 }
  0x1e   :  { %352 = vmatmul.mubr.msk.f32.gmra.mxu0 %vm60_vm0, %v19_v22  ;;  %360 = vmatmul.mubr.msk.f32.gmra.mxu1 %vm60_vm0, %v19_v22 }
  0x1f   :  { %185 = vmatprep.mubr.f32.mxu0 %v364_v3  ;;  %298 = vmatprep.mubr.f32.mxu1 %v364_v3 }
  0x22   :  { %353 = vmatmul.mubr.msk.f32.gmra.mxu0 %vm60_vm0, %v20_v23  ;;  %361 = vmatmul.mubr.msk.f32.gmra.mxu1 %vm60_vm0, %v20_v23 }
  0x23   :  { %191 = vmatprep.mubr.f32.mxu0 %v364_v3  ;;  %304 = vmatprep.mubr.f32.mxu1 %v364_v3 }
  0x26   :  { %354 = vmatmul.mubr.msk.f32.gmra.mxu0 %vm60_vm0, %v21_v24  ;;  %362 = vmatmul.mubr.msk.f32.gmra.mxu1 %vm60_vm0, %v21_v24 }
  0xca   :  { %v151_v36 = vpop.f32.mrf.mxu0  ;;  %v264_v37 = vpop.f32.mrf.mxu1 }
  0xcb   :  { %v152_v38 = vadd.f32 %v151_v36, %v492_v32  ;;  %v265_v39 = vadd.f32 %v264_v37, %v494_v33 }
  0xcc   :  { %v153_v40 = vpop.f32.mrf.mxu0  ;;  %v266_v41 = vpop.f32.mrf.mxu1 }
  0xcd   :  { %311 = vst [vmem:[%s631_s3] sm:$0xff] %v152_v38  ;;  %313 = vst [vmem:[%s631_s3 + $0x10] sm:$0xff] %v265_v39  ;;  %v154_v42 = vadd.f32 %v153_v40, %v496_v34  ;;  %v267_v43 = vadd.f32 %v266_v41, %v498_v35 }
  0xce   :  { %v157_v44 = vpop.f32.mrf.mxu0  ;;  %v270_v45 = vpop.f32.mrf.mxu1 }
  0xcf   :  { %312 = vst [vmem:[%s631_s3 + $0x8] sm:$0xff] %v154_v42  ;;  %314 = vst [vmem:[%s631_s3 + $0x18] sm:$0xff] %v267_v43  ;;  %v158_v46 = vadd.f32 %v157_v44, %v492_v32  ;;  %v271_v47 = vadd.f32 %v270_v45, %v494_v33 }
  0xd0   :  { %v159_v48 = vpop.f32.mrf.mxu0  ;;  %v272_v49 = vpop.f32.mrf.mxu1 }
  0xd1   :  { %315 = vst [vmem:[%s631_s3 + $0x20] sm:$0xff] %v158_v46  ;;  %317 = vst [vmem:[%s631_s3 + $0x30] sm:$0xff] %v271_v47  ;;  %v160_v50 = vadd.f32 %v159_v48, %v496_v34  ;;  %v273_v51 = vadd.f32 %v272_v49, %v498_v35 }
  0xd2   :  { %v163_v52 = vpop.f32.mrf.mxu0  ;;  %v276_v53 = vpop.f32.mrf.mxu1 }
  0xd3   :  { %316 = vst [vmem:[%s631_s3 + $0x28] sm:$0xff] %v160_v50  ;;  %318 = vst [vmem:[%s631_s3 + $0x38] sm:$0xff] %v273_v51  ;;  %v164_v54 = vadd.f32 %v163_v52, %v492_v32  ;;  %v277_v55 = vadd.f32 %v276_v53, %v494_v33 }
  0xd4   :  { %v165_v56 = vpop.f32.mrf.mxu0  ;;  %v278_v57 = vpop.f32.mrf.mxu1 }
  0xd5   :  { %319 = vst [vmem:[%s631_s3 + $0x40] sm:$0xff] %v164_v54  ;;  %321 = vst [vmem:[%s631_s3 + $0x50] sm:$0xff] %v277_v55  ;;  %v166_v58 = vadd.f32 %v165_v56, %v496_v34  ;;  %v279_v59 = vadd.f32 %v278_v57, %v498_v35 }
  0xd6   :  { %v169_v60 = vpop.f32.mrf.mxu0  ;;  %v282_v61 = vpop.f32.mrf.mxu1 }
  0xd7   :  { %320 = vst [vmem:[%s631_s3 + $0x48] sm:$0xff] %v166_v58  ;;  %322 = vst [vmem:[%s631_s3 + $0x58] sm:$0xff] %v279_v59  ;;  %v170_v62 = vadd.f32 %v169_v60, %v492_v32  ;;  %v283_v63 = vadd.f32 %v282_v61, %v494_v33 }
  0xd8   :  { %v171_v0 = vpop.f32.mrf.mxu0  ;;  %v284_v1 = vpop.f32.mrf.mxu1 }
  0xd9   :  { %323 = vst [vmem:[%s631_s3 + $0x60] sm:$0xff] %v170_v62  ;;  %325 = vst [vmem:[%s631_s3 + $0x70] sm:$0xff] %v283_v63  ;;  %v172_v2 = vadd.f32 %v171_v0, %v496_v34  ;;  %v285_v3 = vadd.f32 %v284_v1, %v498_v35 }
  0xda   :  { %v175_v4 = vpop.f32.mrf.mxu0  ;;  %v288_v5 = vpop.f32.mrf.mxu1 }
  0xdb   :  { %324 = vst [vmem:[%s631_s3 + $0x68] sm:$0xff] %v172_v2  ;;  %326 = vst [vmem:[%s631_s3 + $0x78] sm:$0xff] %v285_v3  ;;  %v176_v6 = vadd.f32 %v175_v4, %v492_v32  ;;  %v289_v7 = vadd.f32 %v288_v5, %v494_v33 }
  0xdc   :  { %v177_v8 = vpop.f32.mrf.mxu0  ;;  %v290_v9 = vpop.f32.mrf.mxu1 }
  0xdd   :  { %327 = vst [vmem:[%s631_s3 + $0x80] sm:$0xff] %v176_v6  ;;  %329 = vst [vmem:[%s631_s3 + $0x90] sm:$0xff] %v289_v7  ;;  %v178_v10 = vadd.f32 %v177_v8, %v496_v34  ;;  %v291_v11 = vadd.f32 %v290_v9, %v498_v35 }
  0xde   :  { %v181_v12 = vpop.f32.mrf.mxu0  ;;  %v294_v13 = vpop.f32.mrf.mxu1 }
  0xdf   :  { %328 = vst [vmem:[%s631_s3 + $0x88] sm:$0xff] %v178_v10  ;;  %330 = vst [vmem:[%s631_s3 + $0x98] sm:$0xff] %v291_v11  ;;  %v182_v14 = vadd.f32 %v181_v12, %v492_v32  ;;  %v295_v15 = vadd.f32 %v294_v13, %v494_v33 }
  0xe0   :  { %v183_v16 = vpop.f32.mrf.mxu0  ;;  %v296_v17 = vpop.f32.mrf.mxu1 }
  0xe1   :  { %331 = vst [vmem:[%s631_s3 + $0xa0] sm:$0xff] %v182_v14  ;;  %333 = vst [vmem:[%s631_s3 + $0xb0] sm:$0xff] %v295_v15  ;;  %v184_v18 = vadd.f32 %v183_v16, %v496_v34  ;;  %v297_v19 = vadd.f32 %v296_v17, %v498_v35 }
  0xe2   :  { %v187_v20 = vpop.f32.mrf.mxu0  ;;  %v300_v21 = vpop.f32.mrf.mxu1 }
  0xe3   :  { %332 = vst [vmem:[%s631_s3 + $0xa8] sm:$0xff] %v184_v18  ;;  %334 = vst [vmem:[%s631_s3 + $0xb8] sm:$0xff] %v297_v19  ;;  %v188_v22 = vadd.f32 %v187_v20, %v492_v32  ;;  %v301_v23 = vadd.f32 %v300_v21, %v494_v33 }
  0xe4   :  { %v189_v24 = vpop.f32.mrf.mxu0  ;;  %v302_v25 = vpop.f32.mrf.mxu1 }
  0xe5   :  { %335 = vst [vmem:[%s631_s3 + $0xc0] sm:$0xff] %v188_v22  ;;  %337 = vst [vmem:[%s631_s3 + $0xd0] sm:$0xff] %v301_v23  ;;  %v190_v26 = vadd.f32 %v189_v24, %v496_v34  ;;  %v303_v27 = vadd.f32 %v302_v25, %v498_v35 }
  0xe6   :  { %v193_v28 = vpop.f32.mrf.mxu0  ;;  %v306_v29 = vpop.f32.mrf.mxu1 }
  0xe7   :  { %336 = vst [vmem:[%s631_s3 + $0xc8] sm:$0xff] %v190_v26  ;;  %338 = vst [vmem:[%s631_s3 + $0xd8] sm:$0xff] %v303_v27  ;;  %v194_v30 = vadd.f32 %v193_v28, %v492_v32  ;;  %v307_v31 = vadd.f32 %v306_v29, %v494_v33 }
  0xe8   :  { %v195_v36 = vpop.f32.mrf.mxu0  ;;  %v308_v37 = vpop.f32.mrf.mxu1 }
  0xe9   :  { %339 = vst [vmem:[%s631_s3 + $0xe0] sm:$0xff] %v194_v30  ;;  %341 = vst [vmem:[%s631_s3 + $0xf0] sm:$0xff] %v307_v31  ;;  %v196_v38 = vadd.f32 %v195_v36, %v496_v34  ;;  %v309_v39 = vadd.f32 %v308_v37, %v498_v35 }
  0xeb   :  { %340 = vst [vmem:[%s631_s3 + $0xe8] sm:$0xff] %v196_v38  ;;  %342 = vst [vmem:[%s631_s3 + $0xf8] sm:$0xff] %v309_v39 }

// kernel: seq2seq_forward.5
= control target key start
LH: loop header
LB: loop body
LE: loop exit
PB: predicated region body
PF: predicated region fallthrough
CT: control target
= control target key end

     0   :  { %v298_v3 = vmov 0.0   ;;  %vm57_vm0 = vcmask 261120   ;;  %v37_v22 = vlaneseq  ;;  %s455_s1 = inlined_call_operand.vmem [shape: f32[32,512], index: 1, kind: input, shape index: {}]   ;;  %s456_s0 = inlined_call_operand.vmem [shape: f32[40,32], index: 0, kind: input, shape index: {}]   ;;  %s457_s2 = inlined_call_operand.vmem [shape: f32[1,512], index: 2, kind: input, shape index: {}]   ;;  %s458_s3 = inlined_call_operand.vmem [shape: f32[40,512], index: 3, kind: output, shape index: {}]  }
   0x1   :  { %v32_v0 = vld [vmem:[%s455_s1 + $0x68] sm:$0xff]  ;;  %v34_v1 = vld [vmem:[%s455_s1 + $0x78] sm:$0xff]  ;;  %v31_v2 = vld [vmem:[%s455_s1 + $0x60] sm:$0xff]  ;;  %137 = vmatprep.mubr.f32.mxu0 %v298_v3  ;;  %232 = vmatprep.mubr.f32.mxu1 %v298_v3 }
   0x2   :  { %97 = vmatprep.subr.mxu0 %v32_v0  ;;  %192 = vmatprep.subr.mxu1 %v34_v1  ;;  %v33_v4 = vld [vmem:[%s455_s1 + $0x70] sm:$0xff]  ;;  %v28_v5 = vld [vmem:[%s455_s1 + $0x48] sm:$0xff]  ;;  %v30_v6 = vld [vmem:[%s455_s1 + $0x58] sm:$0xff]  ;;  %v38_v23 = vshrl.u32 %v37_v22, 7 }
   0x3   :  { %98 = vmatpush1.msra.mxu0 %v31_v2  ;;  %193 = vmatpush1.msra.mxu1 %v33_v4  ;;  %v27_v7 = vld [vmem:[%s455_s1 + $0x40] sm:$0xff]  ;;  %v29_v8 = vld [vmem:[%s455_s1 + $0x50] sm:$0xff]  ;;  %v24_v9 = vld [vmem:[%s455_s1 + $0x28] sm:$0xff] }
   0x4   :  { %99 = vmatprep.subr.mxu0 %v28_v5  ;;  %194 = vmatprep.subr.mxu1 %v30_v6  ;;  %v26_v10 = vld [vmem:[%s455_s1 + $0x38] sm:$0xff]  ;;  %v23_v11 = vld [vmem:[%s455_s1 + $0x20] sm:$0xff]  ;;  %v25_v12 = vld [vmem:[%s455_s1 + $0x30] sm:$0xff]  ;;  %v39_v24 = vsub.s32 0, %v38_v23  ;;  %v47_v25 = vsub.s32 2, %v38_v23  ;;  %v43_v27 = vsub.s32 1, %v38_v23 }
   0x5   :  { %100 = vmatpush1.msra.mxu0 %v27_v7  ;;  %195 = vmatpush1.msra.mxu1 %v29_v8  ;;  %v20_v13 = vld [vmem:[%s455_s1 + $0x8] sm:$0xff]  ;;  %v22_v14 = vld [vmem:[%s455_s1 + $0x18] sm:$0xff]  ;;  %v19_v15 = vld [vmem:[%s455_s1] sm:$0xff]  ;;  %v51_v28 = vsub.s32 3, %v38_v23 }
   0x6   :  { %101 = vmatprep.subr.mxu0 %v24_v9  ;;  %196 = vmatprep.subr.mxu1 %v26_v10  ;;  %v21_v16 = vld [vmem:[%s455_s1 + $0x10] sm:$0xff]  ;;  %v14_v17 = vld [vmem:[%s456_s0] sm:$0xff]  ;;  %v15_v18 = vld [vmem:[%s456_s0 + $0x8] sm:$0xff] }
   0x7   :  { %102 = vmatpush1.msra.mxu0 %v23_v11  ;;  %197 = vmatpush1.msra.mxu1 %v25_v12  ;;  %v16_v19 = vld [vmem:[%s456_s0 + $0x10] sm:$0xff]  ;;  %v17_v20 = vld [vmem:[%s456_s0 + $0x18] sm:$0xff]  ;;  %v18_v21 = vld [vmem:[%s456_s0 + $0x20] sm:$0xff] }
   0x8   :  { %103 = vmatprep.subr.mxu0 %v20_v13  ;;  %198 = vmatprep.subr.mxu1 %v22_v14  ;;  %v35_v26 = vld [vmem:[%s457_s2] sm:$0xf] }
   0x9   :  { %104 = vmatpush1.msra.mxu0 %v19_v15  ;;  %199 = vmatpush1.msra.mxu1 %v21_v16  ;;  %v40_v29 = vrot.slane %v35_v26, %v39_v24  ;;  %v48_v30 = vrot.slane %v35_v26, %v47_v25  ;;  %v44_v31 = vrot.slane %v35_v26, %v43_v27 }
   0xa   :  { %287 = vmatmul.mubr.msk.f32.vlgmr.msra.gmra.mxu0 %vm57_vm0, %v14_v17  ;;  %292 = vmatmul.mubr.msk.f32.vlgmr.msra.gmra.mxu1 %vm57_vm0, %v14_v17  ;;  %v52_v32 = vrot.slane %v35_v26, %v51_v28 }
   0xb   :  { %143 = vmatprep.mubr.f32.mxu0 %v298_v3  ;;  %238 = vmatprep.mubr.f32.mxu1 %v298_v3 }
   0xe   :  { %288 = vmatmul.mubr.msk.f32.gmra.mxu0 %vm57_vm0, %v15_v18  ;;  %293 = vmatmul.mubr.msk.f32.gmra.mxu1 %vm57_vm0, %v15_v18 }
   0xf   :  { %149 = vmatprep.mubr.f32.mxu0 %v298_v3  ;;  %244 = vmatprep.mubr.f32.mxu1 %v298_v3 }
  0x12   :  { %289 = vmatmul.mubr.msk.f32.gmra.mxu0 %vm57_vm0, %v16_v19  ;;  %294 = vmatmul.mubr.msk.f32.gmra.mxu1 %vm57_vm0, %v16_v19 }
  0x13   :  { %155 = vmatprep.mubr.f32.mxu0 %v298_v3  ;;  %250 = vmatprep.mubr.f32.mxu1 %v298_v3 }
  0x16   :  { %290 = vmatmul.mubr.msk.f32.gmra.mxu0 %vm57_vm0, %v17_v20  ;;  %295 = vmatmul.mubr.msk.f32.gmra.mxu1 %vm57_vm0, %v17_v20 }
  0x17   :  { %161 = vmatprep.mubr.f32.mxu0 %v298_v3  ;;  %256 = vmatprep.mubr.f32.mxu1 %v298_v3 }
  0x1a   :  { %291 = vmatmul.mubr.msk.f32.gmra.mxu0 %vm57_vm0, %v18_v21  ;;  %296 = vmatmul.mubr.msk.f32.gmra.mxu1 %vm57_vm0, %v18_v21 }
  0xca   :  { %v139_v33 = vpop.f32.mrf.mxu0  ;;  %v234_v34 = vpop.f32.mrf.mxu1 }
  0xcb   :  { %v140_v35 = vadd.f32 %v139_v33, %v40_v29  ;;  %v235_v36 = vadd.f32 %v234_v34, %v48_v30 }
  0xcc   :  { %v141_v37 = vpop.f32.mrf.mxu0  ;;  %v236_v38 = vpop.f32.mrf.mxu1 }
  0xcd   :  { %263 = vst [vmem:[%s458_s3] sm:$0xff] %v140_v35  ;;  %265 = vst [vmem:[%s458_s3 + $0x10] sm:$0xff] %v235_v36  ;;  %v142_v39 = vadd.f32 %v141_v37, %v44_v31  ;;  %v237_v40 = vadd.f32 %v236_v38, %v52_v32 }
  0xce   :  { %v145_v41 = vpop.f32.mrf.mxu0  ;;  %v240_v42 = vpop.f32.mrf.mxu1 }
  0xcf   :  { %264 = vst [vmem:[%s458_s3 + $0x8] sm:$0xff] %v142_v39  ;;  %266 = vst [vmem:[%s458_s3 + $0x18] sm:$0xff] %v237_v40  ;;  %v146_v43 = vadd.f32 %v145_v41, %v40_v29  ;;  %v241_v44 = vadd.f32 %v240_v42, %v48_v30 }
  0xd0   :  { %v147_v45 = vpop.f32.mrf.mxu0  ;;  %v242_v46 = vpop.f32.mrf.mxu1 }
  0xd1   :  { %267 = vst [vmem:[%s458_s3 + $0x20] sm:$0xff] %v146_v43  ;;  %269 = vst [vmem:[%s458_s3 + $0x30] sm:$0xff] %v241_v44  ;;  %v148_v47 = vadd.f32 %v147_v45, %v44_v31  ;;  %v243_v48 = vadd.f32 %v242_v46, %v52_v32 }
  0xd2   :  { %v151_v49 = vpop.f32.mrf.mxu0  ;;  %v246_v50 = vpop.f32.mrf.mxu1 }
  0xd3   :  { %268 = vst [vmem:[%s458_s3 + $0x28] sm:$0xff] %v148_v47  ;;  %270 = vst [vmem:[%s458_s3 + $0x38] sm:$0xff] %v243_v48  ;;  %v152_v51 = vadd.f32 %v151_v49, %v40_v29  ;;  %v247_v52 = vadd.f32 %v246_v50, %v48_v30 }
  0xd4   :  { %v153_v53 = vpop.f32.mrf.mxu0  ;;  %v248_v54 = vpop.f32.mrf.mxu1 }
  0xd5   :  { %271 = vst [vmem:[%s458_s3 + $0x40] sm:$0xff] %v152_v51  ;;  %273 = vst [vmem:[%s458_s3 + $0x50] sm:$0xff] %v247_v52  ;;  %v154_v55 = vadd.f32 %v153_v53, %v44_v31  ;;  %v249_v56 = vadd.f32 %v248_v54, %v52_v32 }
  0xd6   :  { %v157_v57 = vpop.f32.mrf.mxu0  ;;  %v252_v58 = vpop.f32.mrf.mxu1 }
  0xd7   :  { %272 = vst [vmem:[%s458_s3 + $0x48] sm:$0xff] %v154_v55  ;;  %274 = vst [vmem:[%s458_s3 + $0x58] sm:$0xff] %v249_v56  ;;  %v158_v59 = vadd.f32 %v157_v57, %v40_v29  ;;  %v253_v60 = vadd.f32 %v252_v58, %v48_v30 }
  0xd8   :  { %v159_v61 = vpop.f32.mrf.mxu0  ;;  %v254_v62 = vpop.f32.mrf.mxu1 }
  0xd9   :  { %275 = vst [vmem:[%s458_s3 + $0x60] sm:$0xff] %v158_v59  ;;  %277 = vst [vmem:[%s458_s3 + $0x70] sm:$0xff] %v253_v60  ;;  %v160_v63 = vadd.f32 %v159_v61, %v44_v31  ;;  %v255_v0 = vadd.f32 %v254_v62, %v52_v32 }
  0xda   :  { %v163_v1 = vpop.f32.mrf.mxu0  ;;  %v258_v2 = vpop.f32.mrf.mxu1 }
  0xdb   :  { %276 = vst [vmem:[%s458_s3 + $0x68] sm:$0xff] %v160_v63  ;;  %278 = vst [vmem:[%s458_s3 + $0x78] sm:$0xff] %v255_v0  ;;  %v164_v3 = vadd.f32 %v163_v1, %v40_v29  ;;  %v259_v4 = vadd.f32 %v258_v2, %v48_v30 }
  0xdc   :  { %v165_v5 = vpop.f32.mrf.mxu0  ;;  %v260_v6 = vpop.f32.mrf.mxu1 }
  0xdd   :  { %279 = vst [vmem:[%s458_s3 + $0x80] sm:$0xff] %v164_v3  ;;  %281 = vst [vmem:[%s458_s3 + $0x90] sm:$0xff] %v259_v4  ;;  %v166_v7 = vadd.f32 %v165_v5, %v44_v31  ;;  %v261_v8 = vadd.f32 %v260_v6, %v52_v32 }
  0xdf   :  { %280 = vst [vmem:[%s458_s3 + $0x88] sm:$0xff] %v166_v7  ;;  %282 = vst [vmem:[%s458_s3 + $0x98] sm:$0xff] %v261_v8 }

// kernel: seq2seq_forward.6
= control target key start
LH: loop header
LB: loop body
LE: loop exit
PB: predicated region body
PF: predicated region fallthrough
CT: control target
= control target key end

     0   :  { %v4992_v3 = vmov 0.0   ;;  %v5000_v5 = vmov 0   ;;  %s4986_s3 = inlined_call_operand.vmem [shape: f32[128,512], index: 3, kind: input, shape index: {}]   ;;  %s4987_s0 = inlined_call_operand.vmem [shape: s32[8,1], index: 0, kind: input, shape index: {}]   ;;  %s4988_s1 = inlined_call_operand.vmem [shape: f32[8,8,512], index: 1, kind: input, shape index: {}]   ;;  %s4989_s4 = inlined_call_operand.vmem [shape: f32[128,512], index: 4, kind: input, shape index: {}]   ;;  %s4990_s2 = inlined_call_operand.vmem [shape: f32[5,8,512], index: 2, kind: input, shape index: {}]   ;;  %s4991_s5 = inlined_call_operand.vmem [shape: f32[5,8,128], index: 5, kind: output, shape index: {}]  }
   0x1   :  { %v2899_v0 = vld [vmem:[%s4986_s3 + $0x1e8] sm:$0xff]  ;;  %v2904_v1 = vld [vmem:[%s4986_s3 + $0x1e0] sm:$0xff]  ;;  %217 = vmatprep.mubr.f32.mxu0 %v4992_v3  ;;  %288 = vmatprep.mubr.f32.mxu1 %v4992_v3  ;;  %v2948_v10 = vld [vmem:[%s4986_s3 + $0x1f8] sm:$0xff] }
   0x2   :  { %5126 = vst [vmem:[#allocation2_spill] sm:$0xff] %v2899_v0  ;;  %v2909_v2 = vld [vmem:[%s4986_s3 + $0x1c8] sm:$0xff]  ;;  %153 = vmatprep.subr.mxu0 %v2899_v0  ;;  %v2917_v4 = vld [vmem:[%s4986_s3 + $0x1c0] sm:$0xff]  ;;  %2590 = vset.pattern.permute.xlu0 %v5000_v5  ;;  %5127 = vst [vmem:[#allocation3_spill] sm:$0xff] %v2948_v10 }
   0x3   :  { %154 = vmatpush1.msra.mxu0 %v2904_v1  ;;  %v2924_v6 = vld [vmem:[%s4986_s3 + $0x1a8] sm:$0xff]  ;;  %2591 = vset.pattern.permute.xlu1 %v5000_v5  ;;  %v2931_v7 = vld [vmem:[%s4986_s3 + $0x1a0] sm:$0xff]  ;;  %v2960_v12 = vld [vmem:[%s4986_s3 + $0x1f0] sm:$0xff] }
   0x4   :  { %155 = vmatprep.subr.mxu0 %v2909_v2  ;;  %v2937_v8 = vld [vmem:[%s4986_s3 + $0x188] sm:$0xff]  ;;  %v2943_v9 = vld [vmem:[%s4986_s3 + $0x180] sm:$0xff]  ;;  %224 = vmatprep.subr.mxu1 %v2948_v10  ;;  %v2972_v14 = vld [vmem:[%s4986_s3 + $0x1d8] sm:$0xff] }
   0x5   :  { %156 = vmatpush1.msra.mxu0 %v2917_v4  ;;  %v2954_v11 = vld [vmem:[%s4986_s3 + $0x168] sm:$0xff]  ;;  %v2966_v13 = vld [vmem:[%s4986_s3 + $0x160] sm:$0xff]  ;;  %225 = vmatpush1.msra.mxu1 %v2960_v12  ;;  %v2977_v15 = vld [vmem:[%s4986_s3 + $0x1d0] sm:$0xff] }
   0x6   :  { %157 = vmatprep.subr.mxu0 %v2924_v6  ;;  %v2983_v16 = vld [vmem:[%s4986_s3 + $0x148] sm:$0xff]  ;;  %226 = vmatprep.subr.mxu1 %v2972_v14  ;;  %v2989_v17 = vld [vmem:[%s4986_s3 + $0x1b8] sm:$0xff]  ;;  %v2995_v18 = vld [vmem:[%s4986_s3 + $0x140] sm:$0xff] }
   0x7   :  { %158 = vmatpush1.msra.mxu0 %v2931_v7  ;;  %227 = vmatpush1.msra.mxu1 %v2977_v15  ;;  %v3001_v19 = vld [vmem:[%s4986_s3 + $0x1b0] sm:$0xff]  ;;  %v3006_v20 = vld [vmem:[%s4986_s3 + $0x198] sm:$0xff]  ;;  %v3012_v21 = vld [vmem:[%s4986_s3 + $0x128] sm:$0xff] }
   0x8   :  { %159 = vmatprep.subr.mxu0 %v2937_v8  ;;  %228 = vmatprep.subr.mxu1 %v2989_v17  ;;  %v3018_v22 = vld [vmem:[%s4986_s3 + $0x190] sm:$0xff]  ;;  %v3024_v23 = vld [vmem:[%s4986_s3 + $0x120] sm:$0xff]  ;;  %v3030_v24 = vld [vmem:[%s4986_s3 + $0x178] sm:$0xff] }
   0x9   :  { %160 = vmatpush1.msra.mxu0 %v2943_v9  ;;  %229 = vmatpush1.msra.mxu1 %v3001_v19  ;;  %v3036_v25 = vld [vmem:[%s4986_s3 + $0x108] sm:$0xff]  ;;  %v3042_v26 = vld [vmem:[%s4986_s3 + $0x170] sm:$0xff]  ;;  %v3048_v27 = vld [vmem:[%s4986_s3 + $0x100] sm:$0xff] }
   0xa   :  { %161 = vmatprep.subr.mxu0 %v2954_v11  ;;  %230 = vmatprep.subr.mxu1 %v3006_v20  ;;  %v3054_v28 = vld [vmem:[%s4986_s3 + $0x158] sm:$0xff]  ;;  %v3060_v29 = vld [vmem:[%s4986_s3 + $0xe8] sm:$0xff]  ;;  %v3066_v30 = vld [vmem:[%s4986_s3 + $0x150] sm:$0xff] }
   0xb   :  { %162 = vmatpush1.msra.mxu0 %v2966_v13  ;;  %231 = vmatpush1.msra.mxu1 %v3018_v22  ;;  %v3072_v31 = vld [vmem:[%s4986_s3 + $0xe0] sm:$0xff]  ;;  %v3078_v32 = vld [vmem:[%s4986_s3 + $0x138] sm:$0xff]  ;;  %v3084_v33 = vld [vmem:[%s4986_s3 + $0xc8] sm:$0xff] }
   0xc   :  { %163 = vmatprep.subr.mxu0 %v2983_v16  ;;  %232 = vmatprep.subr.mxu1 %v3030_v24  ;;  %v3090_v34 = vld [vmem:[%s4986_s3 + $0x130] sm:$0xff]  ;;  %v3096_v35 = vld [vmem:[%s4986_s3 + $0xc0] sm:$0xff]  ;;  %v3102_v36 = vld [vmem:[%s4986_s3 + $0x118] sm:$0xff] }
   0xd   :  { %164 = vmatpush1.msra.mxu0 %v2995_v18  ;;  %233 = vmatpush1.msra.mxu1 %v3042_v26  ;;  %v3108_v37 = vld [vmem:[%s4986_s3 + $0xa8] sm:$0xff]  ;;  %v3114_v38 = vld [vmem:[%s4986_s3 + $0x110] sm:$0xff]  ;;  %v3120_v39 = vld [vmem:[%s4986_s3 + $0xa0] sm:$0xff] }
   0xe   :  { %165 = vmatprep.subr.mxu0 %v3012_v21  ;;  %234 = vmatprep.subr.mxu1 %v3054_v28  ;;  %v3126_v40 = vld [vmem:[%s4986_s3 + $0xf8] sm:$0xff]  ;;  %v3132_v41 = vld [vmem:[%s4986_s3 + $0x88] sm:$0xff]  ;;  %v3138_v42 = vld [vmem:[%s4986_s3 + $0xf0] sm:$0xff] }
   0xf   :  { %166 = vmatpush1.msra.mxu0 %v3024_v23  ;;  %235 = vmatpush1.msra.mxu1 %v3066_v30  ;;  %v3144_v43 = vld [vmem:[%s4986_s3 + $0x80] sm:$0xff]  ;;  %v3150_v44 = vld [vmem:[%s4986_s3 + $0xd8] sm:$0xff]  ;;  %v3156_v45 = vld [vmem:[%s4986_s3 + $0x68] sm:$0xff] }
  0x10   :  { %167 = vmatprep.subr.mxu0 %v3036_v25  ;;  %236 = vmatprep.subr.mxu1 %v3078_v32  ;;  %5128 = vst [vmem:[#allocation4_spill] sm:$0xff] %v3144_v43  ;;  %5129 = vst [vmem:[#allocation5_spill] sm:$0xff] %v3156_v45  ;;  %v3162_v46 = vld [vmem:[%s4986_s3 + $0xd0] sm:$0xff]  ;;  %v3168_v47 = vld [vmem:[%s4986_s3 + $0x60] sm:$0xff] }
  0x11   :  { %168 = vmatpush1.msra.mxu0 %v3048_v27  ;;  %237 = vmatpush1.msra.mxu1 %v3090_v34  ;;  %5130 = vst [vmem:[#allocation6_spill] sm:$0xff] %v3168_v47  ;;  %v3174_v48 = vld [vmem:[%s4986_s3 + $0xb8] sm:$0xff]  ;;  %v3180_v49 = vld [vmem:[%s4986_s3 + $0x48] sm:$0xff]  ;;  %v3186_v50 = vld [vmem:[%s4986_s3 + $0xb0] sm:$0xff] }
  0x12   :  { %169 = vmatprep.subr.mxu0 %v3060_v29  ;;  %238 = vmatprep.subr.mxu1 %v3102_v36  ;;  %5131 = vst [vmem:[#allocation7_spill] sm:$0xff] %v3180_v49  ;;  %v3192_v51 = vld [vmem:[%s4986_s3 + $0x40] sm:$0xff]  ;;  %v3198_v52 = vld [vmem:[%s4986_s3 + $0x98] sm:$0xff]  ;;  %v3209_v54 = vld [vmem:[%s4986_s3 + $0x28] sm:$0xff] }
  0x13   :  { %170 = vmatpush1.msra.mxu0 %v3072_v31  ;;  %239 = vmatpush1.msra.mxu1 %v3114_v38  ;;  %5132 = vst [vmem:[#allocation8_spill] sm:$0xff] %v3192_v51  ;;  %v3203_v53 = vld [vmem:[%s4987_s0] sm:$0xff]  ;;  %5134 = vst [vmem:[#allocation10_spill] sm:$0xff] %v3209_v54  ;;  %v3215_v55 = vld [vmem:[%s4986_s3 + $0x90] sm:$0xff] }
  0x14   :  { %171 = vmatprep.subr.mxu0 %v3084_v33  ;;  %240 = vmatprep.subr.mxu1 %v3126_v40  ;;  %5133 = vst [vmem:[#allocation9_spill] sm:$0xff] %v3203_v53  ;;  %5135 = vst [vmem:[#allocation11_spill] sm:$0xff] %v3215_v55  ;;  %v3221_v56 = vld [vmem:[%s4986_s3 + $0x20] sm:$0xff]  ;;  %v3227_v57 = vld [vmem:[%s4986_s3 + $0x78] sm:$0xff]  ;;  %vm323_vm0 = vcmp.gt.s32.totalorder %v3203_v53, 0  ;;  %vm506_vm1 = vcmp.gt.s32.totalorder %v3203_v53, 1 }
  0x15   :  { %172 = vmatpush1.msra.mxu0 %v3096_v35  ;;  %241 = vmatpush1.msra.mxu1 %v3138_v42  ;;  %5136 = vst [vmem:[#allocation12_spill] sm:$0xff] %v3221_v56  ;;  %5137 = vst [vmem:[#allocation13_spill] sm:$0xff] %v3227_v57  ;;  %v3233_v58 = vld [vmem:[%s4986_s3 + $0x8] sm:$0xff]  ;;  %v3239_v59 = vld [vmem:[%s4986_s3 + $0x70] sm:$0xff]  ;;  %v324_v3 = vsel %vm323_vm0, 1, %v5000_v5  ;;  %vm1055_vm2 = vcmp.gt.s32.totalorder %v3203_v53, 4 }
  0x16   :  { %173 = vmatprep.subr.mxu0 %v3108_v37  ;;  %242 = vmatprep.subr.mxu1 %v3150_v44  ;;  %5138 = vst [vmem:[#allocation14_spill] sm:$0xff] %v3233_v58  ;;  %5139 = vst [vmem:[#allocation15_spill] sm:$0xff] %v3239_v59  ;;  %v3246_v60 = vld [vmem:[%s4986_s3] sm:$0xff]  ;;  %v3252_v61 = vld [vmem:[%s4986_s3 + $0x58] sm:$0xff]  ;;  %vm1421_vm3 = vcmp.gt.s32.totalorder %v3203_v53, 6 }
  0x17   :  { %174 = vmatpush1.msra.mxu0 %v3120_v39  ;;  %243 = vmatpush1.msra.mxu1 %v3162_v46  ;;  %5140 = vst [vmem:[#allocation16_spill] sm:$0xff] %v3246_v60  ;;  %5141 = vst [vmem:[#allocation17_spill] sm:$0xff] %v3252_v61  ;;  %v3259_v62 = vld [vmem:[%s4986_s3 + $0x50] sm:$0xff]  ;;  %v3266_v63 = vld [vmem:[%s4986_s3 + $0x38] sm:$0xff] }
  0x18   :  { %175 = vmatprep.subr.mxu0 %v3132_v41  ;;  %244 = vmatprep.subr.mxu1 %v3174_v48  ;;  %5142 = vst [vmem:[#allocation18_spill] sm:$0xff] %v3259_v62  ;;  %5143 = vst [vmem:[#allocation19_spill] sm:$0xff] %v3266_v63  ;;  %v3288_v5 = vld [vmem:[%s4986_s3 + $0x10] sm:$0xff] }
  0x19   :  { %176 = vmatpush1.msra.mxu0 %v3144_v43  ;;  %245 = vmatpush1.msra.mxu1 %v3186_v50  ;;  %5147 = vst [vmem:[#allocation22_spill] sm:$0xff] %v3288_v5 }
  0x1a   :  { %177 = vmatprep.subr.mxu0 %v3156_v45  ;;  %246 = vmatprep.subr.mxu1 %v3198_v52 }
  0x1b   :  { %178 = vmatpush1.msra.mxu0 %v3168_v47  ;;  %247 = vmatpush1.msra.mxu1 %v3215_v55 }
  0x1c   :  { %179 = vmatprep.subr.mxu0 %v3180_v49  ;;  %248 = vmatprep.subr.mxu1 %v3227_v57 }
  0x1d   :  { %180 = vmatpush1.msra.mxu0 %v3192_v51  ;;  %249 = vmatpush1.msra.mxu1 %v3239_v59  ;;  %v5152_v53 = vld [vmem:[#allocation14_spill] sm:$0xff] }
  0x1e   :  { %181 = vmatprep.subr.mxu0 %v3209_v54  ;;  %250 = vmatprep.subr.mxu1 %v3252_v61  ;;  %v3282_v54 = vld [vmem:[%s4986_s3 + $0x18] sm:$0xff] }
  0x1f   :  { %182 = vmatpush1.msra.mxu0 %v3221_v56  ;;  %v3274_v56 = vld [vmem:[%s4986_s3 + $0x30] sm:$0xff]  ;;  %251 = vmatpush1.msra.mxu1 %v3259_v62  ;;  %5146 = vst [vmem:[#allocation21_spill] sm:$0xff] %v3282_v54 }
  0x20   :  { %183 = vmatprep.subr.mxu0 %v3233_v58  ;;  %5144 = vst [vmem:[#allocation20_spill] sm:$0xff] %v3274_v56  ;;  %v5145_v58 = vmov 0.0   ;;  %252 = vmatprep.subr.mxu1 %v3266_v63 }
  0x21   :  { %184 = vmatpush1.msra.mxu0 %v3246_v60  ;;  %326 = vperm.xlu0 %2590, %v324_v3   ;;  %v5148_v60 = vmov 0  }
  0x22   :  { %218 = vmatmul.mubr.f32.vlgmr.msra.gmra.mxu0 %v5145_v58  ;;  %253 = vmatpush1.msra.mxu1 %v3274_v56  ;;  %v507_v51 = vsel %vm506_vm1, 1, %v5148_v60  ;;  %v1056_v3 = vsel %vm1055_vm2, 1, %v5148_v60 }
  0x23   :  { %336 = vmatprep.subr.mxu0 %v2899_v0  ;;  %254 = vmatprep.subr.mxu1 %v3282_v54 }
  0x24   :  { %337 = vmatpush1.msra.mxu0 %v2904_v1  ;;  %255 = vmatpush1.msra.mxu1 %v3288_v5 }
  0x25   :  { %338 = vmatprep.subr.mxu0 %v2909_v2  ;;  %289 = vmatmul.mubr.f32.vlgmr.msra.gmra.mxu1 %v5145_v58 }
  0x26   :  { %509 = vperm.xlu0 %2590, %v507_v51   ;;  %407 = vmatprep.subr.mxu1 %v2948_v10  ;;  %v1422_v51 = vsel %vm1421_vm3, 1, %v5148_v60  ;;  %v5151_v60 = vld [vmem:[#allocation12_spill] sm:$0xff] }
  0x27   :  { %339 = vmatpush1.msra.mxu0 %v2917_v4  ;;  %408 = vmatpush1.msra.mxu1 %v2960_v12 }
  0x28   :  { %340 = vmatprep.subr.mxu0 %v2924_v6  ;;  %409 = vmatprep.subr.mxu1 %v2972_v14 }
  0x29   :  { %341 = vmatpush1.msra.mxu0 %v2931_v7  ;;  %410 = vmatpush1.msra.mxu1 %v2977_v15 }
  0x2a   :  { %1058 = vperm.xlu0 %2590, %v1056_v3   ;;  %411 = vmatprep.subr.mxu1 %v2989_v17  ;;  %v5149_v3 = vld [vmem:[#allocation8_spill] sm:$0xff] }
  0x2b   :  { %342 = vmatprep.subr.mxu0 %v2937_v8  ;;  %412 = vmatpush1.msra.mxu1 %v3001_v19 }
  0x2c   :  { %343 = vmatpush1.msra.mxu0 %v2943_v9  ;;  %413 = vmatprep.subr.mxu1 %v3006_v20 }
  0x2d   :  { %344 = vmatprep.subr.mxu0 %v2954_v11  ;;  %414 = vmatpush1.msra.mxu1 %v3018_v22 }
  0x2e   :  { %1424 = vperm.xlu0 %2590, %v1422_v51   ;;  %415 = vmatprep.subr.mxu1 %v3030_v24  ;;  %v5150_v51 = vld [vmem:[#allocation10_spill] sm:$0xff] }
  0x2f   :  { %345 = vmatpush1.msra.mxu0 %v2966_v13  ;;  %416 = vmatpush1.msra.mxu1 %v3042_v26 }
  0x30   :  { %346 = vmatprep.subr.mxu0 %v2983_v16  ;;  %417 = vmatprep.subr.mxu1 %v3054_v28 }
  0x31   :  { %347 = vmatpush1.msra.mxu0 %v2995_v18  ;;  %418 = vmatpush1.msra.mxu1 %v3066_v30 }
  0x32   :  { %348 = vmatprep.subr.mxu0 %v3012_v21  ;;  %419 = vmatprep.subr.mxu1 %v3078_v32 }
  0x33   :  { %349 = vmatpush1.msra.mxu0 %v3024_v23  ;;  %420 = vmatpush1.msra.mxu1 %v3090_v34 }
  0x34   :  { %350 = vmatprep.subr.mxu0 %v3036_v25  ;;  %421 = vmatprep.subr.mxu1 %v3102_v36 }
  0x35   :  { %351 = vmatpush1.msra.mxu0 %v3048_v27  ;;  %422 = vmatpush1.msra.mxu1 %v3114_v38 }
  0x36   :  { %352 = vmatprep.subr.mxu0 %v3060_v29  ;;  %423 = vmatprep.subr.mxu1 %v3126_v40 }
  0x37   :  { %353 = vmatpush1.msra.mxu0 %v3072_v31  ;;  %424 = vmatpush1.msra.mxu1 %v3138_v42 }
  0x38   :  { %354 = vmatprep.subr.mxu0 %v3084_v33  ;;  %425 = vmatprep.subr.mxu1 %v3150_v44 }
  0x39   :  { %355 = vmatpush1.msra.mxu0 %v3096_v35  ;;  %426 = vmatpush1.msra.mxu1 %v3162_v46 }
  0x3a   :  { %356 = vmatprep.subr.mxu0 %v3108_v37  ;;  %427 = vmatprep.subr.mxu1 %v3174_v48 }
  0x3b   :  { %357 = vmatpush1.msra.mxu0 %v3120_v39  ;;  %428 = vmatpush1.msra.mxu1 %v3186_v50 }
  0x3c   :  { %358 = vmatprep.subr.mxu0 %v3132_v41  ;;  %429 = vmatprep.subr.mxu1 %v3198_v52 }
  0x3d   :  { %359 = vmatpush1.msra.mxu0 %v3144_v43  ;;  %430 = vmatpush1.msra.mxu1 %v3215_v55 }
  0x3e   :  { %360 = vmatprep.subr.mxu0 %v3156_v45  ;;  %431 = vmatprep.subr.mxu1 %v3227_v57 }
  0x3f   :  { %361 = vmatpush1.msra.mxu0 %v3168_v47  ;;  %432 = vmatpush1.msra.mxu1 %v3239_v59  ;;  %v5153_v59 = vld [vmem:[#allocation16_spill] sm:$0xff] }
  0x40   :  { %362 = vmatprep.subr.mxu0 %v3180_v49  ;;  %433 = vmatprep.subr.mxu1 %v3252_v61 }
  0x41   :  { %363 = vmatpush1.msra.mxu0 %v5149_v3  ;;  %434 = vmatpush1.msra.mxu1 %v3259_v62  ;;  %v151_v62 = vld [vmem:[%s4988_s1 + $0x10] sm:$0xff] }
  0x42   :  { %364 = vmatprep.subr.mxu0 %v5150_v51  ;;  %435 = vmatprep.subr.mxu1 %v3266_v63 }
  0x43   :  { %365 = vmatpush1.msra.mxu0 %v5151_v60  ;;  %436 = vmatpush1.msra.mxu1 %v3274_v56  ;;  %v149_v56 = vld [vmem:[%s4988_s1] sm:$0xff] }
  0x44   :  { %366 = vmatprep.subr.mxu0 %v5152_v53  ;;  %437 = vmatprep.subr.mxu1 %v3282_v54  ;;  %v150_v54 = vld [vmem:[%s4988_s1 + $0x8] sm:$0xff] }
  0x45   :  { %367 = vmatpush1.msra.mxu0 %v5153_v59  ;;  %400 = vmatprep.mubr.f32.mxu0 %v5145_v58 }
  0x46   :  { %438 = vmatpush1.msra.mxu1 %v3288_v5  ;;  %471 = vmatprep.mubr.f32.mxu1 %v5145_v58 }
  0x47   :  { %519 = vmatprep.subr.mxu0 %v2899_v0  ;;  %590 = vmatprep.subr.mxu1 %v2948_v10  ;;  %v152_v10 = vld [vmem:[%s4988_s1 + $0x18] sm:$0xff] }
  0xe2   :  { %v219_v60 = vpop.f32.mrf.mxu0 }
  0xe3   :  { %v295_v59 = vadd.f32 %v219_v60, %v149_v56 }
  0xe4   :  { %v221_v53 = vpop.f32.mrf.mxu0 }
  0xe5   :  { %v2499_v63 = vmul.f32 -1.442695, %v295_v59  ;;  %v296_v51 = vadd.f32 %v221_v53, %v150_v54  ;;  %v290_v58 = vpop.f32.mrf.mxu1 }
  0xe6   :  { %v297_v61 = vadd.f32 %v290_v58, %v151_v62 }
  0xe7   :  { %2592 = vpow2.f32 %v2499_v63  ;;  %v2500_v5 = vmul.f32 -1.442695, %v296_v51  ;;  %v292_v0 = vpop.f32.mrf.mxu1  ;;  %v327_v51 = vpop.permute.xlu0 %326 }
  0xe8   :  { %v298_v3 = vadd.f32 %v292_v0, %v152_v10  ;;  %vm328_vm4 = vcmp.eq.s32.totalorder %v327_v51, 1  ;;  %v5166_v51 = vld [vmem:[#allocation20_spill] sm:$0xff] }
  0xe9   :  { %2594 = vpow2.f32 %v2500_v5 }
  0xea   :  { %v2501_v49 = vmul.f32 -1.442695, %v298_v3  ;;  %2596 = vtanh.f32 %v297_v61  ;;  %v5158_v3 = vld [vmem:[#allocation15_spill] sm:$0xff] }
  0xec   :  { %2598 = vpow2.f32 %v2501_v49 }
  0xf4   :  { %v2593_v56 = vpop.eup %2592 }
  0xf5   :  { %v302_v60 = vadd.f32 1.0, %v2593_v56  ;;  %v5159_v56 = vld [vmem:[#allocation7_spill] sm:$0xff] }
  0xf6   :  { %v2595_v53 = vpop.eup %2594 }
  0xf7   :  { %2600 = vrcp.f32 %v302_v60  ;;  %v308_v54 = vadd.f32 1.0, %v2595_v53  ;;  %v2597_v5 = vpop.eup %2596  ;;  %v5160_v60 = vld [vmem:[#allocation17_spill] sm:$0xff]  ;;  %v5161_v53 = vld [vmem:[#allocation8_spill] sm:$0xff] }
  0xf9   :  { %2602 = vrcp.f32 %v308_v54  ;;  %v2599_v59 = vpop.eup %2598  ;;  %v5162_v54 = vld [vmem:[#allocation18_spill] sm:$0xff] }
  0xfa   :  { %v315_v57 = vadd.f32 1.0, %v2599_v59  ;;  %v5164_v59 = vld [vmem:[#allocation19_spill] sm:$0xff] }
  0xfc   :  { %2604 = vrcp.f32 %v315_v57  ;;  %v5157_v57 = vld [vmem:[#allocation6_spill] sm:$0xff] }
 0x104   :  { %v2601_v63 = vpop.eup %2600 }
 0x105   :  { %v319_v55 = vmul.f32 %v2601_v63, %v2597_v5  ;;  %v5163_v5 = vld [vmem:[#allocation10_spill] sm:$0xff]  ;;  %v5165_v63 = vld [vmem:[#allocation12_spill] sm:$0xff] }
 0x106   :  { %v2603_v47 = vpop.eup %2602 }
 0x107   :  { %v318_v45 = vmul.f32 0.0, %v2603_v47  ;;  %v5155_v47 = vld [vmem:[#allocation5_spill] sm:$0xff] }
 0x109   :  { %v320_v0 = vadd.f32 %v319_v55, %v318_v45  ;;  %v2605_v58 = vpop.eup %2604  ;;  %v5154_v45 = vld [vmem:[#allocation11_spill] sm:$0xff]  ;;  %v5156_v55 = vld [vmem:[#allocation13_spill] sm:$0xff] }
 0x10b   :  { %2606 = vtanh.f32 %v320_v0  ;;  %v3379_v10 = vsel %vm328_vm4, %v320_v0, 0.0  ;;  %v5167_v0 = vld [vmem:[#allocation14_spill] sm:$0xff] }
 0x118   :  { %v2607_v61 = vpop.eup %2606 }
 0x119   :  { %v322_v49 = vmul.f32 %v2607_v61, %v2605_v58  ;;  %v5168_v58 = vld [vmem:[#allocation21_spill] sm:$0xff]  ;;  %v5169_v61 = vld [vmem:[#allocation16_spill] sm:$0xff] }
 0x11b   :  { %v3381_v62 = vsel %vm328_vm4, %v322_v49, 0.0  ;;  %2506 = vmatmul.mubr.msk.f32.vlgmr.msra.gmra.mxu0 %vm328_vm4, %v322_v49  ;;  %2507 = vmatmul.mubr.msk.f32.vlgmr.msra.gmra.mxu1 %vm328_vm4, %v322_v49  ;;  %v5170_v49 = vmov 0.0  }
 0x11c   :  { %520 = vmatpush1.msra.mxu0 %v2904_v1  ;;  %591 = vmatpush1.msra.mxu1 %v2960_v12 }
 0x11d   :  { %521 = vmatprep.subr.mxu0 %v2909_v2  ;;  %592 = vmatprep.subr.mxu1 %v2972_v14 }
 0x11e   :  { %522 = vmatpush1.msra.mxu0 %v2917_v4  ;;  %593 = vmatpush1.msra.mxu1 %v2977_v15 }
 0x11f   :  { %523 = vmatprep.subr.mxu0 %v2924_v6  ;;  %594 = vmatprep.subr.mxu1 %v2989_v17 }
 0x120   :  { %524 = vmatpush1.msra.mxu0 %v2931_v7  ;;  %595 = vmatpush1.msra.mxu1 %v3001_v19 }
 0x121   :  { %525 = vmatprep.subr.mxu0 %v2937_v8  ;;  %596 = vmatprep.subr.mxu1 %v3006_v20 }
 0x122   :  { %526 = vmatpush1.msra.mxu0 %v2943_v9  ;;  %597 = vmatpush1.msra.mxu1 %v3018_v22 }
 0x123   :  { %527 = vmatprep.subr.mxu0 %v2954_v11  ;;  %598 = vmatprep.subr.mxu1 %v3030_v24 }
 0x124   :  { %528 = vmatpush1.msra.mxu0 %v2966_v13  ;;  %599 = vmatpush1.msra.mxu1 %v3042_v26 }
 0x125   :  { %529 = vmatprep.subr.mxu0 %v2983_v16  ;;  %600 = vmatprep.subr.mxu1 %v3054_v28 }
 0x126   :  { %530 = vmatpush1.msra.mxu0 %v2995_v18  ;;  %601 = vmatpush1.msra.mxu1 %v3066_v30 }
 0x127   :  { %531 = vmatprep.subr.mxu0 %v3012_v21  ;;  %602 = vmatprep.subr.mxu1 %v3078_v32 }
 0x128   :  { %532 = vmatpush1.msra.mxu0 %v3024_v23  ;;  %603 = vmatpush1.msra.mxu1 %v3090_v34 }
 0x129   :  { %533 = vmatprep.subr.mxu0 %v3036_v25  ;;  %604 = vmatprep.subr.mxu1 %v3102_v36 }
 0x12a   :  { %534 = vmatpush1.msra.mxu0 %v3048_v27  ;;  %605 = vmatpush1.msra.mxu1 %v3114_v38 }
 0x12b   :  { %535 = vmatprep.subr.mxu0 %v3060_v29  ;;  %606 = vmatprep.subr.mxu1 %v3126_v40 }
 0x12c   :  { %536 = vmatpush1.msra.mxu0 %v3072_v31  ;;  %607 = vmatpush1.msra.mxu1 %v3138_v42 }
 0x12d   :  { %537 = vmatprep.subr.mxu0 %v3084_v33  ;;  %608 = vmatprep.subr.mxu1 %v3150_v44 }
 0x12e   :  { %538 = vmatpush1.msra.mxu0 %v3096_v35  ;;  %609 = vmatpush1.msra.mxu1 %v3162_v46 }
 0x12f   :  { %539 = vmatprep.subr.mxu0 %v3108_v37  ;;  %610 = vmatprep.subr.mxu1 %v3174_v48 }
 0x130   :  { %540 = vmatpush1.msra.mxu0 %v3120_v39  ;;  %611 = vmatpush1.msra.mxu1 %v3186_v50 }
 0x131   :  { %541 = vmatprep.subr.mxu0 %v3132_v41  ;;  %612 = vmatprep.subr.mxu1 %v3198_v52 }
 0x132   :  { %542 = vmatpush1.msra.mxu0 %v3144_v43  ;;  %613 = vmatpush1.msra.mxu1 %v5154_v45  ;;  %v510_v45 = vpop.permute.xlu0 %509 }
 0x133   :  { %543 = vmatprep.subr.mxu0 %v5155_v47  ;;  %614 = vmatprep.subr.mxu1 %v5156_v55  ;;  %vm511_vm9 = vcmp.eq.s32.totalorder %v510_v45, 1  ;;  %v5179_v45 = vld [vmem:[#allocation13_spill] sm:$0xff] }
 0x134   :  { %544 = vmatpush1.msra.mxu0 %v5157_v57  ;;  %615 = vmatpush1.msra.mxu1 %v5158_v3  ;;  %v2504_v3 = vld [vmem:[%s4988_s1 + $0x30] sm:$0xff] }
 0x135   :  { %545 = vmatprep.subr.mxu0 %v5159_v56  ;;  %616 = vmatprep.subr.mxu1 %v5160_v60  ;;  %v5171_v60 = vld [vmem:[#allocation22_spill] sm:$0xff] }
 0x136   :  { %546 = vmatpush1.msra.mxu0 %v5161_v53  ;;  %617 = vmatpush1.msra.mxu1 %v5162_v54  ;;  %v5172_v54 = vld [vmem:[#allocation2_spill] sm:$0xff] }
 0x137   :  { %547 = vmatprep.subr.mxu0 %v5163_v5  ;;  %618 = vmatprep.subr.mxu1 %v5164_v59  ;;  %v5173_v5 = vld [vmem:[#allocation3_spill] sm:$0xff]  ;;  %v5174_v59 = vld [vmem:[#allocation9_spill] sm:$0xff] }
 0x138   :  { %548 = vmatpush1.msra.mxu0 %v5165_v63  ;;  %619 = vmatpush1.msra.mxu1 %v5166_v51  ;;  %vm689_vm5 = vcmp.gt.s32.totalorder %v5174_v59, 2  ;;  %vm872_vm6 = vcmp.gt.s32.totalorder %v5174_v59, 3  ;;  %v5175_v51 = vmov 0   ;;  %vm1238_vm7 = vcmp.gt.s32.totalorder %v5174_v59, 5 }
 0x139   :  { %549 = vmatprep.subr.mxu0 %v5167_v0  ;;  %620 = vmatprep.subr.mxu1 %v5168_v58  ;;  %v690_v0 = vsel %vm689_vm5, 1, %v5175_v51  ;;  %v873_v58 = vsel %vm872_vm6, 1, %v5175_v51  ;;  %vm1604_vm8 = vcmp.gt.s32.totalorder %v5174_v59, 7 }
 0x13a   :  { %550 = vmatpush1.msra.mxu0 %v5169_v61  ;;  %583 = vmatprep.mubr.f32.mxu0 %v5170_v49 }
 0x13b   :  { %621 = vmatpush1.msra.mxu1 %v5171_v60  ;;  %654 = vmatprep.mubr.f32.mxu1 %v5170_v49  ;;  %v1239_v60 = vsel %vm1238_vm7, 1, %v5175_v51 }
 0x13c   :  { %702 = vmatprep.subr.mxu0 %v5172_v54  ;;  %773 = vmatprep.subr.mxu1 %v5173_v5  ;;  %v1605_v54 = vsel %vm1604_vm8, 1, %v5175_v51  ;;  %v2502_v5 = vld [vmem:[%s4988_s1 + $0x20] sm:$0xff] }
 0x13d   :  { %692 = vperm.xlu1 %2591, %v690_v0   ;;  %v2503_v0 = vld [vmem:[%s4988_s1 + $0x28] sm:$0xff] }
 0x141   :  { %875 = vperm.xlu1 %2591, %v873_v58  }
 0x145   :  { %1241 = vperm.xlu1 %2591, %v1239_v60   ;;  %v2505_v60 = vld [vmem:[%s4988_s1 + $0x38] sm:$0xff] }
 0x149   :  { %1607 = vperm.xlu1 %2591, %v1605_v54  }
 0x1db   :  { %v402_v49 = vpop.f32.mrf.mxu0  ;;  %v473_v56 = vpop.f32.mrf.mxu1 }
 0x1dc   :  { %v478_v61 = vadd.f32 %v2502_v5, %v402_v49  ;;  %v480_v5 = vadd.f32 %v2504_v3, %v473_v56 }
 0x1dd   :  { %v404_v63 = vpop.f32.mrf.mxu0  ;;  %v475_v54 = vpop.f32.mrf.mxu1 }
 0x1de   :  { %v2508_v58 = vmul.f32 -1.442695, %v478_v61  ;;  %v479_v53 = vadd.f32 %v2503_v0, %v404_v63  ;;  %v481_v51 = vadd.f32 %v2505_v60, %v475_v54 }
 0x1e0   :  { %2608 = vpow2.f32 %v2508_v58  ;;  %v2509_v59 = vmul.f32 -1.442695, %v479_v53  ;;  %v2510_v57 = vmul.f32 -1.442695, %v481_v51 }
 0x1e2   :  { %2610 = vpow2.f32 %v2509_v59 }
 0x1e3   :  { %2612 = vpow2.f32 %v2510_v57 }
 0x1ed   :  { %v2609_v55 = vpop.eup %2608 }
 0x1ee   :  { %v485_v49 = vadd.f32 1.0, %v2609_v55 }
 0x1ef   :  { %v2611_v61 = vpop.eup %2610 }
 0x1f0   :  { %2614 = vrcp.f32 %v485_v49  ;;  %v491_v63 = vadd.f32 1.0, %v2611_v61  ;;  %v2613_v53 = vpop.eup %2612  ;;  %v5182_v49 = vld [vmem:[#allocation7_spill] sm:$0xff]  ;;  %v5183_v61 = vld [vmem:[#allocation17_spill] sm:$0xff] }
 0x1f1   :  { %2616 = vtanh.f32 %v480_v5  ;;  %v498_v47 = vadd.f32 1.0, %v2613_v53  ;;  %v5181_v5 = vld [vmem:[#allocation15_spill] sm:$0xff]  ;;  %v5185_v53 = vld [vmem:[#allocation18_spill] sm:$0xff] }
 0x1f2   :  { %2618 = vrcp.f32 %v491_v63  ;;  %v5184_v63 = vld [vmem:[#allocation8_spill] sm:$0xff] }
 0x1f3   :  { %2620 = vrcp.f32 %v498_v47  ;;  %v5180_v47 = vld [vmem:[#allocation6_spill] sm:$0xff] }
 0x1fd   :  { %v2615_v0 = vpop.eup %2614 }
 0x1fe   :  { %v2617_v58 = vpop.eup %2616 }
 0x1ff   :  { %v2619_v59 = vpop.eup %2618  ;;  %v502_v60 = vmul.f32 %v2617_v58, %v2615_v0  ;;  %v5186_v0 = vld [vmem:[#allocation10_spill] sm:$0xff]  ;;  %v5187_v58 = vld [vmem:[#allocation19_spill] sm:$0xff] }
 0x200   :  { %v501_v54 = vmul.f32 %v2619_v59, %v3379_v10  ;;  %v2621_v57 = vpop.eup %2620  ;;  %v5188_v59 = vld [vmem:[#allocation12_spill] sm:$0xff] }
 0x202   :  { %v503_v43 = vadd.f32 %v502_v60, %v501_v54  ;;  %v5189_v60 = vld [vmem:[#allocation20_spill] sm:$0xff]  ;;  %v5190_v54 = vld [vmem:[#allocation14_spill] sm:$0xff] }
 0x204   :  { %2622 = vtanh.f32 %v503_v43  ;;  %v3471_v55 = vsel %vm511_vm9, %v503_v43, %v3379_v10  ;;  %v5176_v43 = vld [vmem:[#allocation4_spill] sm:$0xff]  ;;  %v5177_v10 = vld [vmem:[#allocation11_spill] sm:$0xff] }
 0x211   :  { %v2623_v3 = vpop.eup %2622 }
 0x212   :  { %v505_v56 = vmul.f32 %v2623_v3, %v2621_v57  ;;  %v5191_v57 = vld [vmem:[#allocation21_spill] sm:$0xff]  ;;  %v5192_v3 = vld [vmem:[#allocation16_spill] sm:$0xff] }
 0x214   :  { %v3474_v51 = vsel %vm511_vm9, %v505_v56, %v3381_v62  ;;  %v5178_v62 = vld [vmem:[#allocation5_spill] sm:$0xff]  ;;  %v5193_v56 = vmov 0.0  }
 0x215   :  { %584 = vmatmul.mubr.f32.vlgmr.msra.gmra.mxu0 %v3474_v51  ;;  %655 = vmatmul.mubr.f32.vlgmr.msra.gmra.mxu1 %v3474_v51 }
 0x216   :  { %703 = vmatpush1.msra.mxu0 %v2904_v1  ;;  %774 = vmatpush1.msra.mxu1 %v2960_v12 }
 0x217   :  { %704 = vmatprep.subr.mxu0 %v2909_v2  ;;  %775 = vmatprep.subr.mxu1 %v2972_v14 }
 0x218   :  { %705 = vmatpush1.msra.mxu0 %v2917_v4  ;;  %776 = vmatpush1.msra.mxu1 %v2977_v15 }
 0x219   :  { %706 = vmatprep.subr.mxu0 %v2924_v6  ;;  %777 = vmatprep.subr.mxu1 %v2989_v17 }
 0x21a   :  { %707 = vmatpush1.msra.mxu0 %v2931_v7  ;;  %778 = vmatpush1.msra.mxu1 %v3001_v19 }
 0x21b   :  { %708 = vmatprep.subr.mxu0 %v2937_v8  ;;  %779 = vmatprep.subr.mxu1 %v3006_v20 }
 0x21c   :  { %709 = vmatpush1.msra.mxu0 %v2943_v9  ;;  %780 = vmatpush1.msra.mxu1 %v3018_v22 }
 0x21d   :  { %710 = vmatprep.subr.mxu0 %v2954_v11  ;;  %781 = vmatprep.subr.mxu1 %v3030_v24 }
 0x21e   :  { %711 = vmatpush1.msra.mxu0 %v2966_v13  ;;  %782 = vmatpush1.msra.mxu1 %v3042_v26 }
 0x21f   :  { %712 = vmatprep.subr.mxu0 %v2983_v16  ;;  %783 = vmatprep.subr.mxu1 %v3054_v28 }
 0x220   :  { %713 = vmatpush1.msra.mxu0 %v2995_v18  ;;  %784 = vmatpush1.msra.mxu1 %v3066_v30 }
 0x221   :  { %714 = vmatprep.subr.mxu0 %v3012_v21  ;;  %785 = vmatprep.subr.mxu1 %v3078_v32 }
 0x222   :  { %715 = vmatpush1.msra.mxu0 %v3024_v23  ;;  %786 = vmatpush1.msra.mxu1 %v3090_v34 }
 0x223   :  { %716 = vmatprep.subr.mxu0 %v3036_v25  ;;  %787 = vmatprep.subr.mxu1 %v3102_v36 }
 0x224   :  { %717 = vmatpush1.msra.mxu0 %v3048_v27  ;;  %788 = vmatpush1.msra.mxu1 %v3114_v38 }
 0x225   :  { %718 = vmatprep.subr.mxu0 %v3060_v29  ;;  %789 = vmatprep.subr.mxu1 %v3126_v40 }
 0x226   :  { %719 = vmatpush1.msra.mxu0 %v3072_v31  ;;  %790 = vmatpush1.msra.mxu1 %v3138_v42 }
 0x227   :  { %720 = vmatprep.subr.mxu0 %v3084_v33  ;;  %791 = vmatprep.subr.mxu1 %v3150_v44 }
 0x228   :  { %721 = vmatpush1.msra.mxu0 %v3096_v35  ;;  %792 = vmatpush1.msra.mxu1 %v3162_v46 }
 0x229   :  { %722 = vmatprep.subr.mxu0 %v3108_v37  ;;  %793 = vmatprep.subr.mxu1 %v3174_v48 }
 0x22a   :  { %723 = vmatpush1.msra.mxu0 %v3120_v39  ;;  %794 = vmatpush1.msra.mxu1 %v3186_v50 }
 0x22b   :  { %724 = vmatprep.subr.mxu0 %v3132_v41  ;;  %795 = vmatprep.subr.mxu1 %v3198_v52 }
 0x22c   :  { %725 = vmatpush1.msra.mxu0 %v5176_v43  ;;  %796 = vmatpush1.msra.mxu1 %v5177_v10 }
 0x22d   :  { %726 = vmatprep.subr.mxu0 %v5178_v62  ;;  %797 = vmatprep.subr.mxu1 %v5179_v45 }
 0x22e   :  { %727 = vmatpush1.msra.mxu0 %v5180_v47  ;;  %798 = vmatpush1.msra.mxu1 %v5181_v5  ;;  %v2513_v5 = vld [vmem:[%s4988_s1 + $0x50] sm:$0xff] }
 0x22f   :  { %728 = vmatprep.subr.mxu0 %v5182_v49  ;;  %799 = vmatprep.subr.mxu1 %v5183_v61  ;;  %v5194_v61 = vld [vmem:[#allocation22_spill] sm:$0xff] }
 0x230   :  { %729 = vmatpush1.msra.mxu0 %v5184_v63  ;;  %800 = vmatpush1.msra.mxu1 %v5185_v53  ;;  %v5195_v53 = vld [vmem:[#allocation2_spill] sm:$0xff] }
 0x231   :  { %730 = vmatprep.subr.mxu0 %v5186_v0  ;;  %801 = vmatprep.subr.mxu1 %v5187_v58  ;;  %v5196_v0 = vld [vmem:[#allocation3_spill] sm:$0xff] }
 0x232   :  { %731 = vmatpush1.msra.mxu0 %v5188_v59  ;;  %802 = vmatpush1.msra.mxu1 %v5189_v60  ;;  %v2511_v60 = vld [vmem:[%s4988_s1 + $0x40] sm:$0xff] }
 0x233   :  { %732 = vmatprep.subr.mxu0 %v5190_v54  ;;  %803 = vmatprep.subr.mxu1 %v5191_v57  ;;  %v2512_v57 = vld [vmem:[%s4988_s1 + $0x48] sm:$0xff] }
 0x234   :  { %733 = vmatpush1.msra.mxu0 %v5192_v3  ;;  %766 = vmatprep.mubr.f32.mxu0 %v5193_v56 }
 0x235   :  { %804 = vmatpush1.msra.mxu1 %v5194_v61  ;;  %837 = vmatprep.mubr.f32.mxu1 %v5193_v56 }
 0x236   :  { %885 = vmatprep.subr.mxu0 %v5195_v53  ;;  %956 = vmatprep.subr.mxu1 %v5196_v0  ;;  %v2514_v53 = vld [vmem:[%s4988_s1 + $0x58] sm:$0xff] }
 0x2d5   :  { %v585_v59 = vpop.f32.mrf.mxu0  ;;  %v656_v61 = vpop.f32.mrf.mxu1 }
 0x2d6   :  { %v661_v3 = vadd.f32 %v2511_v60, %v585_v59  ;;  %v663_v59 = vadd.f32 %v2513_v5, %v656_v61 }
 0x2d7   :  { %v587_v54 = vpop.f32.mrf.mxu0  ;;  %v658_v0 = vpop.f32.mrf.mxu1 }
 0x2d8   :  { %v2515_v58 = vmul.f32 -1.442695, %v661_v3  ;;  %v662_v63 = vadd.f32 %v2512_v57, %v587_v54  ;;  %v664_v49 = vadd.f32 %v2514_v53, %v658_v0 }
 0x2da   :  { %2624 = vpow2.f32 %v2515_v58  ;;  %v2516_v56 = vmul.f32 -1.442695, %v662_v63  ;;  %v2517_v47 = vmul.f32 -1.442695, %v664_v49 }
 0x2dc   :  { %2626 = vpow2.f32 %v2516_v56  ;;  %v693_v56 = vpop.permute.xlu1 %692 }
 0x2dd   :  { %2628 = vpow2.f32 %v2517_v47  ;;  %vm694_vm10 = vcmp.eq.s32.totalorder %v693_v56, 1  ;;  %v3677_v56 = vld [vmem:[%s4986_s3 + $0x1c8] sm:$0xff] }
 0x2e7   :  { %v2625_v45 = vpop.eup %2624 }
 0x2e8   :  { %v668_v60 = vadd.f32 1.0, %v2625_v45 }
 0x2e9   :  { %v2627_v3 = vpop.eup %2626 }
 0x2ea   :  { %2630 = vrcp.f32 %v668_v60  ;;  %v674_v58 = vadd.f32 1.0, %v2627_v3  ;;  %v2629_v63 = vpop.eup %2628 }
 0x2eb   :  { %2632 = vtanh.f32 %v663_v59  ;;  %v681_v53 = vadd.f32 1.0, %v2629_v63 }
 0x2ec   :  { %2634 = vrcp.f32 %v674_v58 }
 0x2ed   :  { %2636 = vrcp.f32 %v681_v53  ;;  %v3683_v53 = vld [vmem:[%s4986_s3 + $0x1d8] sm:$0xff] }
 0x2f7   :  { %v2631_v54 = vpop.eup %2630 }
 0x2f8   :  { %v2633_v57 = vpop.eup %2632 }
 0x2f9   :  { %v2635_v62 = vpop.eup %2634  ;;  %v685_v10 = vmul.f32 %v2633_v57, %v2631_v54  ;;  %v3665_v54 = vld [vmem:[%s4986_s3 + $0x1e0] sm:$0xff]  ;;  %v3671_v57 = vld [vmem:[%s4986_s3 + $0x1f0] sm:$0xff] }
 0x2fa   :  { %v684_v0 = vmul.f32 %v2635_v62, %v3471_v55  ;;  %v2637_v47 = vpop.eup %2636 }
 0x2fc   :  { %v686_v49 = vadd.f32 %v685_v10, %v684_v0  ;;  %v3689_v0 = vld [vmem:[%s4986_s3 + $0x1c0] sm:$0xff] }
 0x2fe   :  { %2638 = vtanh.f32 %v686_v49  ;;  %v3558_v45 = vsel %vm694_vm10, %v686_v49, %v3471_v55  ;;  %v3695_v49 = vld [vmem:[%s4986_s3 + $0x1d0] sm:$0xff] }
 0x30b   :  { %v2639_v5 = vpop.eup %2638 }
 0x30c   :  { %v688_v61 = vmul.f32 %v2639_v5, %v2637_v47  ;;  %v3707_v47 = vld [vmem:[%s4986_s3 + $0x1b8] sm:$0xff]  ;;  %v3713_v5 = vld [vmem:[%s4986_s3 + $0x1a0] sm:$0xff] }
 0x30e   :  { %v3561_v59 = vsel %vm694_vm10, %v688_v61, %v3474_v51  ;;  %v3719_v61 = vld [vmem:[%s4986_s3 + $0x1b0] sm:$0xff] }
 0x30f   :  { %767 = vmatmul.mubr.f32.vlgmr.msra.gmra.mxu0 %v3561_v59  ;;  %838 = vmatmul.mubr.f32.vlgmr.msra.gmra.mxu1 %v3561_v59 }
 0x310   :  { %886 = vmatpush1.msra.mxu0 %v2904_v1  ;;  %957 = vmatpush1.msra.mxu1 %v2960_v12  ;;  %v5197_v1 = vld [vmem:[#allocation11_spill] sm:$0xff]  ;;  %v5205_v12 = vld [vmem:[#allocation18_spill] sm:$0xff] }
 0x311   :  { %887 = vmatprep.subr.mxu0 %v2909_v2  ;;  %958 = vmatprep.subr.mxu1 %v2972_v14  ;;  %v5198_v2 = vld [vmem:[#allocation5_spill] sm:$0xff]  ;;  %v5207_v14 = vld [vmem:[#allocation19_spill] sm:$0xff] }
 0x312   :  { %888 = vmatpush1.msra.mxu0 %v2917_v4  ;;  %959 = vmatpush1.msra.mxu1 %v2977_v15  ;;  %v5199_v4 = vld [vmem:[#allocation13_spill] sm:$0xff]  ;;  %v5208_v15 = vld [vmem:[#allocation12_spill] sm:$0xff] }
 0x313   :  { %889 = vmatprep.subr.mxu0 %v2924_v6  ;;  %960 = vmatprep.subr.mxu1 %v2989_v17  ;;  %v5200_v6 = vld [vmem:[#allocation6_spill] sm:$0xff] }
 0x314   :  { %890 = vmatpush1.msra.mxu0 %v2931_v7  ;;  %961 = vmatpush1.msra.mxu1 %v3001_v19  ;;  %v5201_v7 = vld [vmem:[#allocation15_spill] sm:$0xff]  ;;  %v5210_v17 = vld [vmem:[#allocation14_spill] sm:$0xff]  ;;  %v5212_v19 = vld [vmem:[#allocation16_spill] sm:$0xff] }
 0x315   :  { %891 = vmatprep.subr.mxu0 %v2937_v8  ;;  %962 = vmatprep.subr.mxu1 %v3006_v20  ;;  %v5202_v8 = vld [vmem:[#allocation7_spill] sm:$0xff]  ;;  %v5213_v20 = vmov 0.0  }
 0x316   :  { %892 = vmatpush1.msra.mxu0 %v2943_v9  ;;  %963 = vmatpush1.msra.mxu1 %v3018_v22  ;;  %v5203_v9 = vld [vmem:[#allocation17_spill] sm:$0xff]  ;;  %v3632_v22 = vld [vmem:[%s4986_s3 + $0x1e8] sm:$0xff] }
 0x317   :  { %893 = vmatprep.subr.mxu0 %v2954_v11  ;;  %964 = vmatprep.subr.mxu1 %v3030_v24  ;;  %v5204_v11 = vld [vmem:[#allocation8_spill] sm:$0xff]  ;;  %5215 = vst [vmem:[#allocation9_spill] sm:$0xff] %v3632_v22  ;;  %v2518_v24 = vld [vmem:[%s4988_s1 + $0x60] sm:$0xff] }
 0x318   :  { %894 = vmatpush1.msra.mxu0 %v2966_v13  ;;  %965 = vmatpush1.msra.mxu1 %v3042_v26  ;;  %v5206_v13 = vld [vmem:[#allocation10_spill] sm:$0xff]  ;;  %v2519_v26 = vld [vmem:[%s4988_s1 + $0x68] sm:$0xff] }
 0x319   :  { %895 = vmatprep.subr.mxu0 %v2983_v16  ;;  %966 = vmatprep.subr.mxu1 %v3054_v28  ;;  %v5209_v16 = vld [vmem:[#allocation20_spill] sm:$0xff] }
 0x31a   :  { %896 = vmatpush1.msra.mxu0 %v2995_v18  ;;  %967 = vmatpush1.msra.mxu1 %v3066_v30  ;;  %v5211_v18 = vld [vmem:[#allocation21_spill] sm:$0xff] }
 0x31b   :  { %897 = vmatprep.subr.mxu0 %v3012_v21  ;;  %968 = vmatprep.subr.mxu1 %v3078_v32  ;;  %v5214_v21 = vld [vmem:[#allocation22_spill] sm:$0xff] }
 0x31c   :  { %898 = vmatpush1.msra.mxu0 %v3024_v23  ;;  %969 = vmatpush1.msra.mxu1 %v3090_v34  ;;  %v3638_v23 = vld [vmem:[%s4986_s3 + $0x1f8] sm:$0xff] }
 0x31d   :  { %899 = vmatprep.subr.mxu0 %v3036_v25  ;;  %970 = vmatprep.subr.mxu1 %v3102_v36  ;;  %5216 = vst [vmem:[#allocation4_spill] sm:$0xff] %v3638_v23  ;;  %v2520_v36 = vld [vmem:[%s4988_s1 + $0x70] sm:$0xff] }
 0x31e   :  { %900 = vmatpush1.msra.mxu0 %v3048_v27  ;;  %971 = vmatpush1.msra.mxu1 %v3114_v38 }
 0x31f   :  { %901 = vmatprep.subr.mxu0 %v3060_v29  ;;  %972 = vmatprep.subr.mxu1 %v3126_v40 }
 0x320   :  { %902 = vmatpush1.msra.mxu0 %v3072_v31  ;;  %973 = vmatpush1.msra.mxu1 %v3138_v42 }
 0x321   :  { %903 = vmatprep.subr.mxu0 %v3084_v33  ;;  %974 = vmatprep.subr.mxu1 %v3150_v44  ;;  %v2521_v33 = vld [vmem:[%s4988_s1 + $0x78] sm:$0xff] }
 0x322   :  { %904 = vmatpush1.msra.mxu0 %v3096_v35  ;;  %975 = vmatpush1.msra.mxu1 %v3162_v46 }
 0x323   :  { %905 = vmatprep.subr.mxu0 %v3108_v37  ;;  %976 = vmatprep.subr.mxu1 %v3174_v48 }
 0x324   :  { %906 = vmatpush1.msra.mxu0 %v3120_v39  ;;  %977 = vmatpush1.msra.mxu1 %v3186_v50 }
 0x325   :  { %907 = vmatprep.subr.mxu0 %v3132_v41  ;;  %978 = vmatprep.subr.mxu1 %v3198_v52 }
 0x326   :  { %908 = vmatpush1.msra.mxu0 %v5176_v43  ;;  %979 = vmatpush1.msra.mxu1 %v5197_v1  ;;  %v876_v43 = vpop.permute.xlu1 %875  ;;  %v3731_v1 = vld [vmem:[%s4986_s3 + $0x198] sm:$0xff] }
 0x327   :  { %909 = vmatprep.subr.mxu0 %v5198_v2  ;;  %980 = vmatprep.subr.mxu1 %v5199_v4  ;;  %vm877_vm11 = vcmp.eq.s32.totalorder %v876_v43, 1  ;;  %v3737_v2 = vld [vmem:[%s4986_s3 + $0x180] sm:$0xff]  ;;  %v3743_v4 = vld [vmem:[%s4986_s3 + $0x190] sm:$0xff]  ;;  %v3989_v43 = vld [vmem:[%s4986_s3 + $0x28] sm:$0xff] }
 0x328   :  { %910 = vmatpush1.msra.mxu0 %v5200_v6  ;;  %981 = vmatpush1.msra.mxu1 %v5201_v7  ;;  %v3749_v6 = vld [vmem:[%s4986_s3 + $0x168] sm:$0xff]  ;;  %v3755_v7 = vld [vmem:[%s4986_s3 + $0x178] sm:$0xff]  ;;  %5227 = vst [vmem:[#allocation18_spill] sm:$0xff] %v3989_v43 }
 0x329   :  { %911 = vmatprep.subr.mxu0 %v5202_v8  ;;  %982 = vmatprep.subr.mxu1 %v5203_v9  ;;  %v3761_v8 = vld [vmem:[%s4986_s3 + $0x160] sm:$0xff]  ;;  %v3767_v9 = vld [vmem:[%s4986_s3 + $0x170] sm:$0xff] }
 0x32a   :  { %912 = vmatpush1.msra.mxu0 %v5204_v11  ;;  %983 = vmatpush1.msra.mxu1 %v5205_v12  ;;  %v3773_v11 = vld [vmem:[%s4986_s3 + $0x148] sm:$0xff]  ;;  %v3779_v12 = vld [vmem:[%s4986_s3 + $0x158] sm:$0xff] }
 0x32b   :  { %913 = vmatprep.subr.mxu0 %v5206_v13  ;;  %984 = vmatprep.subr.mxu1 %v5207_v14  ;;  %v3785_v13 = vld [vmem:[%s4986_s3 + $0x140] sm:$0xff]  ;;  %v3791_v14 = vld [vmem:[%s4986_s3 + $0x150] sm:$0xff] }
 0x32c   :  { %914 = vmatpush1.msra.mxu0 %v5208_v15  ;;  %985 = vmatpush1.msra.mxu1 %v5209_v16  ;;  %v3797_v15 = vld [vmem:[%s4986_s3 + $0x128] sm:$0xff]  ;;  %v3803_v16 = vld [vmem:[%s4986_s3 + $0x138] sm:$0xff] }
 0x32d   :  { %915 = vmatprep.subr.mxu0 %v5210_v17  ;;  %986 = vmatprep.subr.mxu1 %v5211_v18  ;;  %v3809_v17 = vld [vmem:[%s4986_s3 + $0x120] sm:$0xff]  ;;  %v3815_v18 = vld [vmem:[%s4986_s3 + $0x130] sm:$0xff] }
 0x32e   :  { %916 = vmatpush1.msra.mxu0 %v5212_v19  ;;  %949 = vmatprep.mubr.f32.mxu0 %v5213_v20  ;;  %v3821_v19 = vld [vmem:[%s4986_s3 + $0x108] sm:$0xff] }
 0x32f   :  { %987 = vmatpush1.msra.mxu1 %v5214_v21  ;;  %1020 = vmatprep.mubr.f32.mxu1 %v5213_v20  ;;  %v3827_v21 = vld [vmem:[%s4986_s3 + $0x118] sm:$0xff] }
 0x330   :  { %1068 = vmatprep.subr.mxu0 %v3632_v22  ;;  %1139 = vmatprep.subr.mxu1 %v3638_v23 }
 0x3cf   :  { %v768_v25 = vpop.f32.mrf.mxu0  ;;  %v839_v31 = vpop.f32.mrf.mxu1 }
 0x3d0   :  { %v844_v27 = vadd.f32 %v2518_v24, %v768_v25  ;;  %v846_v39 = vadd.f32 %v2520_v36, %v839_v31  ;;  %v3833_v24 = vld [vmem:[%s4986_s3 + $0x100] sm:$0xff]  ;;  %v3839_v25 = vld [vmem:[%s4986_s3 + $0x110] sm:$0xff]  ;;  %v3875_v31 = vld [vmem:[%s4986_s3 + $0xd8] sm:$0xff] }
 0x3d1   :  { %v770_v28 = vpop.f32.mrf.mxu0  ;;  %v841_v34 = vpop.f32.mrf.mxu1  ;;  %v3905_v36 = vld [vmem:[%s4986_s3 + $0xa0] sm:$0xff] }
 0x3d2   :  { %v2522_v29 = vmul.f32 -1.442695, %v844_v27  ;;  %v845_v30 = vadd.f32 %v2519_v26, %v770_v28  ;;  %v847_v35 = vadd.f32 %v2521_v33, %v841_v34  ;;  %v3845_v26 = vld [vmem:[%s4986_s3 + $0xe8] sm:$0xff]  ;;  %v3851_v27 = vld [vmem:[%s4986_s3 + $0xf8] sm:$0xff]  ;;  %v3857_v28 = vld [vmem:[%s4986_s3 + $0xe0] sm:$0xff] }
 0x3d3   :  { %v3887_v33 = vld [vmem:[%s4986_s3 + $0xd0] sm:$0xff]  ;;  %v3893_v34 = vld [vmem:[%s4986_s3 + $0xa8] sm:$0xff] }
 0x3d4   :  { %2640 = vpow2.f32 %v2522_v29  ;;  %v2523_v32 = vmul.f32 -1.442695, %v845_v30  ;;  %v2524_v37 = vmul.f32 -1.442695, %v847_v35  ;;  %v3863_v29 = vld [vmem:[%s4986_s3 + $0xf0] sm:$0xff]  ;;  %v3869_v30 = vld [vmem:[%s4986_s3 + $0xc8] sm:$0xff] }
 0x3d5   :  { %v3899_v35 = vld [vmem:[%s4986_s3 + $0xb8] sm:$0xff] }
 0x3d6   :  { %2642 = vpow2.f32 %v2523_v32  ;;  %v3881_v32 = vld [vmem:[%s4986_s3 + $0xc0] sm:$0xff] }
 0x3d7   :  { %2644 = vpow2.f32 %v2524_v37  ;;  %v3911_v37 = vld [vmem:[%s4986_s3 + $0xb0] sm:$0xff] }
 0x3e1   :  { %v2641_v38 = vpop.eup %2640 }
 0x3e2   :  { %v851_v40 = vadd.f32 1.0, %v2641_v38  ;;  %v3917_v38 = vld [vmem:[%s4986_s3 + $0x88] sm:$0xff] }
 0x3e3   :  { %v2643_v41 = vpop.eup %2642 }
 0x3e4   :  { %2646 = vrcp.f32 %v851_v40  ;;  %v857_v42 = vadd.f32 1.0, %v2643_v41  ;;  %v2645_v44 = vpop.eup %2644  ;;  %v3929_v40 = vld [vmem:[%s4986_s3 + $0x80] sm:$0xff]  ;;  %v3935_v41 = vld [vmem:[%s4986_s3 + $0x90] sm:$0xff] }
 0x3e5   :  { %2648 = vtanh.f32 %v846_v39  ;;  %v864_v52 = vadd.f32 1.0, %v2645_v44  ;;  %v3923_v39 = vld [vmem:[%s4986_s3 + $0x98] sm:$0xff]  ;;  %5217 = vst [vmem:[#allocation2_spill] sm:$0xff] %v3929_v40  ;;  %5218 = vst [vmem:[#allocation3_spill] sm:$0xff] %v3935_v41 }
 0x3e6   :  { %2650 = vrcp.f32 %v857_v42  ;;  %v3941_v42 = vld [vmem:[%s4986_s3 + $0x68] sm:$0xff]  ;;  %v3947_v44 = vld [vmem:[%s4986_s3 + $0x78] sm:$0xff] }
 0x3e7   :  { %2652 = vrcp.f32 %v864_v52  ;;  %5219 = vst [vmem:[#allocation11_spill] sm:$0xff] %v3941_v42  ;;  %5220 = vst [vmem:[#allocation5_spill] sm:$0xff] %v3947_v44  ;;  %v3971_v52 = vld [vmem:[%s4986_s3 + $0x58] sm:$0xff] }
 0x3e8   :  { %5224 = vst [vmem:[#allocation7_spill] sm:$0xff] %v3971_v52 }
 0x3f1   :  { %v2647_v46 = vpop.eup %2646 }
 0x3f2   :  { %v2649_v48 = vpop.eup %2648 }
 0x3f3   :  { %v2651_v50 = vpop.eup %2650  ;;  %v868_v55 = vmul.f32 %v2649_v48, %v2647_v46  ;;  %v3953_v46 = vld [vmem:[%s4986_s3 + $0x60] sm:$0xff]  ;;  %v3959_v48 = vld [vmem:[%s4986_s3 + $0x70] sm:$0xff] }
 0x3f4   :  { %v867_v51 = vmul.f32 %v2651_v50, %v3558_v45  ;;  %v2653_v60 = vpop.eup %2652  ;;  %5221 = vst [vmem:[#allocation13_spill] sm:$0xff] %v3953_v46  ;;  %5222 = vst [vmem:[#allocation6_spill] sm:$0xff] %v3959_v48  ;;  %v3965_v50 = vld [vmem:[%s4986_s3 + $0x48] sm:$0xff] }
 0x3f5   :  { %5223 = vst [vmem:[#allocation15_spill] sm:$0xff] %v3965_v50 }
 0x3f6   :  { %v869_v10 = vadd.f32 %v868_v55, %v867_v51  ;;  %v3977_v55 = vld [vmem:[%s4986_s3 + $0x40] sm:$0xff]  ;;  %v3983_v51 = vld [vmem:[%s4986_s3 + $0x50] sm:$0xff] }
 0x3f7   :  { %5225 = vst [vmem:[#allocation17_spill] sm:$0xff] %v3977_v55  ;;  %5226 = vst [vmem:[#allocation8_spill] sm:$0xff] %v3983_v51 }
 0x3f8   :  { %2654 = vtanh.f32 %v869_v10  ;;  %v3655_v62 = vsel %vm877_vm11, %v869_v10, %v3558_v45  ;;  %v3701_v45 = vld [vmem:[%s4986_s3 + $0x1a8] sm:$0xff]  ;;  %v3995_v10 = vld [vmem:[%s4986_s3 + $0x38] sm:$0xff] }
 0x3f9   :  { %5228 = vst [vmem:[#allocation10_spill] sm:$0xff] %v3995_v10 }
 0x405   :  { %v2655_v3 = vpop.eup %2654 }
 0x406   :  { %v871_v58 = vmul.f32 %v2655_v3, %v2653_v60  ;;  %v4001_v60 = vld [vmem:[%s4986_s3 + $0x20] sm:$0xff]  ;;  %v4007_v3 = vld [vmem:[%s4986_s3 + $0x30] sm:$0xff] }
 0x407   :  { %5229 = vst [vmem:[#allocation19_spill] sm:$0xff] %v4001_v60  ;;  %5230 = vst [vmem:[#allocation12_spill] sm:$0xff] %v4007_v3 }
 0x408   :  { %v3658_v63 = vsel %vm877_vm11, %v871_v58, %v3561_v59  ;;  %v3725_v59 = vld [vmem:[%s4986_s3 + $0x188] sm:$0xff] }
 0x409   :  { %950 = vmatmul.mubr.f32.vlgmr.msra.gmra.mxu0 %v3658_v63  ;;  %1021 = vmatmul.mubr.f32.vlgmr.msra.gmra.mxu1 %v3658_v63  ;;  %v4013_v58 = vld [vmem:[%s4986_s3 + $0x8] sm:$0xff] }
 0x40a   :  { %1069 = vmatpush1.msra.mxu0 %v3665_v54  ;;  %1140 = vmatpush1.msra.mxu1 %v3671_v57  ;;  %5231 = vst [vmem:[#allocation20_spill] sm:$0xff] %v4013_v58 }
 0x40b   :  { %1070 = vmatprep.subr.mxu0 %v3677_v56  ;;  %1141 = vmatprep.subr.mxu1 %v3683_v53 }
 0x40c   :  { %1071 = vmatpush1.msra.mxu0 %v3689_v0  ;;  %1142 = vmatpush1.msra.mxu1 %v3695_v49 }
 0x40d   :  { %1072 = vmatprep.subr.mxu0 %v3701_v45  ;;  %1143 = vmatprep.subr.mxu1 %v3707_v47 }
 0x40e   :  { %1073 = vmatpush1.msra.mxu0 %v3713_v5  ;;  %1144 = vmatpush1.msra.mxu1 %v3719_v61 }
 0x40f   :  { %1074 = vmatprep.subr.mxu0 %v3725_v59  ;;  %1145 = vmatprep.subr.mxu1 %v3731_v1 }
 0x410   :  { %1075 = vmatpush1.msra.mxu0 %v3737_v2  ;;  %1146 = vmatpush1.msra.mxu1 %v3743_v4 }
 0x411   :  { %1076 = vmatprep.subr.mxu0 %v3749_v6  ;;  %1147 = vmatprep.subr.mxu1 %v3755_v7 }
 0x412   :  { %1077 = vmatpush1.msra.mxu0 %v3761_v8  ;;  %1148 = vmatpush1.msra.mxu1 %v3767_v9 }
 0x413   :  { %1078 = vmatprep.subr.mxu0 %v3773_v11  ;;  %1149 = vmatprep.subr.mxu1 %v3779_v12 }
 0x414   :  { %1079 = vmatpush1.msra.mxu0 %v3785_v13  ;;  %1150 = vmatpush1.msra.mxu1 %v3791_v14 }
 0x415   :  { %1080 = vmatprep.subr.mxu0 %v3797_v15  ;;  %1151 = vmatprep.subr.mxu1 %v3803_v16 }
 0x416   :  { %1081 = vmatpush1.msra.mxu0 %v3809_v17  ;;  %1152 = vmatpush1.msra.mxu1 %v3815_v18 }
 0x417   :  { %1082 = vmatprep.subr.mxu0 %v3821_v19  ;;  %1153 = vmatprep.subr.mxu1 %v3827_v21 }
 0x418   :  { %1083 = vmatpush1.msra.mxu0 %v3833_v24  ;;  %1154 = vmatpush1.msra.mxu1 %v3839_v25 }
 0x419   :  { %1084 = vmatprep.subr.mxu0 %v3845_v26  ;;  %1155 = vmatprep.subr.mxu1 %v3851_v27 }
 0x41a   :  { %1085 = vmatpush1.msra.mxu0 %v3857_v28  ;;  %1156 = vmatpush1.msra.mxu1 %v3863_v29 }
 0x41b   :  { %1086 = vmatprep.subr.mxu0 %v3869_v30  ;;  %1157 = vmatprep.subr.mxu1 %v3875_v31 }
 0x41c   :  { %1087 = vmatpush1.msra.mxu0 %v3881_v32  ;;  %1158 = vmatpush1.msra.mxu1 %v3887_v33 }
 0x41d   :  { %1088 = vmatprep.subr.mxu0 %v3893_v34  ;;  %1159 = vmatprep.subr.mxu1 %v3899_v35 }
 0x41e   :  { %1089 = vmatpush1.msra.mxu0 %v3905_v36  ;;  %1160 = vmatpush1.msra.mxu1 %v3911_v37 }
 0x41f   :  { %1090 = vmatprep.subr.mxu0 %v3917_v38  ;;  %1161 = vmatprep.subr.mxu1 %v3923_v39 }
 0x420   :  { %1091 = vmatpush1.msra.mxu0 %v3929_v40  ;;  %1162 = vmatpush1.msra.mxu1 %v3935_v41  ;;  %v1059_v41 = vpop.permute.xlu0 %1058 }
 0x421   :  { %1092 = vmatprep.subr.mxu0 %v3941_v42  ;;  %1163 = vmatprep.subr.mxu1 %v3947_v44  ;;  %vm1060_vm12 = vcmp.eq.s32.totalorder %v1059_v41, 1  ;;  %v5238_v41 = vld [vmem:[#allocation5_spill] sm:$0xff] }
 0x422   :  { %1093 = vmatpush1.msra.mxu0 %v3953_v46  ;;  %1164 = vmatpush1.msra.mxu1 %v3959_v48  ;;  %v2527_v48 = vld [vmem:[%s4988_s1 + $0x90] sm:$0xff] }
 0x423   :  { %1094 = vmatprep.subr.mxu0 %v3965_v50  ;;  %1165 = vmatprep.subr.mxu1 %v3971_v52 }
 0x424   :  { %1095 = vmatpush1.msra.mxu0 %v3977_v55  ;;  %1166 = vmatpush1.msra.mxu1 %v3983_v51 }
 0x425   :  { %1096 = vmatprep.subr.mxu0 %v3989_v43  ;;  %1167 = vmatprep.subr.mxu1 %v3995_v10  ;;  %v4019_v10 = vld [vmem:[%s4986_s3 + $0x18] sm:$0xff] }
 0x426   :  { %1097 = vmatpush1.msra.mxu0 %v4001_v60  ;;  %1168 = vmatpush1.msra.mxu1 %v4007_v3  ;;  %5232 = vst [vmem:[#allocation14_spill] sm:$0xff] %v4019_v10  ;;  %v4025_v60 = vld [vmem:[%s4986_s3] sm:$0xff]  ;;  %v2526_v3 = vld [vmem:[%s4988_s1 + $0x88] sm:$0xff] }
 0x427   :  { %1098 = vmatprep.subr.mxu0 %v4013_v58  ;;  %1169 = vmatprep.subr.mxu1 %v4019_v10  ;;  %5233 = vst [vmem:[#allocation21_spill] sm:$0xff] %v4025_v60  ;;  %v4032_v58 = vld [vmem:[%s4986_s3 + $0x10] sm:$0xff]  ;;  %v2525_v10 = vld [vmem:[%s4988_s1 + $0x80] sm:$0xff] }
 0x428   :  { %1099 = vmatpush1.msra.mxu0 %v4025_v60  ;;  %1132 = vmatprep.mubr.f32.mxu0 %v5213_v20  ;;  %5234 = vst [vmem:[#allocation16_spill] sm:$0xff] %v4032_v58 }
 0x429   :  { %1170 = vmatpush1.msra.mxu1 %v4032_v58  ;;  %1203 = vmatprep.mubr.f32.mxu1 %v5213_v20 }
 0x42a   :  { %1251 = vmatprep.subr.mxu0 %v3632_v22  ;;  %1322 = vmatprep.subr.mxu1 %v3638_v23  ;;  %v2528_v23 = vld [vmem:[%s4988_s1 + $0x98] sm:$0xff] }
 0x4c9   :  { %v951_v60 = vpop.f32.mrf.mxu0  ;;  %v1022_v58 = vpop.f32.mrf.mxu1 }
 0x4ca   :  { %v1027_v43 = vadd.f32 %v2525_v10, %v951_v60  ;;  %v1029_v10 = vadd.f32 %v2527_v48, %v1022_v58 }
 0x4cb   :  { %v953_v51 = vpop.f32.mrf.mxu0  ;;  %v1024_v22 = vpop.f32.mrf.mxu1 }
 0x4cc   :  { %v2529_v55 = vmul.f32 -1.442695, %v1027_v43  ;;  %v1028_v52 = vadd.f32 %v2526_v3, %v953_v51  ;;  %v1030_v50 = vadd.f32 %v2528_v23, %v1024_v22 }
 0x4ce   :  { %2656 = vpow2.f32 %v2529_v55  ;;  %v2530_v20 = vmul.f32 -1.442695, %v1028_v52  ;;  %v2531_v46 = vmul.f32 -1.442695, %v1030_v50 }
 0x4d0   :  { %2658 = vpow2.f32 %v2530_v20 }
 0x4d1   :  { %2660 = vpow2.f32 %v2531_v46 }
 0x4db   :  { %v2657_v44 = vpop.eup %2656 }
 0x4dc   :  { %v1034_v60 = vadd.f32 1.0, %v2657_v44 }
 0x4dd   :  { %v2659_v43 = vpop.eup %2658 }
 0x4de   :  { %2662 = vrcp.f32 %v1034_v60  ;;  %v1040_v55 = vadd.f32 1.0, %v2659_v43  ;;  %v2661_v20 = vpop.eup %2660  ;;  %v5241_v60 = vld [vmem:[#allocation15_spill] sm:$0xff] }
 0x4df   :  { %2664 = vtanh.f32 %v1029_v10  ;;  %v1047_v42 = vadd.f32 1.0, %v2661_v20  ;;  %v5240_v10 = vld [vmem:[#allocation6_spill] sm:$0xff]  ;;  %v5242_v43 = vld [vmem:[#allocation7_spill] sm:$0xff]  ;;  %v5244_v20 = vld [vmem:[#allocation8_spill] sm:$0xff] }
 0x4e0   :  { %2666 = vrcp.f32 %v1040_v55  ;;  %v5243_v55 = vld [vmem:[#allocation17_spill] sm:$0xff] }
 0x4e1   :  { %2668 = vrcp.f32 %v1047_v42  ;;  %v5239_v42 = vld [vmem:[#allocation13_spill] sm:$0xff] }
 0x4eb   :  { %v2663_v52 = vpop.eup %2662 }
 0x4ec   :  { %v2665_v51 = vpop.eup %2664 }
 0x4ed   :  { %v2667_v3 = vpop.eup %2666  ;;  %v1051_v22 = vmul.f32 %v2665_v51, %v2663_v52  ;;  %v5245_v52 = vld [vmem:[#allocation18_spill] sm:$0xff] }
 0x4ee   :  { %v1050_v23 = vmul.f32 %v2667_v3, %v3655_v62  ;;  %v2669_v46 = vpop.eup %2668  ;;  %v5246_v51 = vld [vmem:[#allocation10_spill] sm:$0xff]  ;;  %v5247_v3 = vld [vmem:[#allocation19_spill] sm:$0xff] }
 0x4f0   :  { %v1052_v40 = vadd.f32 %v1051_v22, %v1050_v23  ;;  %v5248_v22 = vld [vmem:[#allocation12_spill] sm:$0xff] }
 0x4f1   :  { %v5249_v23 = vld [vmem:[#allocation20_spill] sm:$0xff] }
 0x4f2   :  { %2670 = vtanh.f32 %v1052_v40  ;;  %v4052_v44 = vsel %vm1060_vm12, %v1052_v40, %v3655_v62  ;;  %v5235_v62 = vld [vmem:[#allocation2_spill] sm:$0xff]  ;;  %v5237_v40 = vld [vmem:[#allocation11_spill] sm:$0xff] }
 0x4ff   :  { %v2671_v48 = vpop.eup %2670 }
 0x500   :  { %v1054_v50 = vmul.f32 %v2671_v48, %v2669_v46  ;;  %v5250_v46 = vld [vmem:[#allocation14_spill] sm:$0xff]  ;;  %v5251_v48 = vld [vmem:[#allocation21_spill] sm:$0xff] }
 0x502   :  { %v4055_v58 = vsel %vm1060_vm12, %v1054_v50, %v3658_v63  ;;  %v5236_v63 = vld [vmem:[#allocation3_spill] sm:$0xff]  ;;  %v5252_v50 = vmov 0.0  }
 0x503   :  { %1133 = vmatmul.mubr.f32.vlgmr.msra.gmra.mxu0 %v4055_v58  ;;  %1204 = vmatmul.mubr.f32.vlgmr.msra.gmra.mxu1 %v4055_v58 }
 0x504   :  { %1252 = vmatpush1.msra.mxu0 %v3665_v54  ;;  %1323 = vmatpush1.msra.mxu1 %v3671_v57 }
 0x505   :  { %1253 = vmatprep.subr.mxu0 %v3677_v56  ;;  %1324 = vmatprep.subr.mxu1 %v3683_v53 }
 0x506   :  { %1254 = vmatpush1.msra.mxu0 %v3689_v0  ;;  %1325 = vmatpush1.msra.mxu1 %v3695_v49 }
 0x507   :  { %1255 = vmatprep.subr.mxu0 %v3701_v45  ;;  %1326 = vmatprep.subr.mxu1 %v3707_v47 }
 0x508   :  { %1256 = vmatpush1.msra.mxu0 %v3713_v5  ;;  %1327 = vmatpush1.msra.mxu1 %v3719_v61 }
 0x509   :  { %1257 = vmatprep.subr.mxu0 %v3725_v59  ;;  %1328 = vmatprep.subr.mxu1 %v3731_v1 }
 0x50a   :  { %1258 = vmatpush1.msra.mxu0 %v3737_v2  ;;  %1329 = vmatpush1.msra.mxu1 %v3743_v4 }
 0x50b   :  { %1259 = vmatprep.subr.mxu0 %v3749_v6  ;;  %1330 = vmatprep.subr.mxu1 %v3755_v7 }
 0x50c   :  { %1260 = vmatpush1.msra.mxu0 %v3761_v8  ;;  %1331 = vmatpush1.msra.mxu1 %v3767_v9 }
 0x50d   :  { %1261 = vmatprep.subr.mxu0 %v3773_v11  ;;  %1332 = vmatprep.subr.mxu1 %v3779_v12 }
 0x50e   :  { %1262 = vmatpush1.msra.mxu0 %v3785_v13  ;;  %1333 = vmatpush1.msra.mxu1 %v3791_v14 }
 0x50f   :  { %1263 = vmatprep.subr.mxu0 %v3797_v15  ;;  %1334 = vmatprep.subr.mxu1 %v3803_v16 }
 0x510   :  { %1264 = vmatpush1.msra.mxu0 %v3809_v17  ;;  %1335 = vmatpush1.msra.mxu1 %v3815_v18 }
 0x511   :  { %1265 = vmatprep.subr.mxu0 %v3821_v19  ;;  %1336 = vmatprep.subr.mxu1 %v3827_v21 }
 0x512   :  { %1266 = vmatpush1.msra.mxu0 %v3833_v24  ;;  %1337 = vmatpush1.msra.mxu1 %v3839_v25 }
 0x513   :  { %1267 = vmatprep.subr.mxu0 %v3845_v26  ;;  %1338 = vmatprep.subr.mxu1 %v3851_v27 }
 0x514   :  { %1268 = vmatpush1.msra.mxu0 %v3857_v28  ;;  %1339 = vmatpush1.msra.mxu1 %v3863_v29 }
 0x515   :  { %1269 = vmatprep.subr.mxu0 %v3869_v30  ;;  %1340 = vmatprep.subr.mxu1 %v3875_v31 }
 0x516   :  { %1270 = vmatpush1.msra.mxu0 %v3881_v32  ;;  %1341 = vmatpush1.msra.mxu1 %v3887_v33 }
 0x517   :  { %1271 = vmatprep.subr.mxu0 %v3893_v34  ;;  %1342 = vmatprep.subr.mxu1 %v3899_v35 }
 0x518   :  { %1272 = vmatpush1.msra.mxu0 %v3905_v36  ;;  %1343 = vmatpush1.msra.mxu1 %v3911_v37 }
 0x519   :  { %1273 = vmatprep.subr.mxu0 %v3917_v38  ;;  %1344 = vmatprep.subr.mxu1 %v3923_v39 }
 0x51a   :  { %1274 = vmatpush1.msra.mxu0 %v5235_v62  ;;  %1345 = vmatpush1.msra.mxu1 %v5236_v63  ;;  %v1242_v63 = vpop.permute.xlu1 %1241 }
 0x51b   :  { %1275 = vmatprep.subr.mxu0 %v5237_v40  ;;  %1346 = vmatprep.subr.mxu1 %v5238_v41  ;;  %vm1243_vm13 = vcmp.eq.s32.totalorder %v1242_v63, 1 }
 0x51c   :  { %1276 = vmatpush1.msra.mxu0 %v5239_v42  ;;  %1347 = vmatpush1.msra.mxu1 %v5240_v10  ;;  %v2534_v10 = vld [vmem:[%s4988_s1 + $0xb0] sm:$0xff] }
 0x51d   :  { %1277 = vmatprep.subr.mxu0 %v5241_v60  ;;  %1348 = vmatprep.subr.mxu1 %v5242_v43  ;;  %v5253_v43 = vld [vmem:[#allocation16_spill] sm:$0xff] }
 0x51e   :  { %1278 = vmatpush1.msra.mxu0 %v5243_v55  ;;  %1349 = vmatpush1.msra.mxu1 %v5244_v20  ;;  %v5254_v20 = vld [vmem:[#allocation9_spill] sm:$0xff] }
 0x51f   :  { %1279 = vmatprep.subr.mxu0 %v5245_v52  ;;  %1350 = vmatprep.subr.mxu1 %v5246_v51  ;;  %v5255_v52 = vld [vmem:[#allocation4_spill] sm:$0xff] }
 0x520   :  { %1280 = vmatpush1.msra.mxu0 %v5247_v3  ;;  %1351 = vmatpush1.msra.mxu1 %v5248_v22  ;;  %v2532_v22 = vld [vmem:[%s4988_s1 + $0xa0] sm:$0xff] }
 0x521   :  { %1281 = vmatprep.subr.mxu0 %v5249_v23  ;;  %1352 = vmatprep.subr.mxu1 %v5250_v46  ;;  %v2533_v46 = vld [vmem:[%s4988_s1 + $0xa8] sm:$0xff] }
 0x522   :  { %1282 = vmatpush1.msra.mxu0 %v5251_v48  ;;  %1315 = vmatprep.mubr.f32.mxu0 %v5252_v50 }
 0x523   :  { %1353 = vmatpush1.msra.mxu1 %v5253_v43  ;;  %1386 = vmatprep.mubr.f32.mxu1 %v5252_v50 }
 0x524   :  { %1434 = vmatprep.subr.mxu0 %v5254_v20  ;;  %1505 = vmatprep.subr.mxu1 %v5255_v52  ;;  %v2535_v20 = vld [vmem:[%s4988_s1 + $0xb8] sm:$0xff] }
 0x5c3   :  { %v1134_v3 = vpop.f32.mrf.mxu0  ;;  %v1205_v43 = vpop.f32.mrf.mxu1 }
 0x5c4   :  { %v1210_v48 = vadd.f32 %v2532_v22, %v1134_v3  ;;  %v1212_v3 = vadd.f32 %v2534_v10, %v1205_v43 }
 0x5c5   :  { %v1136_v23 = vpop.f32.mrf.mxu0  ;;  %v1207_v52 = vpop.f32.mrf.mxu1 }
 0x5c6   :  { %v2536_v51 = vmul.f32 -1.442695, %v1210_v48  ;;  %v1211_v55 = vadd.f32 %v2533_v46, %v1136_v23  ;;  %v1213_v60 = vadd.f32 %v2535_v20, %v1207_v52 }
 0x5c8   :  { %2672 = vpow2.f32 %v2536_v51  ;;  %v2537_v50 = vmul.f32 -1.442695, %v1211_v55  ;;  %v2538_v42 = vmul.f32 -1.442695, %v1213_v60 }
 0x5ca   :  { %2674 = vpow2.f32 %v2537_v50 }
 0x5cb   :  { %2676 = vpow2.f32 %v2538_v42 }
 0x5d5   :  { %v2673_v41 = vpop.eup %2672 }
 0x5d6   :  { %v1217_v22 = vadd.f32 1.0, %v2673_v41 }
 0x5d7   :  { %v2675_v48 = vpop.eup %2674 }
 0x5d8   :  { %2678 = vrcp.f32 %v1217_v22  ;;  %v1223_v51 = vadd.f32 1.0, %v2675_v48  ;;  %v2677_v55 = vpop.eup %2676 }
 0x5d9   :  { %2680 = vtanh.f32 %v1212_v3  ;;  %v1230_v40 = vadd.f32 1.0, %v2677_v55  ;;  %v4241_v55 = vld [vmem:[%s4989_s4 + $0x1f8] sm:$0xff] }
 0x5da   :  { %2682 = vrcp.f32 %v1223_v51  ;;  %v4236_v51 = vld [vmem:[%s4989_s4 + $0x1e8] sm:$0xff]  ;;  %5276 = vst [vmem:[#allocation9_spill] sm:$0xff] %v4241_v55 }
 0x5db   :  { %2684 = vrcp.f32 %v1230_v40  ;;  %5275 = vst [vmem:[#allocation22_spill] sm:$0xff] %v4236_v51 }
 0x5e5   :  { %v2679_v23 = vpop.eup %2678 }
 0x5e6   :  { %v2681_v46 = vpop.eup %2680 }
 0x5e7   :  { %v2683_v50 = vpop.eup %2682  ;;  %v1234_v20 = vmul.f32 %v2681_v46, %v2679_v23  ;;  %v4248_v23 = vld [vmem:[%s4989_s4 + $0x1e0] sm:$0xff]  ;;  %v4253_v46 = vld [vmem:[%s4989_s4 + $0x1f0] sm:$0xff] }
 0x5e8   :  { %v1233_v52 = vmul.f32 %v2683_v50, %v4052_v44  ;;  %v2685_v42 = vpop.eup %2684  ;;  %v4260_v50 = vld [vmem:[%s4989_s4 + $0x1c8] sm:$0xff] }
 0x5ea   :  { %v1235_v62 = vadd.f32 %v1234_v20, %v1233_v52  ;;  %v4265_v20 = vld [vmem:[%s4989_s4 + $0x1d8] sm:$0xff]  ;;  %v4272_v52 = vld [vmem:[%s4989_s4 + $0x1c0] sm:$0xff] }
 0x5ec   :  { %2686 = vtanh.f32 %v1235_v62  ;;  %v4139_v41 = vsel %vm1243_vm13, %v1235_v62, %v4052_v44 }
 0x5f9   :  { %v2687_v10 = vpop.eup %2686 }
 0x5fa   :  { %v1237_v60 = vmul.f32 %v2687_v10, %v2685_v42  ;;  %v4284_v42 = vld [vmem:[%s4989_s4 + $0x1a8] sm:$0xff]  ;;  %v4289_v10 = vld [vmem:[%s4989_s4 + $0x1b8] sm:$0xff] }
 0x5fc   :  { %v4142_v43 = vsel %vm1243_vm13, %v1237_v60, %v4055_v58  ;;  %v4296_v60 = vld [vmem:[%s4989_s4 + $0x1a0] sm:$0xff] }
 0x5fd   :  { %1316 = vmatmul.mubr.f32.vlgmr.msra.gmra.mxu0 %v4142_v43  ;;  %1387 = vmatmul.mubr.f32.vlgmr.msra.gmra.mxu1 %v4142_v43 }
 0x5fe   :  { %1435 = vmatpush1.msra.mxu0 %v3665_v54  ;;  %1506 = vmatpush1.msra.mxu1 %v3671_v57  ;;  %v5256_v54 = vld [vmem:[#allocation2_spill] sm:$0xff]  ;;  %v5257_v57 = vld [vmem:[#allocation3_spill] sm:$0xff] }
 0x5ff   :  { %1436 = vmatprep.subr.mxu0 %v3677_v56  ;;  %1507 = vmatprep.subr.mxu1 %v3683_v53  ;;  %v5258_v56 = vld [vmem:[#allocation11_spill] sm:$0xff]  ;;  %v5259_v53 = vld [vmem:[#allocation5_spill] sm:$0xff] }
 0x600   :  { %1437 = vmatpush1.msra.mxu0 %v3689_v0  ;;  %1508 = vmatpush1.msra.mxu1 %v3695_v49  ;;  %v5260_v0 = vld [vmem:[#allocation13_spill] sm:$0xff]  ;;  %v5261_v49 = vld [vmem:[#allocation6_spill] sm:$0xff] }
 0x601   :  { %1438 = vmatprep.subr.mxu0 %v3701_v45  ;;  %1509 = vmatprep.subr.mxu1 %v3707_v47  ;;  %v5262_v45 = vld [vmem:[#allocation15_spill] sm:$0xff] }
 0x602   :  { %1439 = vmatpush1.msra.mxu0 %v3713_v5  ;;  %1510 = vmatpush1.msra.mxu1 %v3719_v61  ;;  %v5263_v47 = vld [vmem:[#allocation7_spill] sm:$0xff]  ;;  %v5264_v5 = vld [vmem:[#allocation17_spill] sm:$0xff]  ;;  %v5265_v61 = vld [vmem:[#allocation8_spill] sm:$0xff] }
 0x603   :  { %1440 = vmatprep.subr.mxu0 %v3725_v59  ;;  %1511 = vmatprep.subr.mxu1 %v3731_v1  ;;  %v5266_v59 = vld [vmem:[#allocation18_spill] sm:$0xff] }
 0x604   :  { %1441 = vmatpush1.msra.mxu0 %v3737_v2  ;;  %1512 = vmatpush1.msra.mxu1 %v3743_v4  ;;  %v5267_v1 = vld [vmem:[#allocation10_spill] sm:$0xff]  ;;  %v5268_v2 = vld [vmem:[#allocation19_spill] sm:$0xff]  ;;  %v5269_v4 = vld [vmem:[#allocation12_spill] sm:$0xff] }
 0x605   :  { %1442 = vmatprep.subr.mxu0 %v3749_v6  ;;  %1513 = vmatprep.subr.mxu1 %v3755_v7  ;;  %v5270_v6 = vld [vmem:[#allocation20_spill] sm:$0xff]  ;;  %v5271_v7 = vld [vmem:[#allocation14_spill] sm:$0xff] }
 0x606   :  { %1443 = vmatpush1.msra.mxu0 %v3761_v8  ;;  %1514 = vmatpush1.msra.mxu1 %v3767_v9  ;;  %v5272_v8 = vld [vmem:[#allocation21_spill] sm:$0xff]  ;;  %v5273_v9 = vmov 0.0  }
 0x607   :  { %1444 = vmatprep.subr.mxu0 %v3773_v11  ;;  %1515 = vmatprep.subr.mxu1 %v3779_v12  ;;  %v5274_v11 = vld [vmem:[#allocation16_spill] sm:$0xff]  ;;  %v2539_v12 = vld [vmem:[%s4988_s1 + $0xc0] sm:$0xff] }
 0x608   :  { %1445 = vmatpush1.msra.mxu0 %v3785_v13  ;;  %1516 = vmatpush1.msra.mxu1 %v3791_v14  ;;  %v2540_v14 = vld [vmem:[%s4988_s1 + $0xc8] sm:$0xff] }
 0x609   :  { %1446 = vmatprep.subr.mxu0 %v3797_v15  ;;  %1517 = vmatprep.subr.mxu1 %v3803_v16 }
 0x60a   :  { %1447 = vmatpush1.msra.mxu0 %v3809_v17  ;;  %1518 = vmatpush1.msra.mxu1 %v3815_v18 }
 0x60b   :  { %1448 = vmatprep.subr.mxu0 %v3821_v19  ;;  %1519 = vmatprep.subr.mxu1 %v3827_v21 }
 0x60c   :  { %1449 = vmatpush1.msra.mxu0 %v3833_v24  ;;  %1520 = vmatpush1.msra.mxu1 %v3839_v25  ;;  %v2542_v24 = vld [vmem:[%s4988_s1 + $0xd8] sm:$0xff] }
 0x60d   :  { %1450 = vmatprep.subr.mxu0 %v3845_v26  ;;  %1521 = vmatprep.subr.mxu1 %v3851_v27  ;;  %v2541_v27 = vld [vmem:[%s4988_s1 + $0xd0] sm:$0xff] }
 0x60e   :  { %1451 = vmatpush1.msra.mxu0 %v3857_v28  ;;  %1522 = vmatpush1.msra.mxu1 %v3863_v29 }
 0x60f   :  { %1452 = vmatprep.subr.mxu0 %v3869_v30  ;;  %1523 = vmatprep.subr.mxu1 %v3875_v31 }
 0x610   :  { %1453 = vmatpush1.msra.mxu0 %v3881_v32  ;;  %1524 = vmatpush1.msra.mxu1 %v3887_v33 }
 0x611   :  { %1454 = vmatprep.subr.mxu0 %v3893_v34  ;;  %1525 = vmatprep.subr.mxu1 %v3899_v35 }
 0x612   :  { %1455 = vmatpush1.msra.mxu0 %v3905_v36  ;;  %1526 = vmatpush1.msra.mxu1 %v3911_v37 }
 0x613   :  { %1456 = vmatprep.subr.mxu0 %v3917_v38  ;;  %1527 = vmatprep.subr.mxu1 %v3923_v39  ;;  %v1425_v39 = vpop.permute.xlu0 %1424 }
 0x614   :  { %1457 = vmatpush1.msra.mxu0 %v5256_v54  ;;  %1528 = vmatpush1.msra.mxu1 %v5257_v57  ;;  %vm1426_vm14 = vcmp.eq.s32.totalorder %v1425_v39, 1  ;;  %v4308_v54 = vld [vmem:[%s4989_s4 + $0x188] sm:$0xff]  ;;  %v4313_v57 = vld [vmem:[%s4989_s4 + $0x198] sm:$0xff]  ;;  %v4556_v39 = vld [vmem:[%s4989_s4 + $0x40] sm:$0xff] }
 0x615   :  { %1458 = vmatprep.subr.mxu0 %v5258_v56  ;;  %1529 = vmatprep.subr.mxu1 %v5259_v53  ;;  %v4320_v56 = vld [vmem:[%s4989_s4 + $0x180] sm:$0xff]  ;;  %v4325_v53 = vld [vmem:[%s4989_s4 + $0x190] sm:$0xff]  ;;  %5285 = vst [vmem:[#allocation7_spill] sm:$0xff] %v4556_v39 }
 0x616   :  { %1459 = vmatpush1.msra.mxu0 %v5260_v0  ;;  %1530 = vmatpush1.msra.mxu1 %v5261_v49  ;;  %v4332_v0 = vld [vmem:[%s4989_s4 + $0x168] sm:$0xff]  ;;  %v4337_v49 = vld [vmem:[%s4989_s4 + $0x178] sm:$0xff] }
 0x617   :  { %1460 = vmatprep.subr.mxu0 %v5262_v45  ;;  %1531 = vmatprep.subr.mxu1 %v5263_v47  ;;  %v4344_v45 = vld [vmem:[%s4989_s4 + $0x160] sm:$0xff]  ;;  %v4349_v47 = vld [vmem:[%s4989_s4 + $0x170] sm:$0xff] }
 0x618   :  { %1461 = vmatpush1.msra.mxu0 %v5264_v5  ;;  %1532 = vmatpush1.msra.mxu1 %v5265_v61  ;;  %v4356_v5 = vld [vmem:[%s4989_s4 + $0x148] sm:$0xff]  ;;  %v4361_v61 = vld [vmem:[%s4989_s4 + $0x158] sm:$0xff] }
 0x619   :  { %1462 = vmatprep.subr.mxu0 %v5266_v59  ;;  %1533 = vmatprep.subr.mxu1 %v5267_v1  ;;  %v4368_v59 = vld [vmem:[%s4989_s4 + $0x140] sm:$0xff]  ;;  %v4373_v1 = vld [vmem:[%s4989_s4 + $0x150] sm:$0xff] }
 0x61a   :  { %1463 = vmatpush1.msra.mxu0 %v5268_v2  ;;  %1534 = vmatpush1.msra.mxu1 %v5269_v4  ;;  %v4380_v2 = vld [vmem:[%s4989_s4 + $0x128] sm:$0xff]  ;;  %v4385_v4 = vld [vmem:[%s4989_s4 + $0x138] sm:$0xff] }
 0x61b   :  { %1464 = vmatprep.subr.mxu0 %v5270_v6  ;;  %1535 = vmatprep.subr.mxu1 %v5271_v7  ;;  %v4392_v6 = vld [vmem:[%s4989_s4 + $0x120] sm:$0xff]  ;;  %v4397_v7 = vld [vmem:[%s4989_s4 + $0x130] sm:$0xff] }
 0x61c   :  { %1465 = vmatpush1.msra.mxu0 %v5272_v8  ;;  %1498 = vmatprep.mubr.f32.mxu0 %v5273_v9  ;;  %v4402_v8 = vld [vmem:[%s4989_s4 + $0x108] sm:$0xff] }
 0x61d   :  { %1536 = vmatpush1.msra.mxu1 %v5274_v11  ;;  %1569 = vmatprep.mubr.f32.mxu1 %v5273_v9  ;;  %v4409_v11 = vld [vmem:[%s4989_s4 + $0x118] sm:$0xff] }
 0x61e   :  { %1616 = vmatprep.subr.mxu0 %v4236_v51  ;;  %1687 = vmatprep.subr.mxu1 %v4241_v55 }
 0x6bd   :  { %v1317_v13 = vpop.f32.mrf.mxu0  ;;  %v1388_v19 = vpop.f32.mrf.mxu1 }
 0x6be   :  { %v1393_v15 = vadd.f32 %v2539_v12, %v1317_v13  ;;  %v1395_v30 = vadd.f32 %v2541_v27, %v1388_v19  ;;  %v4414_v12 = vld [vmem:[%s4989_s4 + $0x100] sm:$0xff]  ;;  %v4419_v13 = vld [vmem:[%s4989_s4 + $0x110] sm:$0xff]  ;;  %v4453_v19 = vld [vmem:[%s4989_s4 + $0xd8] sm:$0xff] }
 0x6bf   :  { %v1319_v16 = vpop.f32.mrf.mxu0  ;;  %v1390_v25 = vpop.f32.mrf.mxu1  ;;  %v4484_v27 = vld [vmem:[%s4989_s4 + $0xa0] sm:$0xff] }
 0x6c0   :  { %v2543_v17 = vmul.f32 -1.442695, %v1393_v15  ;;  %v1394_v18 = vadd.f32 %v2540_v14, %v1319_v16  ;;  %v1396_v26 = vadd.f32 %v2542_v24, %v1390_v25  ;;  %v4426_v14 = vld [vmem:[%s4989_s4 + $0xe8] sm:$0xff]  ;;  %v4431_v15 = vld [vmem:[%s4989_s4 + $0xf8] sm:$0xff]  ;;  %v4436_v16 = vld [vmem:[%s4989_s4 + $0xe0] sm:$0xff] }
 0x6c1   :  { %v4465_v24 = vld [vmem:[%s4989_s4 + $0xd0] sm:$0xff]  ;;  %v4472_v25 = vld [vmem:[%s4989_s4 + $0xa8] sm:$0xff] }
 0x6c2   :  { %2688 = vpow2.f32 %v2543_v17  ;;  %v2544_v21 = vmul.f32 -1.442695, %v1394_v18  ;;  %v2545_v28 = vmul.f32 -1.442695, %v1396_v26  ;;  %v4443_v17 = vld [vmem:[%s4989_s4 + $0xf0] sm:$0xff]  ;;  %v4448_v18 = vld [vmem:[%s4989_s4 + $0xc8] sm:$0xff] }
 0x6c3   :  { %v4477_v26 = vld [vmem:[%s4989_s4 + $0xb8] sm:$0xff] }
 0x6c4   :  { %2690 = vpow2.f32 %v2544_v21  ;;  %v4460_v21 = vld [vmem:[%s4989_s4 + $0xc0] sm:$0xff] }
 0x6c5   :  { %2692 = vpow2.f32 %v2545_v28  ;;  %v4489_v28 = vld [vmem:[%s4989_s4 + $0xb0] sm:$0xff] }
 0x6cf   :  { %v2689_v29 = vpop.eup %2688 }
 0x6d0   :  { %v1400_v31 = vadd.f32 1.0, %v2689_v29  ;;  %v4496_v29 = vld [vmem:[%s4989_s4 + $0x88] sm:$0xff] }
 0x6d1   :  { %v2691_v32 = vpop.eup %2690 }
 0x6d2   :  { %2694 = vrcp.f32 %v1400_v31  ;;  %v1406_v33 = vadd.f32 1.0, %v2691_v32  ;;  %v2693_v34 = vpop.eup %2692  ;;  %v4508_v31 = vld [vmem:[%s4989_s4 + $0x80] sm:$0xff]  ;;  %v4513_v32 = vld [vmem:[%s4989_s4 + $0x90] sm:$0xff] }
 0x6d3   :  { %2696 = vtanh.f32 %v1395_v30  ;;  %v1413_v38 = vadd.f32 1.0, %v2693_v34  ;;  %v4501_v30 = vld [vmem:[%s4989_s4 + $0x98] sm:$0xff]  ;;  %5277 = vst [vmem:[#allocation4_spill] sm:$0xff] %v4508_v31  ;;  %5278 = vst [vmem:[#allocation2_spill] sm:$0xff] %v4513_v32 }
 0x6d4   :  { %2698 = vrcp.f32 %v1406_v33  ;;  %v4520_v33 = vld [vmem:[%s4989_s4 + $0x68] sm:$0xff]  ;;  %v4525_v34 = vld [vmem:[%s4989_s4 + $0x78] sm:$0xff] }
 0x6d5   :  { %2700 = vrcp.f32 %v1413_v38  ;;  %5279 = vst [vmem:[#allocation3_spill] sm:$0xff] %v4520_v33  ;;  %5280 = vst [vmem:[#allocation11_spill] sm:$0xff] %v4525_v34  ;;  %v4549_v38 = vld [vmem:[%s4989_s4 + $0x58] sm:$0xff] }
 0x6d6   :  { %5284 = vst [vmem:[#allocation15_spill] sm:$0xff] %v4549_v38 }
 0x6df   :  { %v2695_v35 = vpop.eup %2694 }
 0x6e0   :  { %v2697_v36 = vpop.eup %2696 }
 0x6e1   :  { %v2699_v37 = vpop.eup %2698  ;;  %v1417_v44 = vmul.f32 %v2697_v36, %v2695_v35  ;;  %v4532_v35 = vld [vmem:[%s4989_s4 + $0x60] sm:$0xff]  ;;  %v4537_v36 = vld [vmem:[%s4989_s4 + $0x70] sm:$0xff] }
 0x6e2   :  { %v1416_v58 = vmul.f32 %v2699_v37, %v4139_v41  ;;  %v2701_v40 = vpop.eup %2700  ;;  %5281 = vst [vmem:[#allocation5_spill] sm:$0xff] %v4532_v35  ;;  %5282 = vst [vmem:[#allocation13_spill] sm:$0xff] %v4537_v36  ;;  %v4544_v37 = vld [vmem:[%s4989_s4 + $0x48] sm:$0xff] }
 0x6e3   :  { %5283 = vst [vmem:[#allocation6_spill] sm:$0xff] %v4544_v37 }
 0x6e4   :  { %v1418_v62 = vadd.f32 %v1417_v44, %v1416_v58  ;;  %v4561_v44 = vld [vmem:[%s4989_s4 + $0x50] sm:$0xff]  ;;  %v4568_v58 = vld [vmem:[%s4989_s4 + $0x28] sm:$0xff] }
 0x6e5   :  { %5286 = vst [vmem:[#allocation17_spill] sm:$0xff] %v4561_v44  ;;  %5287 = vst [vmem:[#allocation8_spill] sm:$0xff] %v4568_v58 }
 0x6e6   :  { %2702 = vtanh.f32 %v1418_v62  ;;  %v4224_v63 = vsel %vm1426_vm14, %v1418_v62, %v4139_v41  ;;  %v4277_v41 = vld [vmem:[%s4989_s4 + $0x1d0] sm:$0xff]  ;;  %v4573_v62 = vld [vmem:[%s4989_s4 + $0x38] sm:$0xff] }
 0x6e7   :  { %5288 = vst [vmem:[#allocation18_spill] sm:$0xff] %v4573_v62 }
 0x6f3   :  { %v2703_v3 = vpop.eup %2702 }
 0x6f4   :  { %v1420_v22 = vmul.f32 %v2703_v3, %v2701_v40  ;;  %v4580_v40 = vld [vmem:[%s4989_s4 + $0x20] sm:$0xff]  ;;  %v4585_v3 = vld [vmem:[%s4989_s4 + $0x30] sm:$0xff] }
 0x6f5   :  { %5289 = vst [vmem:[#allocation10_spill] sm:$0xff] %v4580_v40  ;;  %5290 = vst [vmem:[#allocation19_spill] sm:$0xff] %v4585_v3 }
 0x6f6   :  { %v4227_v48 = vsel %vm1426_vm14, %v1420_v22, %v4142_v43  ;;  %v4301_v43 = vld [vmem:[%s4989_s4 + $0x1b0] sm:$0xff]  ;;  %v4592_v22 = vld [vmem:[%s4989_s4 + $0x8] sm:$0xff] }
 0x6f7   :  { %1499 = vmatmul.mubr.f32.vlgmr.msra.gmra.mxu0 %v4227_v48  ;;  %1570 = vmatmul.mubr.f32.vlgmr.msra.gmra.mxu1 %v4227_v48  ;;  %5291 = vst [vmem:[#allocation12_spill] sm:$0xff] %v4592_v22 }
 0x6f8   :  { %1680 = vmatprep.mubr.f32.mxu0 %v5273_v9  ;;  %1751 = vmatprep.mubr.f32.mxu1 %v5273_v9  ;;  %v4597_v9 = vld [vmem:[%s4989_s4 + $0x18] sm:$0xff] }
 0x6f9   :  { %1617 = vmatpush1.msra.mxu0 %v4248_v23  ;;  %1688 = vmatpush1.msra.mxu1 %v4253_v46  ;;  %5292 = vst [vmem:[#allocation20_spill] sm:$0xff] %v4597_v9 }
 0x6fa   :  { %1618 = vmatprep.subr.mxu0 %v4260_v50  ;;  %1689 = vmatprep.subr.mxu1 %v4265_v20 }
 0x6fb   :  { %1619 = vmatpush1.msra.mxu0 %v4272_v52  ;;  %1690 = vmatpush1.msra.mxu1 %v4277_v41 }
 0x6fc   :  { %1620 = vmatprep.subr.mxu0 %v4284_v42  ;;  %1691 = vmatprep.subr.mxu1 %v4289_v10 }
 0x6fd   :  { %1621 = vmatpush1.msra.mxu0 %v4296_v60  ;;  %1692 = vmatpush1.msra.mxu1 %v4301_v43 }
 0x6fe   :  { %1622 = vmatprep.subr.mxu0 %v4308_v54  ;;  %1693 = vmatprep.subr.mxu1 %v4313_v57 }
 0x6ff   :  { %1623 = vmatpush1.msra.mxu0 %v4320_v56  ;;  %1694 = vmatpush1.msra.mxu1 %v4325_v53 }
 0x700   :  { %1624 = vmatprep.subr.mxu0 %v4332_v0  ;;  %1695 = vmatprep.subr.mxu1 %v4337_v49 }
 0x701   :  { %1625 = vmatpush1.msra.mxu0 %v4344_v45  ;;  %1696 = vmatpush1.msra.mxu1 %v4349_v47 }
 0x702   :  { %1626 = vmatprep.subr.mxu0 %v4356_v5  ;;  %1697 = vmatprep.subr.mxu1 %v4361_v61 }
 0x703   :  { %1627 = vmatpush1.msra.mxu0 %v4368_v59  ;;  %1698 = vmatpush1.msra.mxu1 %v4373_v1 }
 0x704   :  { %1628 = vmatprep.subr.mxu0 %v4380_v2  ;;  %1699 = vmatprep.subr.mxu1 %v4385_v4 }
 0x705   :  { %1629 = vmatpush1.msra.mxu0 %v4392_v6  ;;  %1700 = vmatpush1.msra.mxu1 %v4397_v7 }
 0x706   :  { %1630 = vmatprep.subr.mxu0 %v4402_v8  ;;  %1701 = vmatprep.subr.mxu1 %v4409_v11 }
 0x707   :  { %1631 = vmatpush1.msra.mxu0 %v4414_v12  ;;  %1702 = vmatpush1.msra.mxu1 %v4419_v13 }
 0x708   :  { %1632 = vmatprep.subr.mxu0 %v4426_v14  ;;  %1703 = vmatprep.subr.mxu1 %v4431_v15 }
 0x709   :  { %1633 = vmatpush1.msra.mxu0 %v4436_v16  ;;  %1704 = vmatpush1.msra.mxu1 %v4443_v17 }
 0x70a   :  { %1634 = vmatprep.subr.mxu0 %v4448_v18  ;;  %1705 = vmatprep.subr.mxu1 %v4453_v19 }
 0x70b   :  { %1635 = vmatpush1.msra.mxu0 %v4460_v21  ;;  %1706 = vmatpush1.msra.mxu1 %v4465_v24 }
 0x70c   :  { %1636 = vmatprep.subr.mxu0 %v4472_v25  ;;  %1707 = vmatprep.subr.mxu1 %v4477_v26 }
 0x70d   :  { %1637 = vmatpush1.msra.mxu0 %v4484_v27  ;;  %1708 = vmatpush1.msra.mxu1 %v4489_v28 }
 0x70e   :  { %1638 = vmatprep.subr.mxu0 %v4496_v29  ;;  %1709 = vmatprep.subr.mxu1 %v4501_v30 }
 0x70f   :  { %1639 = vmatpush1.msra.mxu0 %v4508_v31  ;;  %1710 = vmatpush1.msra.mxu1 %v4513_v32 }
 0x710   :  { %1640 = vmatprep.subr.mxu0 %v4520_v33  ;;  %1711 = vmatprep.subr.mxu1 %v4525_v34 }
 0x711   :  { %1641 = vmatpush1.msra.mxu0 %v4532_v35  ;;  %1712 = vmatpush1.msra.mxu1 %v4537_v36  ;;  %v2548_v36 = vld [vmem:[%s4988_s1 + $0xf0] sm:$0xff] }
 0x712   :  { %1642 = vmatprep.subr.mxu0 %v4544_v37  ;;  %1713 = vmatprep.subr.mxu1 %v4549_v38 }
 0x713   :  { %1643 = vmatpush1.msra.mxu0 %v4556_v39  ;;  %1714 = vmatpush1.msra.mxu1 %v4561_v44  ;;  %v4604_v39 = vld [vmem:[%s4989_s4] sm:$0xff]  ;;  %v4609_v44 = vld [vmem:[%s4989_s4 + $0x10] sm:$0xff] }
 0x714   :  { %1644 = vmatprep.subr.mxu0 %v4568_v58  ;;  %1715 = vmatprep.subr.mxu1 %v4573_v62  ;;  %5293 = vst [vmem:[#allocation14_spill] sm:$0xff] %v4604_v39  ;;  %5294 = vst [vmem:[#allocation21_spill] sm:$0xff] %v4609_v44  ;;  %v2546_v62 = vld [vmem:[%s4988_s1 + $0xe0] sm:$0xff] }
 0x715   :  { %1645 = vmatpush1.msra.mxu0 %v4580_v40  ;;  %1716 = vmatpush1.msra.mxu1 %v4585_v3  ;;  %v2547_v3 = vld [vmem:[%s4988_s1 + $0xe8] sm:$0xff] }
 0x716   :  { %1646 = vmatprep.subr.mxu0 %v4592_v22  ;;  %1717 = vmatprep.subr.mxu1 %v4597_v9 }
 0x717   :  { %1647 = vmatpush1.msra.mxu0 %v4604_v39  ;;  %1718 = vmatpush1.msra.mxu1 %v4609_v44 }
 0x718   :  { %1792 = vmatprep.subr.mxu0 %v4236_v51  ;;  %1863 = vmatprep.subr.mxu1 %v4241_v55  ;;  %v2549_v55 = vld [vmem:[%s4988_s1 + $0xf8] sm:$0xff] }
 0x7b7   :  { %v1500_v58 = vpop.f32.mrf.mxu0  ;;  %v1571_v39 = vpop.f32.mrf.mxu1 }
 0x7b8   :  { %v1576_v22 = vadd.f32 %v2546_v62, %v1500_v58  ;;  %v1578_v58 = vadd.f32 %v2548_v36, %v1571_v39 }
 0x7b9   :  { %v1502_v40 = vpop.f32.mrf.mxu0  ;;  %v1573_v51 = vpop.f32.mrf.mxu1 }
 0x7ba   :  { %v2550_v9 = vmul.f32 -1.442695, %v1576_v22  ;;  %v1577_v38 = vadd.f32 %v2547_v3, %v1502_v40  ;;  %v1579_v37 = vadd.f32 %v2549_v55, %v1573_v51  ;;  %v1608_v51 = vpop.permute.xlu1 %1607 }
 0x7bb   :  { %vm1609_vm15 = vcmp.eq.s32.totalorder %v1608_v51, 1  ;;  %v5308_v51 = vld [vmem:[#allocation19_spill] sm:$0xff] }
 0x7bc   :  { %2704 = vpow2.f32 %v2550_v9  ;;  %v2551_v44 = vmul.f32 -1.442695, %v1577_v38  ;;  %v2552_v35 = vmul.f32 -1.442695, %v1579_v37 }
 0x7be   :  { %2706 = vpow2.f32 %v2551_v44 }
 0x7bf   :  { %2708 = vpow2.f32 %v2552_v35 }
 0x7c9   :  { %v2705_v34 = vpop.eup %2704 }
 0x7ca   :  { %v1583_v62 = vadd.f32 1.0, %v2705_v34 }
 0x7cb   :  { %v2707_v22 = vpop.eup %2706 }
 0x7cc   :  { %2710 = vrcp.f32 %v1583_v62  ;;  %v1589_v9 = vadd.f32 1.0, %v2707_v22  ;;  %v2709_v38 = vpop.eup %2708  ;;  %v5301_v62 = vld [vmem:[#allocation6_spill] sm:$0xff]  ;;  %v5302_v22 = vld [vmem:[#allocation15_spill] sm:$0xff] }
 0x7cd   :  { %2712 = vtanh.f32 %v1578_v58  ;;  %v1596_v33 = vadd.f32 1.0, %v2709_v38  ;;  %v5300_v58 = vld [vmem:[#allocation13_spill] sm:$0xff] }
 0x7ce   :  { %2714 = vrcp.f32 %v1589_v9  ;;  %v5303_v9 = vld [vmem:[#allocation7_spill] sm:$0xff]  ;;  %v5304_v38 = vld [vmem:[#allocation17_spill] sm:$0xff] }
 0x7cf   :  { %2716 = vrcp.f32 %v1596_v33  ;;  %v5299_v33 = vld [vmem:[#allocation5_spill] sm:$0xff] }
 0x7d9   :  { %v2711_v44 = vpop.eup %2710 }
 0x7da   :  { %v2713_v40 = vpop.eup %2712 }
 0x7db   :  { %v2715_v3 = vpop.eup %2714  ;;  %v1600_v55 = vmul.f32 %v2713_v40, %v2711_v44  ;;  %v5305_v44 = vld [vmem:[#allocation8_spill] sm:$0xff]  ;;  %v5306_v40 = vld [vmem:[#allocation18_spill] sm:$0xff] }
 0x7dc   :  { %v1599_v32 = vmul.f32 %v2715_v3, %v4224_v63  ;;  %v2717_v35 = vpop.eup %2716  ;;  %v5307_v3 = vld [vmem:[#allocation10_spill] sm:$0xff] }
 0x7de   :  { %v1601_v31 = vadd.f32 %v1600_v55, %v1599_v32  ;;  %v5298_v32 = vld [vmem:[#allocation11_spill] sm:$0xff]  ;;  %v5309_v55 = vld [vmem:[#allocation12_spill] sm:$0xff] }
 0x7e0   :  { %2718 = vtanh.f32 %v1601_v31  ;;  %v4633_v34 = vsel %vm1609_vm15, %v1601_v31, %v4224_v63  ;;  %v5295_v63 = vld [vmem:[#allocation4_spill] sm:$0xff]  ;;  %v5297_v31 = vld [vmem:[#allocation3_spill] sm:$0xff] }
 0x7ed   :  { %v2719_v36 = vpop.eup %2718 }
 0x7ee   :  { %v1603_v37 = vmul.f32 %v2719_v36, %v2717_v35  ;;  %v5310_v35 = vld [vmem:[#allocation20_spill] sm:$0xff]  ;;  %v5311_v36 = vld [vmem:[#allocation14_spill] sm:$0xff] }
 0x7f0   :  { %v1610_v39 = vsel %vm1609_vm15, %v1603_v37, %v4227_v48  ;;  %v5296_v48 = vld [vmem:[#allocation2_spill] sm:$0xff]  ;;  %v5312_v37 = vmov 0.0  }
 0x7f1   :  { %1681 = vmatmul.mubr.f32.vlgmr.msra.gmra.mxu0 %v1610_v39  ;;  %1752 = vmatmul.mubr.f32.vlgmr.msra.gmra.mxu1 %v1610_v39  ;;  %v5313_v39 = vld [vmem:[#allocation21_spill] sm:$0xff] }
 0x7f2   :  { %1793 = vmatpush1.msra.mxu0 %v4248_v23  ;;  %1864 = vmatpush1.msra.mxu1 %v4253_v46 }
 0x7f3   :  { %1794 = vmatprep.subr.mxu0 %v4260_v50  ;;  %1865 = vmatprep.subr.mxu1 %v4265_v20 }
 0x7f4   :  { %1795 = vmatpush1.msra.mxu0 %v4272_v52  ;;  %1866 = vmatpush1.msra.mxu1 %v4277_v41 }
 0x7f5   :  { %1796 = vmatprep.subr.mxu0 %v4284_v42  ;;  %1867 = vmatprep.subr.mxu1 %v4289_v10 }
 0x7f6   :  { %1797 = vmatpush1.msra.mxu0 %v4296_v60  ;;  %1868 = vmatpush1.msra.mxu1 %v4301_v43 }
 0x7f7   :  { %1798 = vmatprep.subr.mxu0 %v4308_v54  ;;  %1869 = vmatprep.subr.mxu1 %v4313_v57 }
 0x7f8   :  { %1799 = vmatpush1.msra.mxu0 %v4320_v56  ;;  %1870 = vmatpush1.msra.mxu1 %v4325_v53 }
 0x7f9   :  { %1800 = vmatprep.subr.mxu0 %v4332_v0  ;;  %1871 = vmatprep.subr.mxu1 %v4337_v49 }
 0x7fa   :  { %1801 = vmatpush1.msra.mxu0 %v4344_v45  ;;  %1872 = vmatpush1.msra.mxu1 %v4349_v47 }
 0x7fb   :  { %1802 = vmatprep.subr.mxu0 %v4356_v5  ;;  %1873 = vmatprep.subr.mxu1 %v4361_v61 }
 0x7fc   :  { %1803 = vmatpush1.msra.mxu0 %v4368_v59  ;;  %1874 = vmatpush1.msra.mxu1 %v4373_v1 }
 0x7fd   :  { %1804 = vmatprep.subr.mxu0 %v4380_v2  ;;  %1875 = vmatprep.subr.mxu1 %v4385_v4 }
 0x7fe   :  { %1805 = vmatpush1.msra.mxu0 %v4392_v6  ;;  %1876 = vmatpush1.msra.mxu1 %v4397_v7 }
 0x7ff   :  { %1806 = vmatprep.subr.mxu0 %v4402_v8  ;;  %1877 = vmatprep.subr.mxu1 %v4409_v11 }
 0x800   :  { %1807 = vmatpush1.msra.mxu0 %v4414_v12  ;;  %1878 = vmatpush1.msra.mxu1 %v4419_v13 }
 0x801   :  { %1808 = vmatprep.subr.mxu0 %v4426_v14  ;;  %1879 = vmatprep.subr.mxu1 %v4431_v15 }
 0x802   :  { %1809 = vmatpush1.msra.mxu0 %v4436_v16  ;;  %1880 = vmatpush1.msra.mxu1 %v4443_v17 }
 0x803   :  { %1810 = vmatprep.subr.mxu0 %v4448_v18  ;;  %1881 = vmatprep.subr.mxu1 %v4453_v19 }
 0x804   :  { %1811 = vmatpush1.msra.mxu0 %v4460_v21  ;;  %1882 = vmatpush1.msra.mxu1 %v4465_v24 }
 0x805   :  { %1812 = vmatprep.subr.mxu0 %v4472_v25  ;;  %1883 = vmatprep.subr.mxu1 %v4477_v26 }
 0x806   :  { %1813 = vmatpush1.msra.mxu0 %v4484_v27  ;;  %1884 = vmatpush1.msra.mxu1 %v4489_v28 }
 0x807   :  { %1814 = vmatprep.subr.mxu0 %v4496_v29  ;;  %1885 = vmatprep.subr.mxu1 %v4501_v30 }
 0x808   :  { %1815 = vmatpush1.msra.mxu0 %v5295_v63  ;;  %1886 = vmatpush1.msra.mxu1 %v5296_v48 }
 0x809   :  { %1816 = vmatprep.subr.mxu0 %v5297_v31  ;;  %1887 = vmatprep.subr.mxu1 %v5298_v32 }
 0x80a   :  { %1817 = vmatpush1.msra.mxu0 %v5299_v33  ;;  %1888 = vmatpush1.msra.mxu1 %v5300_v58 }
 0x80b   :  { %1818 = vmatprep.subr.mxu0 %v5301_v62  ;;  %1889 = vmatprep.subr.mxu1 %v5302_v22  ;;  %v1614_v62 = vld [vmem:[%s4990_s2 + $0x10] sm:$0xff] }
 0x80c   :  { %1819 = vmatpush1.msra.mxu0 %v5303_v9  ;;  %1890 = vmatpush1.msra.mxu1 %v5304_v38  ;;  %v5314_v38 = vld [vmem:[#allocation22_spill] sm:$0xff] }
 0x80d   :  { %1820 = vmatprep.subr.mxu0 %v5305_v44  ;;  %1891 = vmatprep.subr.mxu1 %v5306_v40  ;;  %v5315_v44 = vld [vmem:[#allocation9_spill] sm:$0xff] }
 0x80e   :  { %1821 = vmatpush1.msra.mxu0 %v5307_v3  ;;  %1892 = vmatpush1.msra.mxu1 %v5308_v51  ;;  %v1612_v51 = vld [vmem:[%s4990_s2] sm:$0xff] }
 0x80f   :  { %1822 = vmatprep.subr.mxu0 %v5309_v55  ;;  %1893 = vmatprep.subr.mxu1 %v5310_v35  ;;  %v1613_v35 = vld [vmem:[%s4990_s2 + $0x8] sm:$0xff] }
 0x810   :  { %1823 = vmatpush1.msra.mxu0 %v5311_v36  ;;  %1856 = vmatprep.mubr.f32.mxu0 %v5312_v37 }
 0x811   :  { %1894 = vmatpush1.msra.mxu1 %v5313_v39  ;;  %1927 = vmatprep.mubr.f32.mxu1 %v5312_v37 }
 0x812   :  { %1969 = vmatprep.subr.mxu0 %v5314_v38  ;;  %2040 = vmatprep.subr.mxu1 %v5315_v44  ;;  %v1615_v44 = vld [vmem:[%s4990_s2 + $0x18] sm:$0xff] }
 0x8b1   :  { %v1682_v3 = vpop.f32.mrf.mxu0  ;;  %v1753_v39 = vpop.f32.mrf.mxu1 }
 0x8b2   :  { %v1758_v36 = vadd.f32 %v1682_v3, %v1612_v51  ;;  %v1760_v3 = vadd.f32 %v1753_v39, %v1614_v62  ;;  %v5319_v39 = vld [vmem:[#allocation13_spill] sm:$0xff] }
 0x8b3   :  { %v1684_v55 = vpop.f32.mrf.mxu0  ;;  %v1755_v38 = vpop.f32.mrf.mxu1 }
 0x8b4   :  { %v2553_v40 = vmul.f32 -1.442695, %v1758_v36  ;;  %v1759_v9 = vadd.f32 %v1684_v55, %v1613_v35  ;;  %v1761_v22 = vadd.f32 %v1755_v38, %v1615_v44 }
 0x8b6   :  { %2720 = vpow2.f32 %v2553_v40  ;;  %v2554_v37 = vmul.f32 -1.442695, %v1759_v9  ;;  %v2555_v58 = vmul.f32 -1.442695, %v1761_v22  ;;  %v5318_v22 = vld [vmem:[#allocation5_spill] sm:$0xff] }
 0x8b8   :  { %2722 = vpow2.f32 %v2554_v37 }
 0x8b9   :  { %2724 = vpow2.f32 %v2555_v58 }
 0x8c3   :  { %v2721_v33 = vpop.eup %2720 }
 0x8c4   :  { %v1765_v51 = vadd.f32 1.0, %v2721_v33 }
 0x8c5   :  { %v2723_v36 = vpop.eup %2722 }
 0x8c6   :  { %2726 = vrcp.f32 %v1765_v51  ;;  %v1771_v40 = vadd.f32 1.0, %v2723_v36  ;;  %v2725_v9 = vpop.eup %2724  ;;  %v5321_v51 = vld [vmem:[#allocation15_spill] sm:$0xff] }
 0x8c7   :  { %2728 = vtanh.f32 %v1760_v3  ;;  %v1778_v32 = vadd.f32 1.0, %v2725_v9  ;;  %v5320_v3 = vld [vmem:[#allocation6_spill] sm:$0xff]  ;;  %v5322_v36 = vld [vmem:[#allocation7_spill] sm:$0xff]  ;;  %v5324_v9 = vld [vmem:[#allocation8_spill] sm:$0xff] }
 0x8c8   :  { %2730 = vrcp.f32 %v1771_v40  ;;  %v5323_v40 = vld [vmem:[#allocation17_spill] sm:$0xff] }
 0x8c9   :  { %2732 = vrcp.f32 %v1778_v32  ;;  %v5317_v32 = vld [vmem:[#allocation11_spill] sm:$0xff] }
 0x8d3   :  { %v2727_v55 = vpop.eup %2726 }
 0x8d4   :  { %v2729_v35 = vpop.eup %2728 }
 0x8d5   :  { %v2731_v37 = vpop.eup %2730  ;;  %v1782_v38 = vmul.f32 %v2729_v35, %v2727_v55  ;;  %v5325_v55 = vld [vmem:[#allocation18_spill] sm:$0xff] }
 0x8d6   :  { %v1781_v44 = vmul.f32 %v2731_v37, %v4633_v34  ;;  %v2733_v33 = vpop.eup %2732  ;;  %v5316_v34 = vld [vmem:[#allocation3_spill] sm:$0xff]  ;;  %v5326_v35 = vld [vmem:[#allocation10_spill] sm:$0xff] }
 0x8d7   :  { %v5327_v37 = vld [vmem:[#allocation19_spill] sm:$0xff] }
 0x8d8   :  { %v4715_v31 = vadd.f32 %v1782_v38, %v1781_v44  ;;  %v5328_v38 = vld [vmem:[#allocation12_spill] sm:$0xff] }
 0x8d9   :  { %v5329_v44 = vld [vmem:[#allocation20_spill] sm:$0xff] }
 0x8da   :  { %2734 = vtanh.f32 %v4715_v31 }
 0x8e7   :  { %v2735_v62 = vpop.eup %2734 }
 0x8e8   :  { %v1785_v58 = vmul.f32 %v2735_v62, %v2733_v33  ;;  %v5330_v33 = vld [vmem:[#allocation14_spill] sm:$0xff]  ;;  %v5331_v62 = vmov 0.0  }
 0x8ea   :  { %1786 = vst [vmem:[%s4991_s5] sm:$0xff] %v1785_v58  ;;  %1857 = vmatmul.mubr.f32.vlgmr.msra.gmra.mxu0 %v1785_v58  ;;  %1928 = vmatmul.mubr.f32.vlgmr.msra.gmra.mxu1 %v1785_v58  ;;  %v5332_v58 = vld [vmem:[#allocation21_spill] sm:$0xff] }
 0x8eb   :  { %1970 = vmatpush1.msra.mxu0 %v4248_v23  ;;  %2041 = vmatpush1.msra.mxu1 %v4253_v46 }
 0x8ec   :  { %1971 = vmatprep.subr.mxu0 %v4260_v50  ;;  %2042 = vmatprep.subr.mxu1 %v4265_v20 }
 0x8ed   :  { %1972 = vmatpush1.msra.mxu0 %v4272_v52  ;;  %2043 = vmatpush1.msra.mxu1 %v4277_v41 }
 0x8ee   :  { %1973 = vmatprep.subr.mxu0 %v4284_v42  ;;  %2044 = vmatprep.subr.mxu1 %v4289_v10 }
 0x8ef   :  { %1974 = vmatpush1.msra.mxu0 %v4296_v60  ;;  %2045 = vmatpush1.msra.mxu1 %v4301_v43 }
 0x8f0   :  { %1975 = vmatprep.subr.mxu0 %v4308_v54  ;;  %2046 = vmatprep.subr.mxu1 %v4313_v57 }
 0x8f1   :  { %1976 = vmatpush1.msra.mxu0 %v4320_v56  ;;  %2047 = vmatpush1.msra.mxu1 %v4325_v53 }
 0x8f2   :  { %1977 = vmatprep.subr.mxu0 %v4332_v0  ;;  %2048 = vmatprep.subr.mxu1 %v4337_v49 }
 0x8f3   :  { %1978 = vmatpush1.msra.mxu0 %v4344_v45  ;;  %2049 = vmatpush1.msra.mxu1 %v4349_v47 }
 0x8f4   :  { %1979 = vmatprep.subr.mxu0 %v4356_v5  ;;  %2050 = vmatprep.subr.mxu1 %v4361_v61 }
 0x8f5   :  { %1980 = vmatpush1.msra.mxu0 %v4368_v59  ;;  %2051 = vmatpush1.msra.mxu1 %v4373_v1 }
 0x8f6   :  { %1981 = vmatprep.subr.mxu0 %v4380_v2  ;;  %2052 = vmatprep.subr.mxu1 %v4385_v4 }
 0x8f7   :  { %1982 = vmatpush1.msra.mxu0 %v4392_v6  ;;  %2053 = vmatpush1.msra.mxu1 %v4397_v7 }
 0x8f8   :  { %1983 = vmatprep.subr.mxu0 %v4402_v8  ;;  %2054 = vmatprep.subr.mxu1 %v4409_v11 }
 0x8f9   :  { %1984 = vmatpush1.msra.mxu0 %v4414_v12  ;;  %2055 = vmatpush1.msra.mxu1 %v4419_v13 }
 0x8fa   :  { %1985 = vmatprep.subr.mxu0 %v4426_v14  ;;  %2056 = vmatprep.subr.mxu1 %v4431_v15 }
 0x8fb   :  { %1986 = vmatpush1.msra.mxu0 %v4436_v16  ;;  %2057 = vmatpush1.msra.mxu1 %v4443_v17 }
 0x8fc   :  { %1987 = vmatprep.subr.mxu0 %v4448_v18  ;;  %2058 = vmatprep.subr.mxu1 %v4453_v19 }
 0x8fd   :  { %1988 = vmatpush1.msra.mxu0 %v4460_v21  ;;  %2059 = vmatpush1.msra.mxu1 %v4465_v24 }
 0x8fe   :  { %1989 = vmatprep.subr.mxu0 %v4472_v25  ;;  %2060 = vmatprep.subr.mxu1 %v4477_v26 }
 0x8ff   :  { %1990 = vmatpush1.msra.mxu0 %v4484_v27  ;;  %2061 = vmatpush1.msra.mxu1 %v4489_v28 }
 0x900   :  { %1991 = vmatprep.subr.mxu0 %v4496_v29  ;;  %2062 = vmatprep.subr.mxu1 %v4501_v30 }
 0x901   :  { %1992 = vmatpush1.msra.mxu0 %v5295_v63  ;;  %2063 = vmatpush1.msra.mxu1 %v5296_v48 }
 0x902   :  { %1993 = vmatprep.subr.mxu0 %v5316_v34  ;;  %2064 = vmatprep.subr.mxu1 %v5317_v32 }
 0x903   :  { %1994 = vmatpush1.msra.mxu0 %v5318_v22  ;;  %2065 = vmatpush1.msra.mxu1 %v5319_v39 }
 0x904   :  { %1995 = vmatprep.subr.mxu0 %v5320_v3  ;;  %2066 = vmatprep.subr.mxu1 %v5321_v51  ;;  %v2558_v3 = vld [vmem:[%s4990_s2 + $0x30] sm:$0xff] }
 0x905   :  { %1996 = vmatpush1.msra.mxu0 %v5322_v36  ;;  %2067 = vmatpush1.msra.mxu1 %v5323_v40  ;;  %v5333_v40 = vld [vmem:[#allocation22_spill] sm:$0xff] }
 0x906   :  { %1997 = vmatprep.subr.mxu0 %v5324_v9  ;;  %2068 = vmatprep.subr.mxu1 %v5325_v55  ;;  %v5334_v9 = vld [vmem:[#allocation9_spill] sm:$0xff] }
 0x907   :  { %1998 = vmatpush1.msra.mxu0 %v5326_v35  ;;  %2069 = vmatpush1.msra.mxu1 %v5327_v37  ;;  %v2556_v37 = vld [vmem:[%s4990_s2 + $0x20] sm:$0xff] }
 0x908   :  { %1999 = vmatprep.subr.mxu0 %v5328_v38  ;;  %2070 = vmatprep.subr.mxu1 %v5329_v44  ;;  %v2557_v44 = vld [vmem:[%s4990_s2 + $0x28] sm:$0xff] }
 0x909   :  { %2000 = vmatpush1.msra.mxu0 %v5330_v33  ;;  %2033 = vmatprep.mubr.f32.mxu0 %v5331_v62 }
 0x90a   :  { %2071 = vmatpush1.msra.mxu1 %v5332_v58  ;;  %2104 = vmatprep.mubr.f32.mxu1 %v5331_v62 }
 0x90b   :  { %2146 = vmatprep.subr.mxu0 %v5333_v40  ;;  %2217 = vmatprep.subr.mxu1 %v5334_v9  ;;  %v2559_v9 = vld [vmem:[%s4990_s2 + $0x38] sm:$0xff] }
 0x9aa   :  { %v1858_v35 = vpop.f32.mrf.mxu0  ;;  %v1929_v58 = vpop.f32.mrf.mxu1 }
 0x9ab   :  { %v1934_v33 = vadd.f32 %v2556_v37, %v1858_v35  ;;  %v1936_v35 = vadd.f32 %v2558_v3, %v1929_v58  ;;  %v5338_v58 = vld [vmem:[#allocation13_spill] sm:$0xff] }
 0x9ac   :  { %v1860_v38 = vpop.f32.mrf.mxu0  ;;  %v1931_v40 = vpop.f32.mrf.mxu1 }
 0x9ad   :  { %v2560_v55 = vmul.f32 -1.442695, %v1934_v33  ;;  %v1935_v36 = vadd.f32 %v2557_v44, %v1860_v38  ;;  %v1937_v51 = vadd.f32 %v2559_v9, %v1931_v40 }
 0x9af   :  { %2736 = vpow2.f32 %v2560_v55  ;;  %v2561_v62 = vmul.f32 -1.442695, %v1935_v36  ;;  %v2562_v39 = vmul.f32 -1.442695, %v1937_v51  ;;  %v5337_v51 = vld [vmem:[#allocation5_spill] sm:$0xff] }
 0x9b1   :  { %2738 = vpow2.f32 %v2561_v62 }
 0x9b2   :  { %2740 = vpow2.f32 %v2562_v39 }
 0x9bc   :  { %v2737_v22 = vpop.eup %2736 }
 0x9bd   :  { %v1941_v37 = vadd.f32 1.0, %v2737_v22 }
 0x9be   :  { %v2739_v33 = vpop.eup %2738 }
 0x9bf   :  { %2742 = vrcp.f32 %v1941_v37  ;;  %v1947_v55 = vadd.f32 1.0, %v2739_v33  ;;  %v2741_v36 = vpop.eup %2740  ;;  %v5340_v37 = vld [vmem:[#allocation15_spill] sm:$0xff] }
 0x9c0   :  { %2744 = vtanh.f32 %v1936_v35  ;;  %v1954_v32 = vadd.f32 1.0, %v2741_v36  ;;  %v5339_v35 = vld [vmem:[#allocation6_spill] sm:$0xff]  ;;  %v5341_v33 = vld [vmem:[#allocation7_spill] sm:$0xff]  ;;  %v5343_v36 = vld [vmem:[#allocation8_spill] sm:$0xff] }
 0x9c1   :  { %2746 = vrcp.f32 %v1947_v55  ;;  %v5342_v55 = vld [vmem:[#allocation17_spill] sm:$0xff] }
 0x9c2   :  { %2748 = vrcp.f32 %v1954_v32  ;;  %v5336_v32 = vld [vmem:[#allocation11_spill] sm:$0xff] }
 0x9cc   :  { %v2743_v38 = vpop.eup %2742 }
 0x9cd   :  { %v2745_v44 = vpop.eup %2744 }
 0x9ce   :  { %v2747_v62 = vpop.eup %2746  ;;  %v1958_v40 = vmul.f32 %v2745_v44, %v2743_v38  ;;  %v5344_v38 = vld [vmem:[#allocation18_spill] sm:$0xff] }
 0x9cf   :  { %v1957_v9 = vmul.f32 %v2747_v62, %v4715_v31  ;;  %v2749_v22 = vpop.eup %2748  ;;  %v5335_v31 = vld [vmem:[#allocation3_spill] sm:$0xff]  ;;  %v5345_v44 = vld [vmem:[#allocation10_spill] sm:$0xff] }
 0x9d0   :  { %v5346_v62 = vld [vmem:[#allocation19_spill] sm:$0xff] }
 0x9d1   :  { %v4800_v34 = vadd.f32 %v1958_v40, %v1957_v9  ;;  %v5347_v40 = vld [vmem:[#allocation12_spill] sm:$0xff] }
 0x9d2   :  { %v5348_v9 = vld [vmem:[#allocation20_spill] sm:$0xff] }
 0x9d3   :  { %2750 = vtanh.f32 %v4800_v34 }
 0x9e0   :  { %v2751_v3 = vpop.eup %2750 }
 0x9e1   :  { %v1961_v39 = vmul.f32 %v2751_v3, %v2749_v22  ;;  %v5349_v22 = vld [vmem:[#allocation14_spill] sm:$0xff]  ;;  %v5350_v3 = vmov 0.0  }
 0x9e3   :  { %2563 = vst [vmem:[%s4991_s5 + $0x8] sm:$0xff] %v1961_v39  ;;  %2034 = vmatmul.mubr.f32.vlgmr.msra.gmra.mxu0 %v1961_v39  ;;  %2105 = vmatmul.mubr.f32.vlgmr.msra.gmra.mxu1 %v1961_v39  ;;  %v5351_v39 = vld [vmem:[#allocation21_spill] sm:$0xff] }
 0x9e4   :  { %2147 = vmatpush1.msra.mxu0 %v4248_v23  ;;  %2218 = vmatpush1.msra.mxu1 %v4253_v46 }
 0x9e5   :  { %2148 = vmatprep.subr.mxu0 %v4260_v50  ;;  %2219 = vmatprep.subr.mxu1 %v4265_v20 }
 0x9e6   :  { %2149 = vmatpush1.msra.mxu0 %v4272_v52  ;;  %2220 = vmatpush1.msra.mxu1 %v4277_v41 }
 0x9e7   :  { %2150 = vmatprep.subr.mxu0 %v4284_v42  ;;  %2221 = vmatprep.subr.mxu1 %v4289_v10 }
 0x9e8   :  { %2151 = vmatpush1.msra.mxu0 %v4296_v60  ;;  %2222 = vmatpush1.msra.mxu1 %v4301_v43 }
 0x9e9   :  { %2152 = vmatprep.subr.mxu0 %v4308_v54  ;;  %2223 = vmatprep.subr.mxu1 %v4313_v57 }
 0x9ea   :  { %2153 = vmatpush1.msra.mxu0 %v4320_v56  ;;  %2224 = vmatpush1.msra.mxu1 %v4325_v53 }
 0x9eb   :  { %2154 = vmatprep.subr.mxu0 %v4332_v0  ;;  %2225 = vmatprep.subr.mxu1 %v4337_v49 }
 0x9ec   :  { %2155 = vmatpush1.msra.mxu0 %v4344_v45  ;;  %2226 = vmatpush1.msra.mxu1 %v4349_v47 }
 0x9ed   :  { %2156 = vmatprep.subr.mxu0 %v4356_v5  ;;  %2227 = vmatprep.subr.mxu1 %v4361_v61 }
 0x9ee   :  { %2157 = vmatpush1.msra.mxu0 %v4368_v59  ;;  %2228 = vmatpush1.msra.mxu1 %v4373_v1 }
 0x9ef   :  { %2158 = vmatprep.subr.mxu0 %v4380_v2  ;;  %2229 = vmatprep.subr.mxu1 %v4385_v4 }
 0x9f0   :  { %2159 = vmatpush1.msra.mxu0 %v4392_v6  ;;  %2230 = vmatpush1.msra.mxu1 %v4397_v7 }
 0x9f1   :  { %2160 = vmatprep.subr.mxu0 %v4402_v8  ;;  %2231 = vmatprep.subr.mxu1 %v4409_v11 }
 0x9f2   :  { %2161 = vmatpush1.msra.mxu0 %v4414_v12  ;;  %2232 = vmatpush1.msra.mxu1 %v4419_v13 }
 0x9f3   :  { %2162 = vmatprep.subr.mxu0 %v4426_v14  ;;  %2233 = vmatprep.subr.mxu1 %v4431_v15 }
 0x9f4   :  { %2163 = vmatpush1.msra.mxu0 %v4436_v16  ;;  %2234 = vmatpush1.msra.mxu1 %v4443_v17 }
 0x9f5   :  { %2164 = vmatprep.subr.mxu0 %v4448_v18  ;;  %2235 = vmatprep.subr.mxu1 %v4453_v19 }
 0x9f6   :  { %2165 = vmatpush1.msra.mxu0 %v4460_v21  ;;  %2236 = vmatpush1.msra.mxu1 %v4465_v24 }
 0x9f7   :  { %2166 = vmatprep.subr.mxu0 %v4472_v25  ;;  %2237 = vmatprep.subr.mxu1 %v4477_v26 }
 0x9f8   :  { %2167 = vmatpush1.msra.mxu0 %v4484_v27  ;;  %2238 = vmatpush1.msra.mxu1 %v4489_v28 }
 0x9f9   :  { %2168 = vmatprep.subr.mxu0 %v4496_v29  ;;  %2239 = vmatprep.subr.mxu1 %v4501_v30 }
 0x9fa   :  { %2169 = vmatpush1.msra.mxu0 %v5295_v63  ;;  %2240 = vmatpush1.msra.mxu1 %v5296_v48 }
 0x9fb   :  { %2170 = vmatprep.subr.mxu0 %v5335_v31  ;;  %2241 = vmatprep.subr.mxu1 %v5336_v32 }
 0x9fc   :  { %2171 = vmatpush1.msra.mxu0 %v5337_v51  ;;  %2242 = vmatpush1.msra.mxu1 %v5338_v58 }
 0x9fd   :  { %2172 = vmatprep.subr.mxu0 %v5339_v35  ;;  %2243 = vmatprep.subr.mxu1 %v5340_v37  ;;  %v2566_v35 = vld [vmem:[%s4990_s2 + $0x50] sm:$0xff] }
 0x9fe   :  { %2173 = vmatpush1.msra.mxu0 %v5341_v33  ;;  %2244 = vmatpush1.msra.mxu1 %v5342_v55  ;;  %v5352_v55 = vld [vmem:[#allocation22_spill] sm:$0xff] }
 0x9ff   :  { %2174 = vmatprep.subr.mxu0 %v5343_v36  ;;  %2245 = vmatprep.subr.mxu1 %v5344_v38  ;;  %v5353_v36 = vld [vmem:[#allocation9_spill] sm:$0xff] }
 0xa00   :  { %2175 = vmatpush1.msra.mxu0 %v5345_v44  ;;  %2246 = vmatpush1.msra.mxu1 %v5346_v62  ;;  %v2564_v62 = vld [vmem:[%s4990_s2 + $0x40] sm:$0xff] }
 0xa01   :  { %2176 = vmatprep.subr.mxu0 %v5347_v40  ;;  %2247 = vmatprep.subr.mxu1 %v5348_v9  ;;  %v2565_v9 = vld [vmem:[%s4990_s2 + $0x48] sm:$0xff] }
 0xa02   :  { %2177 = vmatpush1.msra.mxu0 %v5349_v22  ;;  %2210 = vmatprep.mubr.f32.mxu0 %v5350_v3 }
 0xa03   :  { %2248 = vmatpush1.msra.mxu1 %v5351_v39  ;;  %2281 = vmatprep.mubr.f32.mxu1 %v5350_v3 }
 0xa04   :  { %2323 = vmatprep.subr.mxu0 %v5352_v55  ;;  %2394 = vmatprep.subr.mxu1 %v5353_v36  ;;  %v2567_v55 = vld [vmem:[%s4990_s2 + $0x58] sm:$0xff] }
 0xaa3   :  { %v2035_v44 = vpop.f32.mrf.mxu0  ;;  %v2106_v39 = vpop.f32.mrf.mxu1 }
 0xaa4   :  { %v2111_v22 = vadd.f32 %v2564_v62, %v2035_v44  ;;  %v2113_v44 = vadd.f32 %v2566_v35, %v2106_v39 }
 0xaa5   :  { %v2037_v40 = vpop.f32.mrf.mxu0  ;;  %v2108_v36 = vpop.f32.mrf.mxu1 }
 0xaa6   :  { %v2568_v38 = vmul.f32 -1.442695, %v2111_v22  ;;  %v2112_v33 = vadd.f32 %v2565_v9, %v2037_v40  ;;  %v2114_v37 = vadd.f32 %v2567_v55, %v2108_v36 }
 0xaa8   :  { %2752 = vpow2.f32 %v2568_v38  ;;  %v2569_v3 = vmul.f32 -1.442695, %v2112_v33  ;;  %v2570_v58 = vmul.f32 -1.442695, %v2114_v37 }
 0xaaa   :  { %2754 = vpow2.f32 %v2569_v3 }
 0xaab   :  { %2756 = vpow2.f32 %v2570_v58 }
 0xab5   :  { %v2753_v51 = vpop.eup %2752 }
 0xab6   :  { %v2118_v62 = vadd.f32 1.0, %v2753_v51 }
 0xab7   :  { %v2755_v22 = vpop.eup %2754 }
 0xab8   :  { %2758 = vrcp.f32 %v2118_v62  ;;  %v2124_v38 = vadd.f32 1.0, %v2755_v22  ;;  %v2757_v33 = vpop.eup %2756 }
 0xab9   :  { %2760 = vtanh.f32 %v2113_v44  ;;  %v2131_v32 = vadd.f32 1.0, %v2757_v33 }
 0xaba   :  { %2762 = vrcp.f32 %v2124_v38 }
 0xabb   :  { %2764 = vrcp.f32 %v2131_v32  ;;  %v2580_v32 = vld [vmem:[%s4990_s2 + $0x80] sm:$0xff] }
 0xac5   :  { %v2759_v40 = vpop.eup %2758 }
 0xac6   :  { %v2761_v9 = vpop.eup %2760 }
 0xac7   :  { %v2763_v3 = vpop.eup %2762  ;;  %v2135_v55 = vmul.f32 %v2761_v9, %v2759_v40  ;;  %v2583_v40 = vld [vmem:[%s4990_s2 + $0x98] sm:$0xff] }
 0xac8   :  { %v2134_v36 = vmul.f32 %v2763_v3, %v4800_v34  ;;  %v2765_v51 = vpop.eup %2764 }
 0xaca   :  { %v4885_v31 = vadd.f32 %v2135_v55, %v2134_v36  ;;  %v2582_v55 = vld [vmem:[%s4990_s2 + $0x90] sm:$0xff] }
 0xacc   :  { %2766 = vtanh.f32 %v4885_v31 }
 0xad9   :  { %v2767_v35 = vpop.eup %2766 }
 0xada   :  { %v2138_v58 = vmul.f32 %v2767_v35, %v2765_v51 }
 0xadc   :  { %2571 = vst [vmem:[%s4991_s5 + $0x10] sm:$0xff] %v2138_v58  ;;  %2211 = vmatmul.mubr.f32.vlgmr.msra.gmra.mxu0 %v2138_v58  ;;  %2282 = vmatmul.mubr.f32.vlgmr.msra.gmra.mxu1 %v2138_v58 }
 0xadd   :  { %2324 = vmatpush1.msra.mxu0 %v4248_v23  ;;  %2395 = vmatpush1.msra.mxu1 %v4253_v46  ;;  %v5354_v23 = vld [vmem:[#allocation3_spill] sm:$0xff] }
 0xade   :  { %2325 = vmatprep.subr.mxu0 %v4260_v50  ;;  %2396 = vmatprep.subr.mxu1 %v4265_v20  ;;  %v5355_v46 = vld [vmem:[#allocation11_spill] sm:$0xff]  ;;  %v5356_v50 = vld [vmem:[#allocation5_spill] sm:$0xff] }
 0xadf   :  { %2326 = vmatpush1.msra.mxu0 %v4272_v52  ;;  %2397 = vmatpush1.msra.mxu1 %v4277_v41  ;;  %v5357_v20 = vld [vmem:[#allocation13_spill] sm:$0xff]  ;;  %v5358_v52 = vld [vmem:[#allocation6_spill] sm:$0xff]  ;;  %v5359_v41 = vld [vmem:[#allocation15_spill] sm:$0xff] }
 0xae0   :  { %2327 = vmatprep.subr.mxu0 %v4284_v42  ;;  %2398 = vmatprep.subr.mxu1 %v4289_v10  ;;  %v5360_v42 = vld [vmem:[#allocation7_spill] sm:$0xff]  ;;  %v5361_v10 = vld [vmem:[#allocation17_spill] sm:$0xff] }
 0xae1   :  { %2328 = vmatpush1.msra.mxu0 %v4296_v60  ;;  %2399 = vmatpush1.msra.mxu1 %v4301_v43  ;;  %v5362_v60 = vld [vmem:[#allocation8_spill] sm:$0xff]  ;;  %v5363_v43 = vld [vmem:[#allocation18_spill] sm:$0xff] }
 0xae2   :  { %2329 = vmatprep.subr.mxu0 %v4308_v54  ;;  %2400 = vmatprep.subr.mxu1 %v4313_v57  ;;  %v5364_v54 = vld [vmem:[#allocation10_spill] sm:$0xff]  ;;  %v5365_v57 = vld [vmem:[#allocation19_spill] sm:$0xff] }
 0xae3   :  { %2330 = vmatpush1.msra.mxu0 %v4320_v56  ;;  %2401 = vmatpush1.msra.mxu1 %v4325_v53  ;;  %v5366_v56 = vld [vmem:[#allocation12_spill] sm:$0xff] }
 0xae4   :  { %2331 = vmatprep.subr.mxu0 %v4332_v0  ;;  %2402 = vmatprep.subr.mxu1 %v4337_v49  ;;  %v5367_v53 = vld [vmem:[#allocation20_spill] sm:$0xff]  ;;  %v5368_v0 = vld [vmem:[#allocation14_spill] sm:$0xff]  ;;  %v5369_v49 = vmov 0.0  }
 0xae5   :  { %2332 = vmatpush1.msra.mxu0 %v4344_v45  ;;  %2403 = vmatpush1.msra.mxu1 %v4349_v47  ;;  %v5370_v45 = vld [vmem:[#allocation21_spill] sm:$0xff]  ;;  %v2572_v47 = vld [vmem:[%s4990_s2 + $0x60] sm:$0xff] }
 0xae6   :  { %2333 = vmatprep.subr.mxu0 %v4356_v5  ;;  %2404 = vmatprep.subr.mxu1 %v4361_v61  ;;  %v2573_v61 = vld [vmem:[%s4990_s2 + $0x68] sm:$0xff] }
 0xae7   :  { %2334 = vmatpush1.msra.mxu0 %v4368_v59  ;;  %2405 = vmatpush1.msra.mxu1 %v4373_v1 }
 0xae8   :  { %2335 = vmatprep.subr.mxu0 %v4380_v2  ;;  %2406 = vmatprep.subr.mxu1 %v4385_v4 }
 0xae9   :  { %2336 = vmatpush1.msra.mxu0 %v4392_v6  ;;  %2407 = vmatpush1.msra.mxu1 %v4397_v7 }
 0xaea   :  { %2337 = vmatprep.subr.mxu0 %v4402_v8  ;;  %2408 = vmatprep.subr.mxu1 %v4409_v11  ;;  %v2575_v8 = vld [vmem:[%s4990_s2 + $0x78] sm:$0xff] }
 0xaeb   :  { %2338 = vmatpush1.msra.mxu0 %v4414_v12  ;;  %2409 = vmatpush1.msra.mxu1 %v4419_v13  ;;  %v2574_v13 = vld [vmem:[%s4990_s2 + $0x70] sm:$0xff] }
 0xaec   :  { %2339 = vmatprep.subr.mxu0 %v4426_v14  ;;  %2410 = vmatprep.subr.mxu1 %v4431_v15 }
 0xaed   :  { %2340 = vmatpush1.msra.mxu0 %v4436_v16  ;;  %2411 = vmatpush1.msra.mxu1 %v4443_v17 }
 0xaee   :  { %2341 = vmatprep.subr.mxu0 %v4448_v18  ;;  %2412 = vmatprep.subr.mxu1 %v4453_v19 }
 0xaef   :  { %2342 = vmatpush1.msra.mxu0 %v4460_v21  ;;  %2413 = vmatpush1.msra.mxu1 %v4465_v24 }
 0xaf0   :  { %2343 = vmatprep.subr.mxu0 %v4472_v25  ;;  %2414 = vmatprep.subr.mxu1 %v4477_v26 }
 0xaf1   :  { %2344 = vmatpush1.msra.mxu0 %v4484_v27  ;;  %2415 = vmatpush1.msra.mxu1 %v4489_v28 }
 0xaf2   :  { %2345 = vmatprep.subr.mxu0 %v4496_v29  ;;  %2416 = vmatprep.subr.mxu1 %v4501_v30 }
 0xaf3   :  { %2346 = vmatpush1.msra.mxu0 %v5295_v63  ;;  %2417 = vmatpush1.msra.mxu1 %v5296_v48 }
 0xaf4   :  { %2347 = vmatprep.subr.mxu0 %v5354_v23  ;;  %2418 = vmatprep.subr.mxu1 %v5355_v46 }
 0xaf5   :  { %2348 = vmatpush1.msra.mxu0 %v5356_v50  ;;  %2419 = vmatpush1.msra.mxu1 %v5357_v20 }
 0xaf6   :  { %2349 = vmatprep.subr.mxu0 %v5358_v52  ;;  %2420 = vmatprep.subr.mxu1 %v5359_v41 }
 0xaf7   :  { %2350 = vmatpush1.msra.mxu0 %v5360_v42  ;;  %2421 = vmatpush1.msra.mxu1 %v5361_v10 }
 0xaf8   :  { %2351 = vmatprep.subr.mxu0 %v5362_v60  ;;  %2422 = vmatprep.subr.mxu1 %v5363_v43 }
 0xaf9   :  { %2352 = vmatpush1.msra.mxu0 %v5364_v54  ;;  %2423 = vmatpush1.msra.mxu1 %v5365_v57 }
 0xafa   :  { %2353 = vmatprep.subr.mxu0 %v5366_v56  ;;  %2424 = vmatprep.subr.mxu1 %v5367_v53 }
 0xafb   :  { %2354 = vmatpush1.msra.mxu0 %v5368_v0  ;;  %2387 = vmatprep.mubr.f32.mxu0 %v5369_v49 }
 0xafc   :  { %2425 = vmatpush1.msra.mxu1 %v5370_v45  ;;  %2458 = vmatprep.mubr.f32.mxu1 %v5369_v49 }
 0xb9c   :  { %v2212_v5 = vpop.f32.mrf.mxu0  ;;  %v2283_v6 = vpop.f32.mrf.mxu1 }
 0xb9d   :  { %v2288_v59 = vadd.f32 %v2572_v47, %v2212_v5  ;;  %v2290_v16 = vadd.f32 %v2574_v13, %v2283_v6 }
 0xb9e   :  { %v2214_v1 = vpop.f32.mrf.mxu0  ;;  %v2285_v11 = vpop.f32.mrf.mxu1 }
 0xb9f   :  { %v2576_v2 = vmul.f32 -1.442695, %v2288_v59  ;;  %v2289_v4 = vadd.f32 %v2573_v61, %v2214_v1  ;;  %v2291_v12 = vadd.f32 %v2575_v8, %v2285_v11 }
 0xba1   :  { %2768 = vpow2.f32 %v2576_v2  ;;  %v2577_v7 = vmul.f32 -1.442695, %v2289_v4  ;;  %v2578_v14 = vmul.f32 -1.442695, %v2291_v12 }
 0xba3   :  { %2770 = vpow2.f32 %v2577_v7 }
 0xba4   :  { %2772 = vpow2.f32 %v2578_v14 }
 0xbae   :  { %v2769_v15 = vpop.eup %2768 }
 0xbaf   :  { %v2295_v17 = vadd.f32 1.0, %v2769_v15 }
 0xbb0   :  { %v2771_v18 = vpop.eup %2770 }
 0xbb1   :  { %2774 = vrcp.f32 %v2295_v17  ;;  %v2301_v19 = vadd.f32 1.0, %v2771_v18  ;;  %v2773_v21 = vpop.eup %2772 }
 0xbb2   :  { %2776 = vtanh.f32 %v2290_v16  ;;  %v2308_v27 = vadd.f32 1.0, %v2773_v21 }
 0xbb3   :  { %2778 = vrcp.f32 %v2301_v19 }
 0xbb4   :  { %2780 = vrcp.f32 %v2308_v27 }
 0xbbe   :  { %v2775_v24 = vpop.eup %2774 }
 0xbbf   :  { %v2777_v25 = vpop.eup %2776 }
 0xbc0   :  { %v2779_v26 = vpop.eup %2778  ;;  %v2312_v28 = vmul.f32 %v2777_v25, %v2775_v24 }
 0xbc1   :  { %v2311_v29 = vmul.f32 %v2779_v26, %v4885_v31  ;;  %v2781_v63 = vpop.eup %2780  ;;  %v2581_v31 = vld [vmem:[%s4990_s2 + $0x88] sm:$0xff] }
 0xbc3   :  { %v2313_v30 = vadd.f32 %v2312_v28, %v2311_v29 }
 0xbc5   :  { %2782 = vtanh.f32 %v2313_v30 }
 0xbd2   :  { %v2783_v48 = vpop.eup %2782 }
 0xbd3   :  { %v2315_v34 = vmul.f32 %v2783_v48, %v2781_v63 }
 0xbd5   :  { %2579 = vst [vmem:[%s4991_s5 + $0x18] sm:$0xff] %v2315_v34  ;;  %2388 = vmatmul.mubr.f32.vlgmr.msra.gmra.mxu0 %v2315_v34  ;;  %2459 = vmatmul.mubr.f32.vlgmr.msra.gmra.mxu1 %v2315_v34 }
 0xc95   :  { %v2389_v37 = vpop.f32.mrf.mxu0  ;;  %v2460_v38 = vpop.f32.mrf.mxu1 }
 0xc96   :  { %v2465_v39 = vadd.f32 %v2580_v32, %v2389_v37  ;;  %v2467_v35 = vadd.f32 %v2582_v55, %v2460_v38 }
 0xc97   :  { %v2391_v44 = vpop.f32.mrf.mxu0  ;;  %v2462_v9 = vpop.f32.mrf.mxu1 }
 0xc98   :  { %v2584_v62 = vmul.f32 -1.442695, %v2465_v39  ;;  %v2466_v22 = vadd.f32 %v2581_v31, %v2391_v44  ;;  %v2468_v3 = vadd.f32 %v2583_v40, %v2462_v9 }
 0xc9a   :  { %2784 = vpow2.f32 %v2584_v62  ;;  %v2585_v33 = vmul.f32 -1.442695, %v2466_v22  ;;  %v2586_v36 = vmul.f32 -1.442695, %v2468_v3 }
 0xc9c   :  { %2786 = vpow2.f32 %v2585_v33 }
 0xc9d   :  { %2788 = vpow2.f32 %v2586_v36 }
 0xca7   :  { %v2785_v51 = vpop.eup %2784 }
 0xca8   :  { %v2472_v58 = vadd.f32 1.0, %v2785_v51 }
 0xca9   :  { %v2787_v23 = vpop.eup %2786 }
 0xcaa   :  { %2790 = vrcp.f32 %v2472_v58  ;;  %v2478_v46 = vadd.f32 1.0, %v2787_v23  ;;  %v2789_v50 = vpop.eup %2788 }
 0xcab   :  { %2792 = vtanh.f32 %v2467_v35  ;;  %v2485_v42 = vadd.f32 1.0, %v2789_v50 }
 0xcac   :  { %2794 = vrcp.f32 %v2478_v46 }
 0xcad   :  { %2796 = vrcp.f32 %v2485_v42 }
 0xcb7   :  { %v2791_v20 = vpop.eup %2790 }
 0xcb8   :  { %v2793_v52 = vpop.eup %2792 }
 0xcb9   :  { %v2795_v41 = vpop.eup %2794  ;;  %v2489_v10 = vmul.f32 %v2793_v52, %v2791_v20 }
 0xcba   :  { %v2488_v60 = vmul.f32 %v2795_v41, %v2313_v30  ;;  %v2797_v54 = vpop.eup %2796 }
 0xcbc   :  { %v2490_v43 = vadd.f32 %v2489_v10, %v2488_v60 }
 0xcbe   :  { %2798 = vtanh.f32 %v2490_v43 }
 0xccb   :  { %v2799_v57 = vpop.eup %2798 }
 0xccc   :  { %v2492_v56 = vmul.f32 %v2799_v57, %v2797_v54 }
 0xcce   :  { %2587 = vst [vmem:[%s4991_s5 + $0x20] sm:$0xff] %v2492_v56 }

</bundles_post_ra>
